<compile_context>
chip_gen: v7x
topology: tpu7x:2x2x1
jax: 0.10.0
libtpu: 0.0.40
codegen_flags: <defaults>
</compile_context>

<pallas_src>
import numpy as np

import jax
import jax.numpy as jnp
from jax import lax
from jax.experimental import pallas as pl
from jax.experimental.pallas import tpu as pltpu


_VMEM_LIMIT = 32 * 1024 * 1024  # well above the ~8 MiB footprint; safe on v5e/v6e/v7x


def _round_up(x, m):
    return ((x + m - 1) // m) * m


# ------------------------------ Pallas kernel ------------------------------ #

def _lenet_kernel(x_ref, w1e_ref, w1o_ref, b1_ref, w2e_ref, w2o_ref, b2_ref,
                  fw1_ref, fb1_ref, fw2_ref, fb2_ref, o_ref):
    """Whole CifarEncoder forward for one batch tile.

    x_ref : (TB*32, 96)   NHWC rows, lane index = w*3 + ci
    w1e/w1o : (5, 96, 84) banded conv1 weights (even / odd output column)
    w2e/w2o : (5, 84, 80) banded conv2 weights (even / odd output column)
    fw1   : (5, 80, 128)  fc1 weights per pooled conv2 row (padded 120->128)
    fw2   : (128, 84)     fc2 weights (padded rows)
    o_ref : (TB, 84)
    """
    R = x_ref.shape[0]          # TB * 32 rows (one image = 32 rows)
    TB = o_ref.shape[0]
    x = x_ref[...]

    def shift_up(a, k):
        # result[r] = a[(r + k) % R]; wrapped rows only ever land in positions
        # that are discarded (in-image row >= 28 / non-pooled rows), so the
        # circular wrap is harmless.
        if k == 0:
            return a
        return pltpu.roll(a, shift=(R - k) % R, axis=0)

    def band_conv(inp, we_ref, wo_ref, b_row, row_stride):
        # conv (5 KH taps as row-shifted banded matmuls) + bias + ReLU + 2x2 pool.
        acc_e = jnp.dot(inp, we_ref[0], preferred_element_type=jnp.float32)
        acc_o = jnp.dot(inp, wo_ref[0], preferred_element_type=jnp.float32)
        for kh in range(1, 5):
            s = shift_up(inp, kh * row_stride)
            acc_e += jnp.dot(s, we_ref[kh], preferred_element_type=jnp.float32)
            acc_o += jnp.dot(s, wo_ref[kh], preferred_element_type=jnp.float32)
        # W-pool (even vs odd output column), then bias + ReLU (commutes with max).
        z = jnp.maximum(jnp.maximum(acc_e, acc_o) + b_row, 0.0)
        # H-pool: partner row is `row_stride` rows further down.
        return jnp.maximum(z, shift_up(z, row_stride))

    # conv1 + ReLU + pool : valid at rows b*32 + 2*ph, lanes pw*6 + c   (84 lanes)
    p1 = band_conv(x, w1e_ref, w1o_ref, b1_ref[...], 1)
    # conv2 + ReLU + pool : valid at rows b*32 + 4*ph2, lanes pw2*16 + c (80 lanes)
    p2 = band_conv(p1, w2e_ref, w2o_ref, b2_ref[...], 2)

    # fc1: contract the 5 pooled conv2 rows per image via shifted matmuls.
    h = jnp.dot(p2, fw1_ref[0], preferred_element_type=jnp.float32)
    for ph2 in range(1, 5):
        h += jnp.dot(shift_up(p2, 4 * ph2), fw1_ref[ph2],
                     preferred_element_type=jnp.float32)
    h = jnp.maximum(h + fb1_ref[...], 0.0)                    # (R, 128), valid rows b*32
    y = jnp.maximum(jnp.dot(h, fw2_ref[...], preferred_element_type=jnp.float32)
                    + fb2_ref[...], 0.0)                      # (R, 84),  valid rows b*32

    # Compact valid rows {b*32} -> b with a tiny selection matmul (dense store).
    r_idx = lax.broadcasted_iota(jnp.int32, (TB, R), 1)
    b_idx = lax.broadcasted_iota(jnp.int32, (TB, R), 0)
    sel = (r_idx == b_idx * 32).astype(jnp.float32)
    o_ref[...] = jnp.dot(sel, y, preferred_element_type=jnp.float32)


# ---------------------------- parameter packing ----------------------------- #

def init_params(key):
    """Torch-layout parameters (OIHW convs, (out,in) Linear weights)."""
    ks = jax.random.split(key, 8)
    s = 0.05
    return {
        "conv1_w": s * jax.random.normal(ks[0], (6, 3, 5, 5), jnp.float32),
        "conv1_b": s * jax.random.normal(ks[1], (6,), jnp.float32),
        "conv2_w": s * jax.random.normal(ks[2], (16, 6, 5, 5), jnp.float32),
        "conv2_b": s * jax.random.normal(ks[3], (16,), jnp.float32),
        "fc1_w":   s * jax.random.normal(ks[4], (120, 400), jnp.float32),
        "fc1_b":   s * jax.random.normal(ks[5], (120,), jnp.float32),
        "fc2_w":   s * jax.random.normal(ks[6], (84, 120), jnp.float32),
        "fc2_b":   s * jax.random.normal(ks[7], (84,), jnp.float32),
    }


def _band(w_oihw, win, parity, n_pool):
    """Banded weight for conv over lanes (lane = w_in*Cin + ci).

    Output column block pw holds conv output column ow = 2*pw + parity, so the
    2x2 W-pool becomes an elementwise max of the even/odd banded results.
    Returns (5, win*Cin, n_pool*Cout), one slab per KH tap.
    """
    cout, cin = w_oihw.shape[0], w_oihw.shape[1]
    out = np.zeros((5, win * cin, n_pool * cout), np.float32)
    for kh in range(5):
        for pw in range(n_pool):
            ow = 2 * pw + parity
            for kw in range(5):
                w_in = ow + kw
                out[kh, w_in * cin:(w_in + 1) * cin,
                    pw * cout:(pw + 1) * cout] = w_oihw[:, :, kh, kw].T
    return out


def prepare_params(p):
    """One-time conversion of torch-layout params into kernel-ready matrices."""
    c1 = np.asarray(p["conv1_w"], np.float32)   # (6, 3, 5, 5)
    c2 = np.asarray(p["conv2_w"], np.float32)   # (16, 6, 5, 5)
    f1 = np.asarray(p["fc1_w"], np.float32)     # (120, 400)
    f2 = np.asarray(p["fc2_w"], np.float32)     # (84, 120)

    w1e, w1o = _band(c1, 32, 0, 14), _band(c1, 32, 1, 14)     # (5, 96, 84)
    w2e, w2o = _band(c2, 14, 0, 5), _band(c2, 14, 1, 5)       # (5, 84, 80)
    b1 = np.tile(np.asarray(p["conv1_b"], np.float32), 14)[None, :]   # (1, 84)
    b2 = np.tile(np.asarray(p["conv2_b"], np.float32), 5)[None, :]    # (1, 80)

    # fc1: torch flattens (C, H, W) of the (16, 5, 5) pooled map; our pooled
    # features sit at lane pw2*16 + c of pooled row ph2 -> fold that mapping in.
    fw1 = np.zeros((5, 80, 128), np.float32)
    for ph2 in range(5):
        for pw2 in range(5):
            for c in range(16):
                fw1[ph2, pw2 * 16 + c, :120] = f1[:, c * 25 + ph2 * 5 + pw2]
    fb1 = np.zeros((1, 128), np.float32)
    fb1[0, :120] = np.asarray(p["fc1_b"], np.float32)

    fw2 = np.zeros((128, 84), np.float32)
    fw2[:120, :] = f2.T
    fb2 = np.asarray(p["fc2_b"], np.float32)[None, :]          # (1, 84)

    packed = dict(w1e=w1e, w1o=w1o, b1=b1, w2e=w2e, w2o=w2o, b2=b2,
                  fw1=fw1, fb1=fb1, fw2=fw2, fb2=fb2)
    return {k: jnp.asarray(v) for k, v in packed.items()}


# ------------------------------- forward pass ------------------------------- #

@jax.jit
def cifar_encoder_forward(x_nchw, kp):
    N = x_nchw.shape[0]
    # Batch tile: multiple of 8, capped at 16, and chosen so that N>=16 gives
    # >=2 grid steps (lets v7x shard the "parallel" grid axis over both TCs).
    TB = min(16, _round_up(max(1, (N + 1) // 2), 8))
    Np = _round_up(N, TB)
    R = TB * 32

    # One fused XLA pass: f32 cast + NCHW->NHWC + flatten (W,C) into 96 lanes.
    x = jnp.transpose(x_nchw.astype(jnp.float32), (0, 2, 3, 1)).reshape(N * 32, 96)
    if Np != N:
        x = jnp.pad(x, ((0, (Np - N) * 32), (0, 0)))

    dot_flops_per_row = 2 * (10 * 96 * 84 + 10 * 84 * 80 + 5 * 80 * 128 + 128 * 84)
    weight_bytes = 4 * (2 * 5 * 96 * 84 + 2 * 5 * 84 * 80 + 5 * 80 * 128
                        + 128 * 84 + 84 + 80 + 128 + 84)
    cost = pl.CostEstimate(
        flops=Np * 32 * dot_flops_per_row + 2 * Np * TB * 32 * 84,
        transcendentals=0,
        bytes_accessed=4 * (Np * 32 * 96 + Np * 84) + weight_bytes)

    out = pl.pallas_call(
        _lenet_kernel,
        out_shape=jax.ShapeDtypeStruct((Np, 84), jnp.float32),
        grid=(Np // TB,),
        in_specs=[
            pl.BlockSpec((R, 96), lambda i: (i, 0)),              # x rows
            pl.BlockSpec((5, 96, 84), lambda i: (0, 0, 0)),       # w1 even
            pl.BlockSpec((5, 96, 84), lambda i: (0, 0, 0)),       # w1 odd
            pl.BlockSpec((1, 84), lambda i: (0, 0)),              # b1 (tiled)
            pl.BlockSpec((5, 84, 80), lambda i: (0, 0, 0)),       # w2 even
            pl.BlockSpec((5, 84, 80), lambda i: (0, 0, 0)),       # w2 odd
            pl.BlockSpec((1, 80), lambda i: (0, 0)),              # b2 (tiled)
            pl.BlockSpec((5, 80, 128), lambda i: (0, 0, 0)),      # fc1 (per pooled row)
            pl.BlockSpec((1, 128), lambda i: (0, 0)),             # fc1 bias (padded)
            pl.BlockSpec((128, 84), lambda i: (0, 0)),            # fc2
            pl.BlockSpec((1, 84), lambda i: (0, 0)),              # fc2 bias
        ],
        out_specs=pl.BlockSpec((TB, 84), lambda i: (i, 0)),
        compiler_params=pltpu.CompilerParams(
            dimension_semantics=("parallel",),
            vmem_limit_bytes=_VMEM_LIMIT),
        cost_estimate=cost,
    )(x, kp["w1e"], kp["w1o"], kp["b1"], kp["w2e"], kp["w2o"], kp["b2"],
      kp["fw1"], kp["fb1"], kp["fw2"], kp["fb2"])

    return out[:N] if Np != N else out


# ---------------------------- pure-JAX reference ---------------------------- #

def _reference_forward(x_nchw, p):
    hi = lax.Precision.HIGHEST
    dn = lax.conv_dimension_numbers(x_nchw.shape, p["conv1_w"].shape,
                                    ("NCHW", "OIHW", "NCHW"))
    x = lax.conv_general_dilated(x_nchw, p["conv1_w"], (1, 1), "VALID",
                                 dimension_numbers=dn, precision=hi)
    x = jnp.maximum(x + p["conv1_b"][None, :, None, None], 0.0)
    x = lax.reduce_window(x, -jnp.inf, lax.max, (1, 1, 2, 2), (1, 1, 2, 2), "VALID")
    x = lax.conv_general_dilated(x, p["conv2_w"], (1, 1), "VALID",
                                 dimension_numbers=dn, precision=hi)
    x = jnp.maximum(x + p["conv2_b"][None, :, None, None], 0.0)
    x = lax.reduce_window(x, -jnp.inf, lax.max, (1, 1, 2, 2), (1, 1, 2, 2), "VALID")
    x = x.reshape(x.shape[0], 400)
    x = jnp.maximum(jnp.dot(x, p["fc1_w"].T, precision=hi) + p["fc1_b"], 0.0)
    x = jnp.maximum(jnp.dot(x, p["fc2_w"].T, precision=hi) + p["fc2_b"], 0.0)
    return x


if __name__ == "__main__":
    key = jax.random.PRNGKey(0)
    kx, kparam = jax.random.split(key)
    # CIFAR-shaped input (the forward's view(-1, 16*5*5) requires 3x32x32).
    x = jax.random.normal(kx, (2, 3, 32, 32), jnp.float32)
    params = init_params(kparam)
    kernel_params = prepare_params(params)   # one-time weight packing (outside jit)

    out = cifar_encoder_forward(x, kernel_params)
    out = jax.block_until_ready(out)
    assert out.shape == (2, 84), out.shape

    ref = _reference_forward(x, params)
    err = float(jnp.max(jnp.abs(out - ref)))
    assert jnp.allclose(out, ref, atol=1e-2, rtol=1e-2), f"mismatch vs reference: {err}"

    print("KERNEL_OK")
</pallas_src>

<mosaic_0001>
module attributes {stable_mosaic.version = 11 : i64} {
  func.func @_lenet_kernel(%arg0: i32, %arg1: memref<256x96xf32, #tpu.memory_space<vmem>>, %arg2: memref<5x96x84xf32, #tpu.memory_space<vmem>>, %arg3: memref<5x96x84xf32, #tpu.memory_space<vmem>>, %arg4: memref<1x84xf32, #tpu.memory_space<vmem>>, %arg5: memref<5x84x80xf32, #tpu.memory_space<vmem>>, %arg6: memref<5x84x80xf32, #tpu.memory_space<vmem>>, %arg7: memref<1x80xf32, #tpu.memory_space<vmem>>, %arg8: memref<5x80x128xf32, #tpu.memory_space<vmem>>, %arg9: memref<1x128xf32, #tpu.memory_space<vmem>>, %arg10: memref<128x84xf32, #tpu.memory_space<vmem>>, %arg11: memref<1x84xf32, #tpu.memory_space<vmem>>, %arg12: memref<8x84xf32, #tpu.memory_space<vmem>>) attributes {dimension_semantics = [#tpu.dimension_semantics<parallel>], iteration_bounds = array<i64: 1>, scalar_prefetch = 0 : i64, scratch_operands = 0 : i64, tpu.core_type = #tpu.core_type<tc>, window_params = [{transform_indices = @transform_0, window_bounds = array<i64: 256, 96>}, {pipeline_mode = #tpu.pipeline_mode<synchronous>, transform_indices = @transform_1, window_bounds = array<i64: 5, 96, 84>}, {pipeline_mode = #tpu.pipeline_mode<synchronous>, transform_indices = @transform_2, window_bounds = array<i64: 5, 96, 84>}, {pipeline_mode = #tpu.pipeline_mode<synchronous>, transform_indices = @transform_3, window_bounds = array<i64: 1, 84>}, {pipeline_mode = #tpu.pipeline_mode<synchronous>, transform_indices = @transform_4, window_bounds = array<i64: 5, 84, 80>}, {pipeline_mode = #tpu.pipeline_mode<synchronous>, transform_indices = @transform_5, window_bounds = array<i64: 5, 84, 80>}, {pipeline_mode = #tpu.pipeline_mode<synchronous>, transform_indices = @transform_6, window_bounds = array<i64: 1, 80>}, {pipeline_mode = #tpu.pipeline_mode<synchronous>, transform_indices = @transform_7, window_bounds = array<i64: 5, 80, 128>}, {pipeline_mode = #tpu.pipeline_mode<synchronous>, transform_indices = @transform_8, window_bounds = array<i64: 1, 128>}, {pipeline_mode = #tpu.pipeline_mode<synchronous>, transform_indices = @transform_9, window_bounds = array<i64: 128, 84>}, {pipeline_mode = #tpu.pipeline_mode<synchronous>, transform_indices = @transform_10, window_bounds = array<i64: 1, 84>}, {transform_indices = @transform_11, window_bounds = array<i64: 8, 84>}]} {
    %c0 = arith.constant 0 : index
    %c0_0 = arith.constant 0 : index
    %0 = vector.load %arg1[%c0, %c0_0] : memref<256x96xf32, #tpu.memory_space<vmem>>, vector<256x96xf32>
    %c0_1 = arith.constant 0 : index
    %c0_2 = arith.constant 0 : index
    %1 = vector.load %arg4[%c0_1, %c0_2] : memref<1x84xf32, #tpu.memory_space<vmem>>, vector<1x84xf32>
    %c0_3 = arith.constant 0 : index
    %c0_4 = arith.constant 0 : index
    %c0_5 = arith.constant 0 : index
    %2 = vector.load %arg2[%c0_3, %c0_4, %c0_5] : memref<5x96x84xf32, #tpu.memory_space<vmem>>, vector<1x96x84xf32>
    %3 = vector.shape_cast %2 : vector<1x96x84xf32> to vector<96x84xf32>
    %cst = arith.constant dense<0.000000e+00> : vector<256x84xf32>
    %4 = tpu.matmul %0, %3, %cst {dimension_numbers = #tpu.dot_dimension_numbers<[1], [0], [0], [1], [0, 0, 1, 1], [], []>} : vector<256x96xf32>, vector<96x84xf32>, vector<256x84xf32> -> vector<256x84xf32>
    %c0_6 = arith.constant 0 : index
    %c0_7 = arith.constant 0 : index
    %c0_8 = arith.constant 0 : index
    %5 = vector.load %arg3[%c0_6, %c0_7, %c0_8] : memref<5x96x84xf32, #tpu.memory_space<vmem>>, vector<1x96x84xf32>
    %6 = vector.shape_cast %5 : vector<1x96x84xf32> to vector<96x84xf32>
    %cst_9 = arith.constant dense<0.000000e+00> : vector<256x84xf32>
    %7 = tpu.matmul %0, %6, %cst_9 {dimension_numbers = #tpu.dot_dimension_numbers<[1], [0], [0], [1], [0, 0, 1, 1], [], []>} : vector<256x96xf32>, vector<96x84xf32>, vector<256x84xf32> -> vector<256x84xf32>
    %c255_i32 = arith.constant 255 : i32
    %8 = tpu.dynamic_rotate %0 by %c255_i32 dim 0 : vector<256x96xf32>, i32 -> vector<256x96xf32>
    %c1 = arith.constant 1 : index
    %c0_10 = arith.constant 0 : index
    %c0_11 = arith.constant 0 : index
    %9 = vector.load %arg2[%c1, %c0_10, %c0_11] : memref<5x96x84xf32, #tpu.memory_space<vmem>>, vector<1x96x84xf32>
    %10 = vector.shape_cast %9 : vector<1x96x84xf32> to vector<96x84xf32>
    %cst_12 = arith.constant dense<0.000000e+00> : vector<256x84xf32>
    %11 = tpu.matmul %8, %10, %cst_12 {dimension_numbers = #tpu.dot_dimension_numbers<[1], [0], [0], [1], [0, 0, 1, 1], [], []>} : vector<256x96xf32>, vector<96x84xf32>, vector<256x84xf32> -> vector<256x84xf32>
    %12 = arith.addf %4, %11 : vector<256x84xf32>
    %c1_13 = arith.constant 1 : index
    %c0_14 = arith.constant 0 : index
    %c0_15 = arith.constant 0 : index
    %13 = vector.load %arg3[%c1_13, %c0_14, %c0_15] : memref<5x96x84xf32, #tpu.memory_space<vmem>>, vector<1x96x84xf32>
    %14 = vector.shape_cast %13 : vector<1x96x84xf32> to vector<96x84xf32>
    %cst_16 = arith.constant dense<0.000000e+00> : vector<256x84xf32>
    %15 = tpu.matmul %8, %14, %cst_16 {dimension_numbers = #tpu.dot_dimension_numbers<[1], [0], [0], [1], [0, 0, 1, 1], [], []>} : vector<256x96xf32>, vector<96x84xf32>, vector<256x84xf32> -> vector<256x84xf32>
    %16 = arith.addf %7, %15 : vector<256x84xf32>
    %c254_i32 = arith.constant 254 : i32
    %17 = tpu.dynamic_rotate %0 by %c254_i32 dim 0 : vector<256x96xf32>, i32 -> vector<256x96xf32>
    %c2 = arith.constant 2 : index
    %c0_17 = arith.constant 0 : index
    %c0_18 = arith.constant 0 : index
    %18 = vector.load %arg2[%c2, %c0_17, %c0_18] : memref<5x96x84xf32, #tpu.memory_space<vmem>>, vector<1x96x84xf32>
    %19 = vector.shape_cast %18 : vector<1x96x84xf32> to vector<96x84xf32>
    %cst_19 = arith.constant dense<0.000000e+00> : vector<256x84xf32>
    %20 = tpu.matmul %17, %19, %cst_19 {dimension_numbers = #tpu.dot_dimension_numbers<[1], [0], [0], [1], [0, 0, 1, 1], [], []>} : vector<256x96xf32>, vector<96x84xf32>, vector<256x84xf32> -> vector<256x84xf32>
    %21 = arith.addf %12, %20 : vector<256x84xf32>
    %c2_20 = arith.constant 2 : index
    %c0_21 = arith.constant 0 : index
    %c0_22 = arith.constant 0 : index
    %22 = vector.load %arg3[%c2_20, %c0_21, %c0_22] : memref<5x96x84xf32, #tpu.memory_space<vmem>>, vector<1x96x84xf32>
    %23 = vector.shape_cast %22 : vector<1x96x84xf32> to vector<96x84xf32>
    %cst_23 = arith.constant dense<0.000000e+00> : vector<256x84xf32>
    %24 = tpu.matmul %17, %23, %cst_23 {dimension_numbers = #tpu.dot_dimension_numbers<[1], [0], [0], [1], [0, 0, 1, 1], [], []>} : vector<256x96xf32>, vector<96x84xf32>, vector<256x84xf32> -> vector<256x84xf32>
    %25 = arith.addf %16, %24 : vector<256x84xf32>
    %c253_i32 = arith.constant 253 : i32
    %26 = tpu.dynamic_rotate %0 by %c253_i32 dim 0 : vector<256x96xf32>, i32 -> vector<256x96xf32>
    %c3 = arith.constant 3 : index
    %c0_24 = arith.constant 0 : index
    %c0_25 = arith.constant 0 : index
    %27 = vector.load %arg2[%c3, %c0_24, %c0_25] : memref<5x96x84xf32, #tpu.memory_space<vmem>>, vector<1x96x84xf32>
    %28 = vector.shape_cast %27 : vector<1x96x84xf32> to vector<96x84xf32>
    %cst_26 = arith.constant dense<0.000000e+00> : vector<256x84xf32>
    %29 = tpu.matmul %26, %28, %cst_26 {dimension_numbers = #tpu.dot_dimension_numbers<[1], [0], [0], [1], [0, 0, 1, 1], [], []>} : vector<256x96xf32>, vector<96x84xf32>, vector<256x84xf32> -> vector<256x84xf32>
    %30 = arith.addf %21, %29 : vector<256x84xf32>
    %c3_27 = arith.constant 3 : index
    %c0_28 = arith.constant 0 : index
    %c0_29 = arith.constant 0 : index
    %31 = vector.load %arg3[%c3_27, %c0_28, %c0_29] : memref<5x96x84xf32, #tpu.memory_space<vmem>>, vector<1x96x84xf32>
    %32 = vector.shape_cast %31 : vector<1x96x84xf32> to vector<96x84xf32>
    %cst_30 = arith.constant dense<0.000000e+00> : vector<256x84xf32>
    %33 = tpu.matmul %26, %32, %cst_30 {dimension_numbers = #tpu.dot_dimension_numbers<[1], [0], [0], [1], [0, 0, 1, 1], [], []>} : vector<256x96xf32>, vector<96x84xf32>, vector<256x84xf32> -> vector<256x84xf32>
    %34 = arith.addf %25, %33 : vector<256x84xf32>
    %c252_i32 = arith.constant 252 : i32
    %35 = tpu.dynamic_rotate %0 by %c252_i32 dim 0 : vector<256x96xf32>, i32 -> vector<256x96xf32>
    %c4 = arith.constant 4 : index
    %c0_31 = arith.constant 0 : index
    %c0_32 = arith.constant 0 : index
    %36 = vector.load %arg2[%c4, %c0_31, %c0_32] : memref<5x96x84xf32, #tpu.memory_space<vmem>>, vector<1x96x84xf32>
    %37 = vector.shape_cast %36 : vector<1x96x84xf32> to vector<96x84xf32>
    %cst_33 = arith.constant dense<0.000000e+00> : vector<256x84xf32>
    %38 = tpu.matmul %35, %37, %cst_33 {dimension_numbers = #tpu.dot_dimension_numbers<[1], [0], [0], [1], [0, 0, 1, 1], [], []>} : vector<256x96xf32>, vector<96x84xf32>, vector<256x84xf32> -> vector<256x84xf32>
    %39 = arith.addf %30, %38 : vector<256x84xf32>
    %c4_34 = arith.constant 4 : index
    %c0_35 = arith.constant 0 : index
    %c0_36 = arith.constant 0 : index
    %40 = vector.load %arg3[%c4_34, %c0_35, %c0_36] : memref<5x96x84xf32, #tpu.memory_space<vmem>>, vector<1x96x84xf32>
    %41 = vector.shape_cast %40 : vector<1x96x84xf32> to vector<96x84xf32>
    %cst_37 = arith.constant dense<0.000000e+00> : vector<256x84xf32>
    %42 = tpu.matmul %35, %41, %cst_37 {dimension_numbers = #tpu.dot_dimension_numbers<[1], [0], [0], [1], [0, 0, 1, 1], [], []>} : vector<256x96xf32>, vector<96x84xf32>, vector<256x84xf32> -> vector<256x84xf32>
    %43 = arith.addf %34, %42 : vector<256x84xf32>
    %44 = arith.maximumf %39, %43 : vector<256x84xf32>
    %45 = vector.broadcast %1 : vector<1x84xf32> to vector<256x84xf32>
    %46 = arith.addf %44, %45 : vector<256x84xf32>
    %cst_38 = arith.constant 0.000000e+00 : f32
    %47 = vector.broadcast %cst_38 : f32 to vector<256x84xf32>
    %48 = arith.maximumf %46, %47 : vector<256x84xf32>
    %c255_i32_39 = arith.constant 255 : i32
    %49 = tpu.dynamic_rotate %48 by %c255_i32_39 dim 0 : vector<256x84xf32>, i32 -> vector<256x84xf32>
    %50 = arith.maximumf %48, %49 : vector<256x84xf32>
    %c0_40 = arith.constant 0 : index
    %c0_41 = arith.constant 0 : index
    %51 = vector.load %arg7[%c0_40, %c0_41] : memref<1x80xf32, #tpu.memory_space<vmem>>, vector<1x80xf32>
    %c0_42 = arith.constant 0 : index
    %c0_43 = arith.constant 0 : index
    %c0_44 = arith.constant 0 : index
    %52 = vector.load %arg5[%c0_42, %c0_43, %c0_44] : memref<5x84x80xf32, #tpu.memory_space<vmem>>, vector<1x84x80xf32>
    %53 = vector.shape_cast %52 : vector<1x84x80xf32> to vector<84x80xf32>
    %cst_45 = arith.constant dense<0.000000e+00> : vector<256x80xf32>
    %54 = tpu.matmul %50, %53, %cst_45 {dimension_numbers = #tpu.dot_dimension_numbers<[1], [0], [0], [1], [0, 0, 1, 1], [], []>} : vector<256x84xf32>, vector<84x80xf32>, vector<256x80xf32> -> vector<256x80xf32>
    %c0_46 = arith.constant 0 : index
    %c0_47 = arith.constant 0 : index
    %c0_48 = arith.constant 0 : index
    %55 = vector.load %arg6[%c0_46, %c0_47, %c0_48] : memref<5x84x80xf32, #tpu.memory_space<vmem>>, vector<1x84x80xf32>
    %56 = vector.shape_cast %55 : vector<1x84x80xf32> to vector<84x80xf32>
    %cst_49 = arith.constant dense<0.000000e+00> : vector<256x80xf32>
    %57 = tpu.matmul %50, %56, %cst_49 {dimension_numbers = #tpu.dot_dimension_numbers<[1], [0], [0], [1], [0, 0, 1, 1], [], []>} : vector<256x84xf32>, vector<84x80xf32>, vector<256x80xf32> -> vector<256x80xf32>
    %c254_i32_50 = arith.constant 254 : i32
    %58 = tpu.dynamic_rotate %50 by %c254_i32_50 dim 0 : vector<256x84xf32>, i32 -> vector<256x84xf32>
    %c1_51 = arith.constant 1 : index
    %c0_52 = arith.constant 0 : index
    %c0_53 = arith.constant 0 : index
    %59 = vector.load %arg5[%c1_51, %c0_52, %c0_53] : memref<5x84x80xf32, #tpu.memory_space<vmem>>, vector<1x84x80xf32>
    %60 = vector.shape_cast %59 : vector<1x84x80xf32> to vector<84x80xf32>
    %cst_54 = arith.constant dense<0.000000e+00> : vector<256x80xf32>
    %61 = tpu.matmul %58, %60, %cst_54 {dimension_numbers = #tpu.dot_dimension_numbers<[1], [0], [0], [1], [0, 0, 1, 1], [], []>} : vector<256x84xf32>, vector<84x80xf32>, vector<256x80xf32> -> vector<256x80xf32>
    %62 = arith.addf %54, %61 : vector<256x80xf32>
    %c1_55 = arith.constant 1 : index
    %c0_56 = arith.constant 0 : index
    %c0_57 = arith.constant 0 : index
    %63 = vector.load %arg6[%c1_55, %c0_56, %c0_57] : memref<5x84x80xf32, #tpu.memory_space<vmem>>, vector<1x84x80xf32>
    %64 = vector.shape_cast %63 : vector<1x84x80xf32> to vector<84x80xf32>
    %cst_58 = arith.constant dense<0.000000e+00> : vector<256x80xf32>
    %65 = tpu.matmul %58, %64, %cst_58 {dimension_numbers = #tpu.dot_dimension_numbers<[1], [0], [0], [1], [0, 0, 1, 1], [], []>} : vector<256x84xf32>, vector<84x80xf32>, vector<256x80xf32> -> vector<256x80xf32>
    %66 = arith.addf %57, %65 : vector<256x80xf32>
    %c252_i32_59 = arith.constant 252 : i32
    %67 = tpu.dynamic_rotate %50 by %c252_i32_59 dim 0 : vector<256x84xf32>, i32 -> vector<256x84xf32>
    %c2_60 = arith.constant 2 : index
    %c0_61 = arith.constant 0 : index
    %c0_62 = arith.constant 0 : index
    %68 = vector.load %arg5[%c2_60, %c0_61, %c0_62] : memref<5x84x80xf32, #tpu.memory_space<vmem>>, vector<1x84x80xf32>
    %69 = vector.shape_cast %68 : vector<1x84x80xf32> to vector<84x80xf32>
    %cst_63 = arith.constant dense<0.000000e+00> : vector<256x80xf32>
    %70 = tpu.matmul %67, %69, %cst_63 {dimension_numbers = #tpu.dot_dimension_numbers<[1], [0], [0], [1], [0, 0, 1, 1], [], []>} : vector<256x84xf32>, vector<84x80xf32>, vector<256x80xf32> -> vector<256x80xf32>
    %71 = arith.addf %62, %70 : vector<256x80xf32>
    %c2_64 = arith.constant 2 : index
    %c0_65 = arith.constant 0 : index
    %c0_66 = arith.constant 0 : index
    %72 = vector.load %arg6[%c2_64, %c0_65, %c0_66] : memref<5x84x80xf32, #tpu.memory_space<vmem>>, vector<1x84x80xf32>
    %73 = vector.shape_cast %72 : vector<1x84x80xf32> to vector<84x80xf32>
    %cst_67 = arith.constant dense<0.000000e+00> : vector<256x80xf32>
    %74 = tpu.matmul %67, %73, %cst_67 {dimension_numbers = #tpu.dot_dimension_numbers<[1], [0], [0], [1], [0, 0, 1, 1], [], []>} : vector<256x84xf32>, vector<84x80xf32>, vector<256x80xf32> -> vector<256x80xf32>
    %75 = arith.addf %66, %74 : vector<256x80xf32>
    %c250_i32 = arith.constant 250 : i32
    %76 = tpu.dynamic_rotate %50 by %c250_i32 dim 0 : vector<256x84xf32>, i32 -> vector<256x84xf32>
    %c3_68 = arith.constant 3 : index
    %c0_69 = arith.constant 0 : index
    %c0_70 = arith.constant 0 : index
    %77 = vector.load %arg5[%c3_68, %c0_69, %c0_70] : memref<5x84x80xf32, #tpu.memory_space<vmem>>, vector<1x84x80xf32>
    %78 = vector.shape_cast %77 : vector<1x84x80xf32> to vector<84x80xf32>
    %cst_71 = arith.constant dense<0.000000e+00> : vector<256x80xf32>
    %79 = tpu.matmul %76, %78, %cst_71 {dimension_numbers = #tpu.dot_dimension_numbers<[1], [0], [0], [1], [0, 0, 1, 1], [], []>} : vector<256x84xf32>, vector<84x80xf32>, vector<256x80xf32> -> vector<256x80xf32>
    %80 = arith.addf %71, %79 : vector<256x80xf32>
    %c3_72 = arith.constant 3 : index
    %c0_73 = arith.constant 0 : index
    %c0_74 = arith.constant 0 : index
    %81 = vector.load %arg6[%c3_72, %c0_73, %c0_74] : memref<5x84x80xf32, #tpu.memory_space<vmem>>, vector<1x84x80xf32>
    %82 = vector.shape_cast %81 : vector<1x84x80xf32> to vector<84x80xf32>
    %cst_75 = arith.constant dense<0.000000e+00> : vector<256x80xf32>
    %83 = tpu.matmul %76, %82, %cst_75 {dimension_numbers = #tpu.dot_dimension_numbers<[1], [0], [0], [1], [0, 0, 1, 1], [], []>} : vector<256x84xf32>, vector<84x80xf32>, vector<256x80xf32> -> vector<256x80xf32>
    %84 = arith.addf %75, %83 : vector<256x80xf32>
    %c248_i32 = arith.constant 248 : i32
    %85 = tpu.dynamic_rotate %50 by %c248_i32 dim 0 : vector<256x84xf32>, i32 -> vector<256x84xf32>
    %c4_76 = arith.constant 4 : index
    %c0_77 = arith.constant 0 : index
    %c0_78 = arith.constant 0 : index
    %86 = vector.load %arg5[%c4_76, %c0_77, %c0_78] : memref<5x84x80xf32, #tpu.memory_space<vmem>>, vector<1x84x80xf32>
    %87 = vector.shape_cast %86 : vector<1x84x80xf32> to vector<84x80xf32>
    %cst_79 = arith.constant dense<0.000000e+00> : vector<256x80xf32>
    %88 = tpu.matmul %85, %87, %cst_79 {dimension_numbers = #tpu.dot_dimension_numbers<[1], [0], [0], [1], [0, 0, 1, 1], [], []>} : vector<256x84xf32>, vector<84x80xf32>, vector<256x80xf32> -> vector<256x80xf32>
    %89 = arith.addf %80, %88 : vector<256x80xf32>
    %c4_80 = arith.constant 4 : index
    %c0_81 = arith.constant 0 : index
    %c0_82 = arith.constant 0 : index
    %90 = vector.load %arg6[%c4_80, %c0_81, %c0_82] : memref<5x84x80xf32, #tpu.memory_space<vmem>>, vector<1x84x80xf32>
    %91 = vector.shape_cast %90 : vector<1x84x80xf32> to vector<84x80xf32>
    %cst_83 = arith.constant dense<0.000000e+00> : vector<256x80xf32>
    %92 = tpu.matmul %85, %91, %cst_83 {dimension_numbers = #tpu.dot_dimension_numbers<[1], [0], [0], [1], [0, 0, 1, 1], [], []>} : vector<256x84xf32>, vector<84x80xf32>, vector<256x80xf32> -> vector<256x80xf32>
    %93 = arith.addf %84, %92 : vector<256x80xf32>
    %94 = arith.maximumf %89, %93 : vector<256x80xf32>
    %95 = vector.broadcast %51 : vector<1x80xf32> to vector<256x80xf32>
    %96 = arith.addf %94, %95 : vector<256x80xf32>
    %cst_84 = arith.constant 0.000000e+00 : f32
    %97 = vector.broadcast %cst_84 : f32 to vector<256x80xf32>
    %98 = arith.maximumf %96, %97 : vector<256x80xf32>
    %c254_i32_85 = arith.constant 254 : i32
    %99 = tpu.dynamic_rotate %98 by %c254_i32_85 dim 0 : vector<256x80xf32>, i32 -> vector<256x80xf32>
    %100 = arith.maximumf %98, %99 : vector<256x80xf32>
    %c0_86 = arith.constant 0 : index
    %c0_87 = arith.constant 0 : index
    %c0_88 = arith.constant 0 : index
    %101 = vector.load %arg8[%c0_86, %c0_87, %c0_88] : memref<5x80x128xf32, #tpu.memory_space<vmem>>, vector<1x80x128xf32>
    %102 = vector.shape_cast %101 : vector<1x80x128xf32> to vector<80x128xf32>
    %cst_89 = arith.constant dense<0.000000e+00> : vector<256x128xf32>
    %103 = tpu.matmul %100, %102, %cst_89 {dimension_numbers = #tpu.dot_dimension_numbers<[1], [0], [0], [1], [0, 0, 1, 1], [], []>} : vector<256x80xf32>, vector<80x128xf32>, vector<256x128xf32> -> vector<256x128xf32>
    %c252_i32_90 = arith.constant 252 : i32
    %104 = tpu.dynamic_rotate %100 by %c252_i32_90 dim 0 : vector<256x80xf32>, i32 -> vector<256x80xf32>
    %c1_91 = arith.constant 1 : index
    %c0_92 = arith.constant 0 : index
    %c0_93 = arith.constant 0 : index
    %105 = vector.load %arg8[%c1_91, %c0_92, %c0_93] : memref<5x80x128xf32, #tpu.memory_space<vmem>>, vector<1x80x128xf32>
    %106 = vector.shape_cast %105 : vector<1x80x128xf32> to vector<80x128xf32>
    %cst_94 = arith.constant dense<0.000000e+00> : vector<256x128xf32>
    %107 = tpu.matmul %104, %106, %cst_94 {dimension_numbers = #tpu.dot_dimension_numbers<[1], [0], [0], [1], [0, 0, 1, 1], [], []>} : vector<256x80xf32>, vector<80x128xf32>, vector<256x128xf32> -> vector<256x128xf32>
    %108 = arith.addf %103, %107 : vector<256x128xf32>
    %c248_i32_95 = arith.constant 248 : i32
    %109 = tpu.dynamic_rotate %100 by %c248_i32_95 dim 0 : vector<256x80xf32>, i32 -> vector<256x80xf32>
    %c2_96 = arith.constant 2 : index
    %c0_97 = arith.constant 0 : index
    %c0_98 = arith.constant 0 : index
    %110 = vector.load %arg8[%c2_96, %c0_97, %c0_98] : memref<5x80x128xf32, #tpu.memory_space<vmem>>, vector<1x80x128xf32>
    %111 = vector.shape_cast %110 : vector<1x80x128xf32> to vector<80x128xf32>
    %cst_99 = arith.constant dense<0.000000e+00> : vector<256x128xf32>
    %112 = tpu.matmul %109, %111, %cst_99 {dimension_numbers = #tpu.dot_dimension_numbers<[1], [0], [0], [1], [0, 0, 1, 1], [], []>} : vector<256x80xf32>, vector<80x128xf32>, vector<256x128xf32> -> vector<256x128xf32>
    %113 = arith.addf %108, %112 : vector<256x128xf32>
    %c244_i32 = arith.constant 244 : i32
    %114 = tpu.dynamic_rotate %100 by %c244_i32 dim 0 : vector<256x80xf32>, i32 -> vector<256x80xf32>
    %c3_100 = arith.constant 3 : index
    %c0_101 = arith.constant 0 : index
    %c0_102 = arith.constant 0 : index
    %115 = vector.load %arg8[%c3_100, %c0_101, %c0_102] : memref<5x80x128xf32, #tpu.memory_space<vmem>>, vector<1x80x128xf32>
    %116 = vector.shape_cast %115 : vector<1x80x128xf32> to vector<80x128xf32>
    %cst_103 = arith.constant dense<0.000000e+00> : vector<256x128xf32>
    %117 = tpu.matmul %114, %116, %cst_103 {dimension_numbers = #tpu.dot_dimension_numbers<[1], [0], [0], [1], [0, 0, 1, 1], [], []>} : vector<256x80xf32>, vector<80x128xf32>, vector<256x128xf32> -> vector<256x128xf32>
    %118 = arith.addf %113, %117 : vector<256x128xf32>
    %c240_i32 = arith.constant 240 : i32
    %119 = tpu.dynamic_rotate %100 by %c240_i32 dim 0 : vector<256x80xf32>, i32 -> vector<256x80xf32>
    %c4_104 = arith.constant 4 : index
    %c0_105 = arith.constant 0 : index
    %c0_106 = arith.constant 0 : index
    %120 = vector.load %arg8[%c4_104, %c0_105, %c0_106] : memref<5x80x128xf32, #tpu.memory_space<vmem>>, vector<1x80x128xf32>
    %121 = vector.shape_cast %120 : vector<1x80x128xf32> to vector<80x128xf32>
    %cst_107 = arith.constant dense<0.000000e+00> : vector<256x128xf32>
    %122 = tpu.matmul %119, %121, %cst_107 {dimension_numbers = #tpu.dot_dimension_numbers<[1], [0], [0], [1], [0, 0, 1, 1], [], []>} : vector<256x80xf32>, vector<80x128xf32>, vector<256x128xf32> -> vector<256x128xf32>
    %123 = arith.addf %118, %122 : vector<256x128xf32>
    %c0_108 = arith.constant 0 : index
    %c0_109 = arith.constant 0 : index
    %124 = vector.load %arg9[%c0_108, %c0_109] : memref<1x128xf32, #tpu.memory_space<vmem>>, vector<1x128xf32>
    %125 = vector.broadcast %124 : vector<1x128xf32> to vector<256x128xf32>
    %126 = arith.addf %123, %125 : vector<256x128xf32>
    %cst_110 = arith.constant 0.000000e+00 : f32
    %127 = vector.broadcast %cst_110 : f32 to vector<256x128xf32>
    %128 = arith.maximumf %126, %127 : vector<256x128xf32>
    %c0_111 = arith.constant 0 : index
    %c0_112 = arith.constant 0 : index
    %129 = vector.load %arg10[%c0_111, %c0_112] : memref<128x84xf32, #tpu.memory_space<vmem>>, vector<128x84xf32>
    %cst_113 = arith.constant dense<0.000000e+00> : vector<256x84xf32>
    %130 = tpu.matmul %128, %129, %cst_113 {dimension_numbers = #tpu.dot_dimension_numbers<[1], [0], [0], [1], [0, 0, 1, 1], [], []>} : vector<256x128xf32>, vector<128x84xf32>, vector<256x84xf32> -> vector<256x84xf32>
    %c0_114 = arith.constant 0 : index
    %c0_115 = arith.constant 0 : index
    %131 = vector.load %arg11[%c0_114, %c0_115] : memref<1x84xf32, #tpu.memory_space<vmem>>, vector<1x84xf32>
    %132 = vector.broadcast %131 : vector<1x84xf32> to vector<256x84xf32>
    %133 = arith.addf %130, %132 : vector<256x84xf32>
    %cst_116 = arith.constant 0.000000e+00 : f32
    %134 = vector.broadcast %cst_116 : f32 to vector<256x84xf32>
    %135 = arith.maximumf %133, %134 : vector<256x84xf32>
    %136 = tpu.iota {dimensions = array<i32: 1>} : vector<8x256xi32>
    %137 = tpu.iota {dimensions = array<i32: 0>} : vector<8x256xi32>
    %c32_i32 = arith.constant 32 : i32
    %138 = vector.broadcast %c32_i32 : i32 to vector<8x256xi32>
    %139 = arith.muli %137, %138 : vector<8x256xi32>
    %140 = arith.cmpi eq, %136, %139 : vector<8x256xi32>
    %141 = arith.extui %140 : vector<8x256xi1> to vector<8x256xi32>
    %142 = arith.sitofp %141 : vector<8x256xi32> to vector<8x256xf32>
    %cst_117 = arith.constant dense<0.000000e+00> : vector<8x84xf32>
    %143 = tpu.matmul %142, %135, %cst_117 {dimension_numbers = #tpu.dot_dimension_numbers<[1], [0], [0], [1], [0, 0, 1, 1], [], []>} : vector<8x256xf32>, vector<256x84xf32>, vector<8x84xf32> -> vector<8x84xf32>
    %c0_118 = arith.constant 0 : index
    %c0_119 = arith.constant 0 : index
    %144 = vector.load %arg12[%c0_118, %c0_119] : memref<8x84xf32, #tpu.memory_space<vmem>>, vector<8x84xf32>
    tpu.vector_store %arg12[%c0_118, %c0_119], %143 {strides = array<i32>} : memref<8x84xf32, #tpu.memory_space<vmem>>, vector<8x84xf32>,
    return
  }
  func.func @transform_0(%arg0: i32) -> (i32, i32) {
    %c0_i32 = arith.constant 0 : i32
    %c0_i32_0 = arith.constant 0 : i32
    return %arg0, %c0_i32 : i32, i32
  }
  func.func @transform_1(%arg0: i32) -> (i32, i32, i32) {
    %c0_i32 = arith.constant 0 : i32
    %c0_i32_0 = arith.constant 0 : i32
    %c0_i32_1 = arith.constant 0 : i32
    %c0_i32_2 = arith.constant 0 : i32
    return %c0_i32, %c0_i32_0, %c0_i32_1 : i32, i32, i32
  }
  func.func @transform_2(%arg0: i32) -> (i32, i32, i32) {
    %c0_i32 = arith.constant 0 : i32
    %c0_i32_0 = arith.constant 0 : i32
    %c0_i32_1 = arith.constant 0 : i32
    %c0_i32_2 = arith.constant 0 : i32
    return %c0_i32, %c0_i32_0, %c0_i32_1 : i32, i32, i32
  }
  func.func @transform_3(%arg0: i32) -> (i32, i32) {
    %c0_i32 = arith.constant 0 : i32
    %c0_i32_0 = arith.constant 0 : i32
    %c0_i32_1 = arith.constant 0 : i32
    return %c0_i32, %c0_i32_0 : i32, i32
  }
  func.func @transform_4(%arg0: i32) -> (i32, i32, i32) {
    %c0_i32 = arith.constant 0 : i32
    %c0_i32_0 = arith.constant 0 : i32
    %c0_i32_1 = arith.constant 0 : i32
    %c0_i32_2 = arith.constant 0 : i32
    return %c0_i32, %c0_i32_0, %c0_i32_1 : i32, i32, i32
  }
  func.func @transform_5(%arg0: i32) -> (i32, i32, i32) {
    %c0_i32 = arith.constant 0 : i32
    %c0_i32_0 = arith.constant 0 : i32
    %c0_i32_1 = arith.constant 0 : i32
    %c0_i32_2 = arith.constant 0 : i32
    return %c0_i32, %c0_i32_0, %c0_i32_1 : i32, i32, i32
  }
  func.func @transform_6(%arg0: i32) -> (i32, i32) {
    %c0_i32 = arith.constant 0 : i32
    %c0_i32_0 = arith.constant 0 : i32
    %c0_i32_1 = arith.constant 0 : i32
    return %c0_i32, %c0_i32_0 : i32, i32
  }
  func.func @transform_7(%arg0: i32) -> (i32, i32, i32) {
    %c0_i32 = arith.constant 0 : i32
    %c0_i32_0 = arith.constant 0 : i32
    %c0_i32_1 = arith.constant 0 : i32
    %c0_i32_2 = arith.constant 0 : i32
    return %c0_i32, %c0_i32_0, %c0_i32_1 : i32, i32, i32
  }
  func.func @transform_8(%arg0: i32) -> (i32, i32) {
    %c0_i32 = arith.constant 0 : i32
    %c0_i32_0 = arith.constant 0 : i32
    %c0_i32_1 = arith.constant 0 : i32
    return %c0_i32, %c0_i32_0 : i32, i32
  }
  func.func @transform_9(%arg0: i32) -> (i32, i32) {
    %c0_i32 = arith.constant 0 : i32
    %c0_i32_0 = arith.constant 0 : i32
    %c0_i32_1 = arith.constant 0 : i32
    return %c0_i32, %c0_i32_0 : i32, i32
  }
  func.func @transform_10(%arg0: i32) -> (i32, i32) {
    %c0_i32 = arith.constant 0 : i32
    %c0_i32_0 = arith.constant 0 : i32
    %c0_i32_1 = arith.constant 0 : i32
    return %c0_i32, %c0_i32_0 : i32, i32
  }
  func.func @transform_11(%arg0: i32) -> (i32, i32) {
    %c0_i32 = arith.constant 0 : i32
    %c0_i32_0 = arith.constant 0 : i32
    return %arg0, %c0_i32 : i32, i32
  }
}

</mosaic_0001>

<bundles_post_ra>
// kernel: cifar_encoder_forward.1
= control target key start
LH: loop header
LB: loop body
LE: loop exit
PB: predicated region body
PF: predicated region fallthrough
CT: control target
= control target key end

     0   :  { %v18791_v3 = vlaneseq  ;;  %vm175_vm1 = vcmask 785408   ;;  %vm3778_vm5 = vcmask 1043456   ;;  %vm3681_vm6 = vcmask 687104   ;;  %s18779_s1 = inlined_call_operand.vmem [shape: f32[5,96,84], index: 1, kind: input, shape index: {}]   ;;  %s18780_s0 = inlined_call_operand.vmem [shape: f32[256,96], index: 0, kind: input, shape index: {}]   ;;  %s18781_s2 = inlined_call_operand.vmem [shape: f32[5,96,84], index: 2, kind: input, shape index: {}]   ;;  %s18782_s4 = inlined_call_operand.vmem [shape: f32[5,84,80], index: 4, kind: input, shape index: {}]   ;;  %s18783_s5 = inlined_call_operand.vmem [shape: f32[5,84,80], index: 5, kind: input, shape index: {}]   ;;  %s18784_s3 = inlined_call_operand.vmem [shape: f32[1,84], index: 3, kind: input, shape index: {}]   ;;  %s18785_s7 = inlined_call_operand.vmem [shape: f32[5,80,128], index: 7, kind: input, shape index: {}]   ;;  %s18786_s6 = inlined_call_operand.vmem [shape: f32[1,80], index: 6, kind: input, shape index: {}]   ;;  %s18787_s9 = inlined_call_operand.vmem [shape: f32[128,84], index: 9, kind: input, shape index: {}]   ;;  %s18788_s8 = inlined_call_operand.vmem [shape: f32[1,128], index: 8, kind: input, shape index: {}]   ;;  %s18789_s10 = inlined_call_operand.vmem [shape: f32[1,84], index: 10, kind: input, shape index: {}]   ;;  %s18790_s11 = inlined_call_operand.vmem [shape: f32[8,84], index: 11, kind: output, shape index: {}]  }
   0x1   :  { %v8918_v0 = vld [vmem:[%s18779_s1 + $0x60] sm:$0xff]  ;;  %v8919_v1 = vld [vmem:[%s18779_s1 + $0x68] sm:$0xff]  ;;  %v8920_v6 = vld [vmem:[%s18779_s1 + $0x70] sm:$0xff]  ;;  %vm7035_vm8 = vcmask 654336  }
   0x2   :  { %v9070_v2 = vld [vmem:[%s18779_s1 + $0xc0] sm:$0xff]  ;;  %v12963_v4 = vpack.c.bf16 %v8919_v1, %v8918_v0  ;;  %v9071_v5 = vld [vmem:[%s18779_s1 + $0xc8] sm:$0xff]  ;;  %v8921_v7 = vld [vmem:[%s18779_s1 + $0x78] sm:$0xff]  ;;  %v14326_v17 = vshrl.u32 %v18791_v3, 7 }
   0x3   :  { %v13059_v8 = vpack.c.bf16 %v9071_v5, %v9070_v2  ;;  %v12967_v9 = vpack.c.bf16 %v8921_v7, %v8920_v6  ;;  %v9072_v10 = vld [vmem:[%s18779_s1 + $0xd0] sm:$0xff]  ;;  %v9073_v11 = vld [vmem:[%s18779_s1 + $0xd8] sm:$0xff]  ;;  %v8922_v12 = vld [vmem:[%s18779_s1 + $0x80] sm:$0xff] }
   0x4   :  { %12964 = vmatprep.subr.bf16.mxu1 %v12963_v4  ;;  %v13063_v13 = vpack.c.bf16 %v9073_v11, %v9072_v10  ;;  %v8923_v14 = vld [vmem:[%s18779_s1 + $0x88] sm:$0xff]  ;;  %v9074_v15 = vld [vmem:[%s18779_s1 + $0xe0] sm:$0xff]  ;;  %18902 = vst [vmem:[#allocation2_spill] sm:$0xff] %v14326_v17  ;;  %v8924_v19 = vld [vmem:[%s18779_s1 + $0x90] sm:$0xff]  ;;  %vm129_vm0 = vcmp.lt.s32.totalorder %v14326_v17, 7  ;;  %vm1313_vm2 = vcmp.lt.s32.totalorder %v14326_v17, 6 }
   0x5   :  { %v9075_v16 = vld [vmem:[%s18779_s1 + $0xe8] sm:$0xff]  ;;  %13060 = vmatprep.subr.bf16.mxu0 %v13059_v8  ;;  %12966 = vmatpush3.bf16.msra.mxu1 %v12963_v4  ;;  %v12971_v18 = vpack.c.bf16 %v8923_v14, %v8922_v12  ;;  %v8925_v20 = vld [vmem:[%s18779_s1 + $0x98] sm:$0xff]  ;;  %v9076_v22 = vld [vmem:[%s18779_s1 + $0xf0] sm:$0xff]  ;;  %vm2014_vm3 = vcmp.lt.s32.totalorder %v14326_v17, 5  ;;  %vm2715_vm4 = vcmp.lt.s32.totalorder %v14326_v17, 4 }
   0x6   :  { %13062 = vmatpush3.bf16.msra.mxu0 %v13059_v8  ;;  %12968 = vmatprep.subr.bf16.mxu1 %v12967_v9  ;;  %v13067_v21 = vpack.c.bf16 %v9075_v16, %v9074_v15  ;;  %v9077_v23 = vld [vmem:[%s18779_s1 + $0xf8] sm:$0xff]  ;;  %v12975_v24 = vpack.c.bf16 %v8925_v20, %v8924_v19  ;;  %v14343_v25 = vld [vmem:[%s18780_s0] sm:$0xff]  ;;  %v14348_v26 = vld [vmem:[%s18780_s0 + $0x8] sm:$0xff] }
   0x7   :  { %13064 = vmatprep.subr.bf16.mxu0 %v13063_v13  ;;  %v18793_v27 = vrot.slane %v14343_v25, 1  ;;  %v96_v28 = vrot.slane %v14348_v26, 1  ;;  %v18792_v29 = vrot.slane %v14343_v25, 2  ;;  %v1282_v30 = vrot.slane %v14348_v26, 2  ;;  %v8926_v32 = vld [vmem:[%s18779_s1 + $0xa0] sm:$0xff]  ;;  %v8927_v33 = vld [vmem:[%s18779_s1 + $0xa8] sm:$0xff] }
   0x8   :  { %v13071_v31 = vpack.c.bf16 %v9077_v23, %v9076_v22  ;;  %v9078_v34 = vld [vmem:[%s18779_s1 + $0x100] sm:$0xff]  ;;  %v9079_v35 = vld [vmem:[%s18779_s1 + $0x108] sm:$0xff]  ;;  %v12979_v38 = vpack.c.bf16 %v8927_v33, %v8926_v32  ;;  %v8928_v40 = vld [vmem:[%s18779_s1 + $0xb0] sm:$0xff] }
   0x9   :  { %12970 = vmatpush3.bf16.msra.mxu1 %v12967_v9  ;;  %v14372_v36 = vsel %vm129_vm0, %v18793_v27, %v96_v28  ;;  %v14378_v37 = vsel %vm1313_vm2, %v18792_v29, %v1282_v30  ;;  %v13075_v39 = vpack.c.bf16 %v9079_v35, %v9078_v34  ;;  %v8929_v41 = vld [vmem:[%s18779_s1 + $0xb8] sm:$0xff]  ;;  %v9080_v42 = vld [vmem:[%s18779_s1 + $0x110] sm:$0xff]  ;;  %v14412_v51 = vld [vmem:[%s18780_s0 + $0x20] sm:$0xff] }
   0xa   :  { %13066 = vmatpush3.bf16.msra.mxu0 %v13063_v13  ;;  %12972 = vmatprep.subr.bf16.mxu1 %v12971_v18  ;;  %18903 = vst [vmem:[#allocation3_spill] sm:$0xff] %v14378_v37  ;;  %v9081_v43 = vld [vmem:[%s18779_s1 + $0x118] sm:$0xff]  ;;  %v12983_v44 = vpack.c.bf16 %v8929_v41, %v8928_v40  ;;  %v14399_v45 = vld [vmem:[%s18780_s0 + $0x10] sm:$0xff]  ;;  %v14418_v53 = vld [vmem:[%s18780_s0 + $0x28] sm:$0xff]  ;;  %v99_v57 = vrot.slane %v14412_v51, 1  ;;  %v1285_v60 = vrot.slane %v14412_v51, 2 }
   0xb   :  { %13068 = vmatprep.subr.bf16.mxu0 %v13067_v21  ;;  %11147 = vmatprep.mubr.msk.f32.mxu1 %vm175_vm1, %v14372_v36  ;;  %v13079_v46 = vpack.c.bf16 %v9081_v43, %v9080_v42  ;;  %v14404_v47 = vld [vmem:[%s18780_s0 + $0x18] sm:$0xff]  ;;  %v97_v48 = vrot.slane %v14399_v45, 1  ;;  %v1283_v49 = vrot.slane %v14399_v45, 2  ;;  %v71_v54 = vld [vmem:[%s18779_s1] sm:$0xff]  ;;  %v72_v55 = vld [vmem:[%s18779_s1 + $0x8] sm:$0xff]  ;;  %v100_v61 = vrot.slane %v14418_v53, 1 }
   0xc   :  { %11435 = vmatprep.mubr.msk.f32.mxu0 %vm175_vm1, %v14378_v37  ;;  %v98_v50 = vrot.slane %v14404_v47, 1  ;;  %v1284_v52 = vrot.slane %v14404_v47, 2  ;;  %v14444_v62 = vld [vmem:[%s18780_s0 + $0x30] sm:$0xff]  ;;  %v1286_v0 = vrot.slane %v14418_v53, 2  ;;  %v14454_v1 = vld [vmem:[%s18780_s0 + $0x38] sm:$0xff]  ;;  %v12987_v2 = vpack.c.bf16 %v72_v55, %v71_v54  ;;  %v9158_v4 = vld [vmem:[%s18779_s1 + $0x120] sm:$0xff] }
   0xd   :  { %12974 = vmatpush3.bf16.msra.mxu1 %v12971_v18  ;;  %v14428_v56 = vsel %vm129_vm0, %v96_v28, %v97_v48  ;;  %v14433_v58 = vsel %vm1313_vm2, %v1282_v30, %v1283_v49  ;;  %v101_v6 = vrot.slane %v14444_v62, 1  ;;  %v9159_v7 = vld [vmem:[%s18779_s1 + $0x128] sm:$0xff]  ;;  %v73_v8 = vld [vmem:[%s18779_s1 + $0x10] sm:$0xff]  ;;  %v74_v9 = vld [vmem:[%s18779_s1 + $0x18] sm:$0xff]  ;;  %v14487_v11 = vsel %vm129_vm0, %v99_v57, %v100_v61 }
   0xe   :  { %13070 = vmatpush3.bf16.msra.mxu0 %v13067_v21  ;;  %12976 = vmatprep.subr.bf16.mxu1 %v12975_v24  ;;  %18904 = vst [vmem:[#allocation4_spill] sm:$0xff] %v14433_v58  ;;  %v14437_v59 = vsel %vm129_vm0, %v97_v48, %v98_v50  ;;  %v14448_v63 = vsel %vm1313_vm2, %v1283_v49, %v1284_v52  ;;  %v1287_v12 = vrot.slane %v14444_v62, 2  ;;  %v102_v13 = vrot.slane %v14454_v1, 1  ;;  %v14494_v14 = vld [vmem:[%s18780_s0 + $0x40] sm:$0xff]  ;;  %v14504_v18 = vld [vmem:[%s18780_s0 + $0x48] sm:$0xff]  ;;  %v9160_v19 = vld [vmem:[%s18779_s1 + $0x130] sm:$0xff] }
   0xf   :  { %13072 = vmatprep.subr.bf16.mxu0 %v13071_v31  ;;  %18905 = vst [vmem:[#allocation5_spill] sm:$0xff] %v14448_v63  ;;  %v14467_v5 = vsel %vm129_vm0, %v98_v50, %v99_v57  ;;  %v14483_v10 = vsel %vm1313_vm2, %v1284_v52, %v1285_v60  ;;  %v14498_v15 = vsel %vm1313_vm2, %v1285_v60, %v1286_v0  ;;  %v1288_v16 = vrot.slane %v14454_v1, 2  ;;  %v9161_v20 = vld [vmem:[%s18779_s1 + $0x138] sm:$0xff]  ;;  %v75_v30 = vld [vmem:[%s18779_s1 + $0x20] sm:$0xff]  ;;  %v14544_v35 = vld [vmem:[%s18780_s0 + $0x50] sm:$0xff] }
  0x10   :  { %18906 = vst [vmem:[#allocation6_spill] sm:$0xff] %v14483_v10  ;;  %18907 = vst [vmem:[#allocation7_spill] sm:$0xff] %v14498_v15  ;;  %v13107_v21 = vpack.c.bf16 %v9159_v7, %v9158_v4  ;;  %v12991_v22 = vpack.c.bf16 %v74_v9, %v73_v8  ;;  %v14520_v23 = vsel %vm129_vm0, %v100_v61, %v101_v6  ;;  %v1289_v28 = vrot.slane %v14494_v14, 2  ;;  %v9163_v40 = vld [vmem:[%s18779_s1 + $0x148] sm:$0xff]  ;;  %v14560_v43 = vld [vmem:[%s18780_s0 + $0x58] sm:$0xff] }
  0x11   :  { %12978 = vmatpush3.bf16.msra.mxu1 %v12975_v24  ;;  %v103_v24 = vrot.slane %v14494_v14, 1  ;;  %v14534_v32 = vsel %vm1313_vm2, %v1286_v0, %v1287_v12  ;;  %v14538_v33 = vsel %vm129_vm0, %v101_v6, %v102_v13  ;;  %v104_v34 = vrot.slane %v14504_v18, 1  ;;  %v78_v48 = vld [vmem:[%s18779_s1 + $0x38] sm:$0xff]  ;;  %v9164_v54 = vld [vmem:[%s18779_s1 + $0x150] sm:$0xff]  ;;  %v14610_v7 = vld [vmem:[%s18780_s0 + $0x68] sm:$0xff] }
  0x12   :  { %13074 = vmatpush3.bf16.msra.mxu0 %v13071_v31  ;;  %12980 = vmatprep.subr.bf16.mxu1 %v12979_v38  ;;  %v76_v31 = vld [vmem:[%s18779_s1 + $0x28] sm:$0xff]  ;;  %18908 = vst [vmem:[#allocation8_spill] sm:$0xff] %v14534_v32  ;;  %v14554_v41 = vsel %vm1313_vm2, %v1287_v12, %v1288_v16  ;;  %v1290_v42 = vrot.slane %v14504_v18, 2  ;;  %v105_v50 = vrot.slane %v14544_v35, 1  ;;  %v9165_v55 = vld [vmem:[%s18779_s1 + $0x158] sm:$0xff]  ;;  %v14589_v57 = vsel %vm1313_vm2, %v1288_v16, %v1289_v28  ;;  %v79_v12 = vld [vmem:[%s18779_s1 + $0x40] sm:$0xff] }
  0x13   :  { %13076 = vmatprep.subr.bf16.mxu0 %v13075_v39  ;;  %18909 = vst [vmem:[#allocation9_spill] sm:$0xff] %v14554_v41  ;;  %v14576_v49 = vsel %vm129_vm0, %v102_v13, %v103_v24  ;;  %18910 = vst [vmem:[#allocation10_spill] sm:$0xff] %v14589_v57  ;;  %v14593_v60 = vsel %vm129_vm0, %v103_v24, %v104_v34  ;;  %v1291_v61 = vrot.slane %v14544_v35, 2  ;;  %v106_v0 = vrot.slane %v14560_v43, 1  ;;  %v80_v13 = vld [vmem:[%s18779_s1 + $0x48] sm:$0xff]  ;;  %v14754_v27 = vld [vmem:[%s18780_s0 + $0x98] sm:$0xff] }
  0x14   :  { %v14604_v4 = vsel %vm1313_vm2, %v1289_v28, %v1290_v42  ;;  %v1292_v6 = vrot.slane %v14560_v43, 2  ;;  %v13119_v9 = vpack.c.bf16 %v9165_v55, %v9164_v54  ;;  %v14626_v16 = vsel %vm129_vm0, %v104_v34, %v105_v50  ;;  %v9169_v54 = vld [vmem:[%s18779_s1 + $0x178] sm:$0xff] }
  0x15   :  { %12982 = vmatpush3.bf16.msra.mxu1 %v12979_v38  ;;  %v13111_v38 = vpack.c.bf16 %v9161_v20, %v9160_v19  ;;  %18911 = vst [vmem:[#allocation11_spill] sm:$0xff] %v14604_v4  ;;  %v9166_v20 = vld [vmem:[%s18779_s1 + $0x160] sm:$0xff]  ;;  %v14643_v24 = vsel %vm129_vm0, %v105_v50, %v106_v0 }
  0x16   :  { %13078 = vmatpush3.bf16.msra.mxu0 %v13075_v39  ;;  %12984 = vmatprep.subr.bf16.mxu1 %v12983_v44  ;;  %v9162_v39 = vld [vmem:[%s18779_s1 + $0x140] sm:$0xff]  ;;  %v14654_v34 = vsel %vm1313_vm2, %v1291_v61, %v1292_v6 }
  0x17   :  { %13080 = vmatprep.subr.bf16.mxu0 %v13079_v46  ;;  %v13115_v52 = vpack.c.bf16 %v9163_v40, %v9162_v39  ;;  %18913 = vst [vmem:[#allocation13_spill] sm:$0xff] %v14654_v34  ;;  %v14660_v39 = vld [vmem:[%s18780_s0 + $0x78] sm:$0xff]  ;;  %v13003_v40 = vpack.c.bf16 %v80_v13, %v79_v12  ;;  %v14700_v13 = vld [vmem:[%s18780_s0 + $0x80] sm:$0xff] }
  0x18   :  { %v110_v12 = vrot.slane %v14660_v39, 1 }
  0x19   :  { %12986 = vmatpush3.bf16.msra.mxu1 %v12983_v44  ;;  %v12995_v44 = vpack.c.bf16 %v76_v31, %v75_v30  ;;  %v108_v30 = vrot.slane %v14610_v7, 1  ;;  %v14650_v31 = vld [vmem:[%s18780_s0 + $0x70] sm:$0xff] }
  0x1a   :  { %13082 = vmatpush3.bf16.msra.mxu0 %v13079_v46  ;;  %12988 = vmatprep.subr.bf16.mxu1 %v12987_v2  ;;  %v77_v46 = vld [vmem:[%s18779_s1 + $0x30] sm:$0xff]  ;;  %v109_v50 = vrot.slane %v14650_v31, 1 }
  0x1b   :  { %13108 = vmatprep.subr.bf16.mxu0 %v13107_v21  ;;  %v12999_v8 = vpack.c.bf16 %v78_v48, %v77_v46  ;;  %v82_v46 = vld [vmem:[%s18779_s1 + $0x58] sm:$0xff] }
  0x1c   :  { %11148 = vmatmul.mubr.msk.f32.vlgmr.msra.gmra.mrb[0].mxu1 %vm175_vm1, %v14428_v56 }
  0x1d   :  { %11436 = vmatmul.mubr.msk.f32.vlgmr.msra.gmra.mrb[0].mxu0 %vm175_vm1, %v14433_v58  ;;  %11150 = vmatprep.mubr.msk.f32.mxu1 %vm175_vm1, %v14437_v59 }
  0x1e   :  { %11438 = vmatprep.mubr.msk.f32.mxu0 %vm175_vm1, %v14448_v63  ;;  %12990 = vmatpush3.bf16.msra.mxu1 %v12987_v2  ;;  %v14600_v2 = vld [vmem:[%s18780_s0 + $0x60] sm:$0xff] }
  0x1f   :  { %13110 = vmatpush3.bf16.msra.mxu0 %v13107_v21  ;;  %12992 = vmatprep.subr.bf16.mxu1 %v12991_v22  ;;  %v107_v19 = vrot.slane %v14600_v2, 1  ;;  %v9167_v21 = vld [vmem:[%s18779_s1 + $0x168] sm:$0xff]  ;;  %v1293_v28 = vrot.slane %v14600_v2, 2 }
  0x20   :  { %11151 = vmatmul.mubr.msk.f32.gmra.mrb[2].mxu1 %vm175_vm1, %v14467_v5  ;;  %13112 = vmatprep.subr.bf16.mxu0 %v13111_v38 }
  0x21   :  { %11439 = vmatmul.mubr.msk.f32.gmra.mrb[2].mxu0 %vm175_vm1, %v14483_v10  ;;  %11153 = vmatprep.mubr.msk.f32.mxu1 %vm175_vm1, %v14487_v11  ;;  %v14676_v48 = vsel %vm129_vm0, %v106_v0, %v107_v19  ;;  %v14689_v55 = vsel %vm1313_vm2, %v1292_v6, %v1293_v28  ;;  %v1295_v0 = vrot.slane %v14650_v31, 2  ;;  %v1296_v6 = vrot.slane %v14660_v39, 2 }
  0x22   :  { %11441 = vmatprep.mubr.msk.f32.mxu0 %vm175_vm1, %v14498_v15  ;;  %12994 = vmatpush3.bf16.msra.mxu1 %v12991_v22  ;;  %v14639_v22 = vsel %vm1313_vm2, %v1290_v42, %v1291_v61  ;;  %v13123_v42 = vpack.c.bf16 %v9167_v21, %v9166_v20  ;;  %18914 = vst [vmem:[#allocation14_spill] sm:$0xff] %v14689_v55 }
  0x23   :  { %13114 = vmatpush3.bf16.msra.mxu0 %v13111_v38  ;;  %12996 = vmatprep.subr.bf16.mxu1 %v12995_v44  ;;  %18912 = vst [vmem:[#allocation12_spill] sm:$0xff] %v14639_v22  ;;  %v1294_v38 = vrot.slane %v14610_v7, 2  ;;  %v14693_v61 = vsel %vm129_vm0, %v107_v19, %v108_v30  ;;  %v14710_v19 = vld [vmem:[%s18780_s0 + $0x88] sm:$0xff] }
  0x24   :  { %11154 = vmatmul.mubr.msk.f32.gmra.mrb[4].mxu1 %vm175_vm1, %v14520_v23  ;;  %13116 = vmatprep.subr.bf16.mxu0 %v13115_v52  ;;  %v1298_v29 = vrot.slane %v14710_v19, 2 }
  0x25   :  { %11442 = vmatmul.mubr.msk.f32.gmra.mrb[4].mxu0 %vm175_vm1, %v14534_v32  ;;  %11156 = vmatprep.mubr.msk.f32.mxu1 %vm175_vm1, %v14538_v33  ;;  %v14704_v20 = vsel %vm1313_vm2, %v1293_v28, %v1294_v38  ;;  %v111_v28 = vrot.slane %v14700_v13, 1 }
  0x26   :  { %11444 = vmatprep.mubr.msk.f32.mxu0 %vm175_vm1, %v14554_v41  ;;  %12998 = vmatpush3.bf16.msra.mxu1 %v12995_v44  ;;  %v81_v44 = vld [vmem:[%s18779_s1 + $0x50] sm:$0xff]  ;;  %18915 = vst [vmem:[#allocation15_spill] sm:$0xff] %v14704_v20 }
  0x27   :  { %13118 = vmatpush3.bf16.msra.mxu0 %v13115_v52  ;;  %13000 = vmatprep.subr.bf16.mxu1 %v12999_v8  ;;  %v9168_v52 = vld [vmem:[%s18779_s1 + $0x170] sm:$0xff]  ;;  %v13007_v21 = vpack.c.bf16 %v82_v46, %v81_v44  ;;  %v14731_v44 = vsel %vm129_vm0, %v109_v50, %v110_v12  ;;  %v1297_v46 = vrot.slane %v14700_v13, 2 }
  0x28   :  { %11157 = vmatmul.mubr.msk.f32.gmra.mrb[6].mxu1 %vm175_vm1, %v14576_v49  ;;  %13120 = vmatprep.subr.bf16.mxu0 %v13119_v9  ;;  %v13127_v3 = vpack.c.bf16 %v9169_v54, %v9168_v52  ;;  %18917 = vst [vmem:[#allocation17_spill] sm:$0xff] %v14731_v44  ;;  %v112_v52 = vrot.slane %v14710_v19, 1  ;;  %v8994_v54 = vld [vmem:[%s18781_s2 + $0x60] sm:$0xff] }
  0x29   :  { %11445 = vmatmul.mubr.msk.f32.gmra.mrb[6].mxu0 %vm175_vm1, %v14589_v57  ;;  %11159 = vmatprep.mubr.msk.f32.mxu1 %vm175_vm1, %v14593_v60 }
  0x2a   :  { %11447 = vmatprep.mubr.msk.f32.mxu0 %vm175_vm1, %v14604_v4  ;;  %13002 = vmatpush3.bf16.msra.mxu1 %v12999_v8  ;;  %v14720_v8 = vsel %vm129_vm0, %v108_v30, %v109_v50  ;;  %v14738_v30 = vld [vmem:[%s18780_s0 + $0x90] sm:$0xff]  ;;  %v14748_v50 = vsel %vm1313_vm2, %v1295_v0, %v1296_v6 }
  0x2b   :  { %13122 = vmatpush3.bf16.msra.mxu0 %v13119_v9  ;;  %13004 = vmatprep.subr.bf16.mxu1 %v13003_v40  ;;  %v14727_v9 = vsel %vm1313_vm2, %v1294_v38, %v1295_v0  ;;  %v8995_v38 = vld [vmem:[%s18781_s2 + $0x68] sm:$0xff]  ;;  %18918 = vst [vmem:[#allocation18_spill] sm:$0xff] %v14748_v50 }
  0x2c   :  { %11160 = vmatmul.mubr.msk.f32.gmra.mrb[8].mxu1 %vm175_vm1, %v14626_v16  ;;  %13124 = vmatprep.subr.bf16.mxu0 %v13123_v42  ;;  %18916 = vst [vmem:[#allocation16_spill] sm:$0xff] %v14727_v9  ;;  %v9247_v0 = vld [vmem:[%s18779_s1 + $0x188] sm:$0xff] }
  0x2d   :  { %11448 = vmatmul.mubr.msk.f32.gmra.mrb[8].mxu0 %vm175_vm1, %v14639_v22  ;;  %11162 = vmatprep.mubr.msk.f32.mxu1 %vm175_vm1, %v14643_v24  ;;  %v1299_v22 = vrot.slane %v14738_v30, 2 }
  0x2e   :  { %11450 = vmatprep.mubr.msk.f32.mxu0 %vm175_vm1, %v14654_v34  ;;  %13006 = vmatpush3.bf16.msra.mxu1 %v13003_v40  ;;  %v9246_v40 = vld [vmem:[%s18779_s1 + $0x180] sm:$0xff]  ;;  %v14779_v34 = vsel %vm1313_vm2, %v1296_v6, %v1297_v46  ;;  %v1300_v6 = vrot.slane %v14754_v27, 2 }
  0x2f   :  { %13126 = vmatpush3.bf16.msra.mxu0 %v13123_v42  ;;  %13008 = vmatprep.subr.bf16.mxu1 %v13007_v21  ;;  %v14770_v42 = vsel %vm129_vm0, %v110_v12, %v111_v28  ;;  %18920 = vst [vmem:[#allocation20_spill] sm:$0xff] %v14779_v34  ;;  %v114_v12 = vrot.slane %v14754_v27, 1 }
  0x30   :  { %11163 = vmatmul.mubr.msk.f32.gmra.mrb[10].mxu1 %vm175_vm1, %v14676_v48  ;;  %13128 = vmatprep.subr.bf16.mxu0 %v13127_v3  ;;  %18919 = vst [vmem:[#allocation19_spill] sm:$0xff] %v14770_v42 }
  0x31   :  { %11451 = vmatmul.mubr.msk.f32.gmra.mrb[10].mxu0 %vm175_vm1, %v14689_v55  ;;  %11165 = vmatprep.mubr.msk.f32.mxu1 %vm175_vm1, %v14693_v61  ;;  %v14773_v55 = vpack.c.bf16 %v8995_v38, %v8994_v54  ;;  %v14790_v54 = vld [vmem:[%s18780_s0 + $0xa0] sm:$0xff]  ;;  %v14794_v38 = vsel %vm1313_vm2, %v1297_v46, %v1298_v29 }
  0x32   :  { %11453 = vmatprep.mubr.msk.f32.mxu0 %vm175_vm1, %v14704_v20  ;;  %v113_v20 = vrot.slane %v14738_v30, 1  ;;  %13010 = vmatpush3.bf16.msra.mxu1 %v13007_v21  ;;  %18922 = vst [vmem:[#allocation22_spill] sm:$0xff] %v14794_v38  ;;  %v115_v46 = vrot.slane %v14790_v54, 1 }
  0x33   :  { %13130 = vmatpush3.bf16.msra.mxu0 %v13127_v3  ;;  %13012 = vmatprep.subr.bf16.mxu1 %v14773_v55  ;;  %v14820_v3 = vsel %vm1313_vm2, %v1298_v29, %v1299_v22 }
  0x34   :  { %11166 = vmatmul.mubr.msk.f32.gmra.mrb[12].mxu1 %vm175_vm1, %v14720_v8  ;;  %v14813_v21 = vsel %vm129_vm0, %v112_v52, %v113_v20  ;;  %18924 = vst [vmem:[#allocation24_spill] sm:$0xff] %v14820_v3 }
  0x35   :  { %11454 = vmatmul.mubr.msk.f32.gmra.mrb[12].mxu0 %vm175_vm1, %v14727_v9  ;;  %11168 = vmatprep.mubr.msk.f32.mxu1 %vm175_vm1, %v14731_v44  ;;  %v14783_v9 = vsel %vm129_vm0, %v111_v28, %v112_v52  ;;  %v14800_v28 = vld [vmem:[%s18780_s0 + $0xa8] sm:$0xff]  ;;  %18923 = vst [vmem:[#allocation23_spill] sm:$0xff] %v14813_v21  ;;  %v14831_v52 = vld [vmem:[%s18780_s0 + $0xb0] sm:$0xff] }
  0x36   :  { %11456 = vmatprep.mubr.msk.f32.mxu0 %vm175_vm1, %v14748_v50  ;;  %18921 = vst [vmem:[#allocation21_spill] sm:$0xff] %v14783_v9  ;;  %v14803_v50 = vpack.c.bf16 %v9247_v0, %v9246_v40  ;;  %v14824_v40 = vsel %vm129_vm0, %v113_v20, %v114_v12  ;;  %v1301_v0 = vrot.slane %v14790_v54, 2  ;;  %v1302_v29 = vrot.slane %v14800_v28, 2  ;;  %v14842_v20 = vld [vmem:[%s18780_s0 + $0xb8] sm:$0xff] }
  0x37   :  { %18925 = vst [vmem:[#allocation25_spill] sm:$0xff] %v14824_v40  ;;  %v117_v4 = vrot.slane %v14831_v52, 1  ;;  %v118_v32 = vrot.slane %v14842_v20, 1 }
  0x38   :  { %11169 = vmatmul.mubr.msk.f32.gmra.mrb[14].mxu1 %vm175_vm1, %v14770_v42  ;;  %13156 = vmatprep.subr.bf16.mxu0 %v14803_v50  ;;  %v14859_v57 = vsel %vm1313_vm2, %v1300_v6, %v1301_v0 }
  0x39   :  { %11457 = vmatmul.mubr.msk.f32.gmra.mrb[14].mxu0 %vm175_vm1, %v14779_v34  ;;  %11171 = vmatprep.mubr.msk.f32.mxu1 %vm175_vm1, %v14783_v9  ;;  %v116_v34 = vrot.slane %v14800_v28, 1  ;;  %18928 = vst [vmem:[#allocation28_spill] sm:$0xff] %v14859_v57  ;;  %v14901_v63 = vsel %vm129_vm0, %v117_v4, %v118_v32 }
  0x3a   :  { %11459 = vmatprep.mubr.msk.f32.mxu0 %vm175_vm1, %v14794_v38  ;;  %v14836_v38 = vsel %vm1313_vm2, %v1299_v22, %v1300_v6  ;;  %v14852_v22 = vsel %vm129_vm0, %v114_v12, %v115_v46  ;;  %v14870_v12 = vld [vmem:[%s18780_s0 + $0xc0] sm:$0xff]  ;;  %v1304_v6 = vrot.slane %v14842_v20, 2  ;;  %18933 = vst [vmem:[#allocation33_spill] sm:$0xff] %v14901_v63 }
  0x3b   :  { %18926 = vst [vmem:[#allocation26_spill] sm:$0xff] %v14836_v38  ;;  %18927 = vst [vmem:[#allocation27_spill] sm:$0xff] %v14852_v22  ;;  %v14863_v41 = vsel %vm129_vm0, %v115_v46, %v116_v34  ;;  %v14880_v46 = vld [vmem:[%s18780_s0 + $0xc8] sm:$0xff]  ;;  %v119_v15 = vrot.slane %v14870_v12, 1 }
  0x3c   :  { %11172 = vmatmul.mubr.msk.f32.gmra.mrb[16].mxu1 %vm175_vm1, %v14813_v21  ;;  %18929 = vst [vmem:[#allocation29_spill] sm:$0xff] %v14863_v41  ;;  %v120_v58 = vrot.slane %v14880_v46, 1 }
  0x3d   :  { %11460 = vmatmul.mubr.msk.f32.gmra.mrb[16].mxu0 %vm175_vm1, %v14820_v3  ;;  %11174 = vmatprep.mubr.msk.f32.mxu1 %vm175_vm1, %v14824_v40  ;;  %v1303_v3 = vrot.slane %v14831_v52, 2 }
  0x3e   :  { %11462 = vmatprep.mubr.msk.f32.mxu0 %vm175_vm1, %v14836_v38  ;;  %v14874_v38 = vsel %vm1313_vm2, %v1301_v0, %v1302_v29  ;;  %v14890_v0 = vsel %vm129_vm0, %v116_v34, %v117_v4  ;;  %v14908_v34 = vld [vmem:[%s18780_s0 + $0xd0] sm:$0xff]  ;;  %v14918_v4 = vld [vmem:[%s18780_s0 + $0xd8] sm:$0xff] }
  0x3f   :  { %18930 = vst [vmem:[#allocation30_spill] sm:$0xff] %v14874_v38  ;;  %18931 = vst [vmem:[#allocation31_spill] sm:$0xff] %v14890_v0  ;;  %v14897_v10 = vsel %vm1313_vm2, %v1302_v29, %v1303_v3  ;;  %v1306_v29 = vrot.slane %v14880_v46, 2  ;;  %v121_v37 = vrot.slane %v14908_v34, 1 }
  0x40   :  { %11175 = vmatmul.mubr.msk.f32.gmra.mrb[18].mxu1 %vm175_vm1, %v14852_v22  ;;  %18932 = vst [vmem:[#allocation32_spill] sm:$0xff] %v14897_v10 }
  0x41   :  { %11463 = vmatmul.mubr.msk.f32.gmra.mrb[18].mxu0 %vm175_vm1, %v14859_v57  ;;  %11177 = vmatprep.mubr.msk.f32.mxu1 %vm175_vm1, %v14863_v41  ;;  %v1305_v57 = vrot.slane %v14870_v12, 2 }
  0x42   :  { %11465 = vmatprep.mubr.msk.f32.mxu0 %vm175_vm1, %v14874_v38  ;;  %v14912_v38 = vsel %vm1313_vm2, %v1303_v3, %v1304_v6  ;;  %v14928_v3 = vsel %vm129_vm0, %v118_v32, %v119_v15  ;;  %v14946_v32 = vld [vmem:[%s18780_s0 + $0xe0] sm:$0xff] }
  0x43   :  { %18934 = vst [vmem:[#allocation34_spill] sm:$0xff] %v14912_v38  ;;  %18935 = vst [vmem:[#allocation35_spill] sm:$0xff] %v14928_v3  ;;  %v14935_v41 = vsel %vm1313_vm2, %v1304_v6, %v1305_v57  ;;  %v1308_v6 = vrot.slane %v14918_v4, 2  ;;  %v123_v22 = vrot.slane %v14946_v32, 1 }
  0x44   :  { %11178 = vmatmul.mubr.msk.f32.gmra.mrb[20].mxu1 %vm175_vm1, %v14890_v0  ;;  %18936 = vst [vmem:[#allocation36_spill] sm:$0xff] %v14935_v41  ;;  %v14939_v0 = vsel %vm129_vm0, %v119_v15, %v120_v58  ;;  %v14956_v15 = vld [vmem:[%s18780_s0 + $0xe8] sm:$0xff] }
  0x45   :  { %11466 = vmatmul.mubr.msk.f32.gmra.mrb[20].mxu0 %vm175_vm1, %v14897_v10  ;;  %11180 = vmatprep.mubr.msk.f32.mxu1 %vm175_vm1, %v14901_v63  ;;  %18937 = vst [vmem:[#allocation37_spill] sm:$0xff] %v14939_v0  ;;  %v1307_v10 = vrot.slane %v14908_v34, 2  ;;  %v122_v63 = vrot.slane %v14918_v4, 1 }
  0x46   :  { %11468 = vmatprep.mubr.msk.f32.mxu0 %vm175_vm1, %v14912_v38  ;;  %v14950_v38 = vsel %vm1313_vm2, %v1305_v57, %v1306_v29  ;;  %v14966_v57 = vsel %vm129_vm0, %v120_v58, %v121_v37  ;;  %v14984_v58 = vld [vmem:[%s18780_s0 + $0xf0] sm:$0xff] }
  0x47   :  { %18938 = vst [vmem:[#allocation38_spill] sm:$0xff] %v14950_v38  ;;  %18939 = vst [vmem:[#allocation39_spill] sm:$0xff] %v14966_v57  ;;  %v14973_v40 = vsel %vm1313_vm2, %v1306_v29, %v1307_v10  ;;  %v1310_v29 = vrot.slane %v14956_v15, 2  ;;  %v125_v21 = vrot.slane %v14984_v58, 1 }
  0x48   :  { %11181 = vmatmul.mubr.msk.f32.gmra.mrb[22].mxu1 %vm175_vm1, %v14928_v3  ;;  %18940 = vst [vmem:[#allocation40_spill] sm:$0xff] %v14973_v40  ;;  %v14977_v3 = vsel %vm129_vm0, %v121_v37, %v122_v63  ;;  %v14994_v37 = vld [vmem:[%s18780_s0 + $0xf8] sm:$0xff] }
  0x49   :  { %11469 = vmatmul.mubr.msk.f32.gmra.mrb[22].mxu0 %vm175_vm1, %v14935_v41  ;;  %11183 = vmatprep.mubr.msk.f32.mxu1 %vm175_vm1, %v14939_v0  ;;  %18941 = vst [vmem:[#allocation41_spill] sm:$0xff] %v14977_v3  ;;  %v1309_v41 = vrot.slane %v14946_v32, 2  ;;  %v124_v0 = vrot.slane %v14956_v15, 1  ;;  %v1312_v42 = vrot.slane %v14994_v37, 2 }
  0x4a   :  { %11471 = vmatprep.mubr.msk.f32.mxu0 %vm175_vm1, %v14950_v38  ;;  %v14988_v38 = vsel %vm1313_vm2, %v1307_v10, %v1308_v6  ;;  %v15004_v10 = vsel %vm129_vm0, %v122_v63, %v123_v22 }
  0x4b   :  { %18942 = vst [vmem:[#allocation42_spill] sm:$0xff] %v14988_v38  ;;  %18943 = vst [vmem:[#allocation43_spill] sm:$0xff] %v15004_v10  ;;  %v15011_v9 = vsel %vm1313_vm2, %v1308_v6, %v1309_v41  ;;  %v15021_v63 = vsel %vm1313_vm2, %v1309_v41, %v1310_v29 }
  0x4c   :  { %11184 = vmatmul.mubr.msk.f32.gmra.mrb[24].mxu1 %vm175_vm1, %v14966_v57  ;;  %18944 = vst [vmem:[#allocation44_spill] sm:$0xff] %v15011_v9  ;;  %v15015_v57 = vsel %vm129_vm0, %v123_v22, %v124_v0  ;;  %18946 = vst [vmem:[#allocation46_spill] sm:$0xff] %v15021_v63  ;;  %v15032_v22 = vsel %vm129_vm0, %v124_v0, %v125_v21  ;;  %v1983_v0 = vrot.slane %v14348_v26, 3 }
  0x4d   :  { %11472 = vmatmul.mubr.msk.f32.gmra.mrb[24].mxu0 %vm175_vm1, %v14973_v40  ;;  %11186 = vmatprep.mubr.msk.f32.mxu1 %vm175_vm1, %v14977_v3  ;;  %18945 = vst [vmem:[#allocation45_spill] sm:$0xff] %v15015_v57  ;;  %v1311_v40 = vrot.slane %v14984_v58, 2  ;;  %v126_v3 = vrot.slane %v14994_v37, 1  ;;  %18947 = vst [vmem:[#allocation47_spill] sm:$0xff] %v15032_v22 }
  0x4e   :  { %11474 = vmatprep.mubr.msk.f32.mxu0 %vm175_vm1, %v14988_v38 }
  0x4f   :  { %v15038_v41 = vsel %vm1313_vm2, %v1310_v29, %v1311_v40  ;;  %v15042_v6 = vsel %vm129_vm0, %v125_v21, %v126_v3  ;;  %v18951_v21 = vrot.slane %v14343_v25, 1  ;;  %v18953_v29 = vrot.slane %v14343_v25, 2 }
  0x50   :  { %11187 = vmatmul.mubr.msk.f32.gmra.mrb[26].mxu1 %vm175_vm1, %v15004_v10  ;;  %18948 = vst [vmem:[#allocation48_spill] sm:$0xff] %v15038_v41  ;;  %18949 = vst [vmem:[#allocation49_spill] sm:$0xff] %v15042_v6 }
  0x51   :  { %11475 = vmatmul.mubr.msk.f32.gmra.mrb[26].mxu0 %vm175_vm1, %v15011_v9  ;;  %11189 = vmatprep.mubr.msk.f32.mxu1 %vm175_vm1, %v15015_v57  ;;  %v15046_v9 = vsel %vm1313_vm2, %v1311_v40, %v1312_v42  ;;  %v15061_v40 = vsel %vm129_vm0, %v126_v3, %v18951_v21  ;;  %v15069_v38 = vsel %vm1313_vm2, %v1312_v42, %v18953_v29  ;;  %v1985_v3 = vrot.slane %v14404_v47, 3  ;;  %v8996_v21 = vld [vmem:[%s18781_s2 + $0x70] sm:$0xff]  ;;  %v8997_v42 = vld [vmem:[%s18781_s2 + $0x78] sm:$0xff] }
  0x52   :  { %11477 = vmatprep.mubr.msk.f32.mxu0 %vm175_vm1, %v15021_v63  ;;  %18950 = vst [vmem:[#allocation50_spill] sm:$0xff] %v15046_v9  ;;  %18952 = vst [vmem:[#allocation51_spill] sm:$0xff] %v15061_v40  ;;  %v18955_v63 = vrot.slane %v14343_v25, 3  ;;  %v9249_v29 = vld [vmem:[%s18779_s1 + $0x198] sm:$0xff]  ;;  %v13015_v57 = vpack.c.bf16 %v8997_v42, %v8996_v21  ;;  %v9251_v21 = vld [vmem:[%s18779_s1 + $0x1a8] sm:$0xff] }
  0x53   :  { %18954 = vst [vmem:[#allocation52_spill] sm:$0xff] %v15069_v38  ;;  %v19044_v17 = vld [vmem:[#allocation44_spill] sm:$0xff] }
  0x54   :  { %11190 = vmatmul.mubr.msk.f32.gmra.mrb[28].mxu1 %vm175_vm1, %v15032_v22  ;;  %v1987_v22 = vrot.slane %v14418_v53, 3 }
  0x55   :  { %11478 = vmatmul.mubr.msk.f32.gmra.mrb[28].mxu0 %vm175_vm1, %v15038_v41  ;;  %11192 = vmatprep.mubr.msk.f32.mxu1 %vm175_vm1, %v15042_v6  ;;  %v1984_v41 = vrot.slane %v14399_v45, 3  ;;  %v15076_v6 = vsel %vm2014_vm3, %v18955_v63, %v1983_v0  ;;  %v9248_v63 = vld [vmem:[%s18779_s1 + $0x190] sm:$0xff] }
  0x56   :  { %11480 = vmatprep.mubr.msk.f32.mxu0 %vm175_vm1, %v15046_v9  ;;  %18956 = vst [vmem:[#allocation53_spill] sm:$0xff] %v15076_v6  ;;  %v13159_v10 = vpack.c.bf16 %v9249_v29, %v9248_v63  ;;  %v1988_v63 = vrot.slane %v14444_v62, 3 }
  0x57   :  { %v15101_v9 = vsel %vm2014_vm3, %v1983_v0, %v1984_v41  ;;  %v8999_v0 = vld [vmem:[%s18781_s2 + $0x88] sm:$0xff] }
  0x58   :  { %11193 = vmatmul.mubr.msk.f32.gmra.mrb[30].mxu1 %vm175_vm1, %v15061_v40  ;;  %18957 = vst [vmem:[#allocation54_spill] sm:$0xff] %v15101_v9  ;;  %v15106_v40 = vsel %vm2014_vm3, %v1984_v41, %v1985_v3  ;;  %v9250_v41 = vld [vmem:[%s18779_s1 + $0x1a0] sm:$0xff] }
  0x59   :  { %11481 = vmatmul.mubr.msk.f32.gmra.mrb[30].mxu0 %vm175_vm1, %v15069_v38  ;;  %11219 = vmatprep.mubr.msk.f32.mxu1 %vm175_vm1, %v14343_v25  ;;  %v1986_v38 = vrot.slane %v14412_v51, 3  ;;  %18958 = vst [vmem:[#allocation55_spill] sm:$0xff] %v15106_v40 }
  0x5a   :  { %11579 = vmatprep.mubr.msk.f32.mxu0 %vm175_vm1, %v15076_v6  ;;  %v8998_v6 = vld [vmem:[%s18781_s2 + $0x80] sm:$0xff] }
  0x5b   :  { %v15131_v42 = vsel %vm2014_vm3, %v1985_v3, %v1986_v38  ;;  %v15137_v29 = vsel %vm2014_vm3, %v1986_v38, %v1987_v22  ;;  %v13019_v44 = vpack.c.bf16 %v8999_v0, %v8998_v6  ;;  %v13163_v3 = vpack.c.bf16 %v9251_v21, %v9250_v41  ;;  %v9253_v38 = vld [vmem:[%s18779_s1 + $0x1b8] sm:$0xff] }
  0x5c   :  { %11220 = vmatmul.mubr.msk.f32.vlgmr.msra.gmra.mrb[0].mxu1 %vm175_vm1, %v14348_v26  ;;  %18959 = vst [vmem:[#allocation56_spill] sm:$0xff] %v15131_v42  ;;  %18960 = vst [vmem:[#allocation57_spill] sm:$0xff] %v15137_v29  ;;  %v15163_v6 = vsel %vm2014_vm3, %v1987_v22, %v1988_v63  ;;  %v1990_v0 = vrot.slane %v14494_v14, 3  ;;  %v1991_v21 = vrot.slane %v14504_v18, 3  ;;  %v9002_v22 = vld [vmem:[%s18781_s2 + $0xa0] sm:$0xff] }
  0x5d   :  { %11580 = vmatmul.mubr.msk.f32.vlgmr.msra.gmra.mrb[0].mxu0 %vm175_vm1, %v15101_v9  ;;  %11222 = vmatprep.mubr.msk.f32.mxu1 %vm175_vm1, %v14399_v45  ;;  %v1989_v9 = vrot.slane %v14454_v1, 3  ;;  %18961 = vst [vmem:[#allocation58_spill] sm:$0xff] %v15163_v6 }
  0x5e   :  { %11582 = vmatprep.mubr.msk.f32.mxu0 %vm175_vm1, %v15106_v40  ;;  %13014 = vmatpush3.bf16.msra.mxu1 %v14773_v55  ;;  %v9000_v40 = vld [vmem:[%s18781_s2 + $0x90] sm:$0xff]  ;;  %v9001_v55 = vld [vmem:[%s18781_s2 + $0x98] sm:$0xff] }
  0x5f   :  { %13158 = vmatpush3.bf16.msra.mxu0 %v14803_v50  ;;  %13016 = vmatprep.subr.bf16.mxu1 %v13015_v57  ;;  %v9252_v50 = vld [vmem:[%s18779_s1 + $0x1b0] sm:$0xff]  ;;  %v15168_v41 = vsel %vm2014_vm3, %v1988_v63, %v1989_v9  ;;  %v15193_v63 = vsel %vm2014_vm3, %v1989_v9, %v1990_v0 }
  0x60   :  { %11223 = vmatmul.mubr.msk.f32.gmra.mrb[2].mxu1 %vm175_vm1, %v14404_v47  ;;  %13160 = vmatprep.subr.bf16.mxu0 %v13159_v10  ;;  %18962 = vst [vmem:[#allocation59_spill] sm:$0xff] %v15168_v41  ;;  %18963 = vst [vmem:[#allocation60_spill] sm:$0xff] %v15193_v63  ;;  %v9004_v9 = vld [vmem:[%s18781_s2 + $0xb0] sm:$0xff] }
  0x61   :  { %11583 = vmatmul.mubr.msk.f32.gmra.mrb[2].mxu0 %vm175_vm1, %v15131_v42  ;;  %11225 = vmatprep.mubr.msk.f32.mxu1 %vm175_vm1, %v14412_v51  ;;  %v13023_v42 = vpack.c.bf16 %v9001_v55, %v9000_v40  ;;  %v9255_v40 = vld [vmem:[%s18779_s1 + $0x1c8] sm:$0xff]  ;;  %v1992_v55 = vrot.slane %v14544_v35, 3 }
  0x62   :  { %11585 = vmatprep.mubr.msk.f32.mxu0 %vm175_vm1, %v15137_v29  ;;  %13018 = vmatpush3.bf16.msra.mxu1 %v13015_v57  ;;  %v13167_v29 = vpack.c.bf16 %v9253_v38, %v9252_v50  ;;  %v9003_v57 = vld [vmem:[%s18781_s2 + $0xa8] sm:$0xff]  ;;  %v15198_v50 = vsel %vm2014_vm3, %v1990_v0, %v1991_v21  ;;  %v1993_v38 = vrot.slane %v14560_v43, 3  ;;  %v9257_v0 = vld [vmem:[%s18779_s1 + $0x1d8] sm:$0xff] }
  0x63   :  { %13162 = vmatpush3.bf16.msra.mxu0 %v13159_v10  ;;  %13020 = vmatprep.subr.bf16.mxu1 %v13019_v44  ;;  %v9254_v10 = vld [vmem:[%s18779_s1 + $0x1c0] sm:$0xff]  ;;  %18964 = vst [vmem:[#allocation61_spill] sm:$0xff] %v15198_v50 }
  0x64   :  { %11226 = vmatmul.mubr.msk.f32.gmra.mrb[4].mxu1 %vm175_vm1, %v14418_v53  ;;  %13164 = vmatprep.subr.bf16.mxu0 %v13163_v3 }
  0x65   :  { %11586 = vmatmul.mubr.msk.f32.gmra.mrb[4].mxu0 %vm175_vm1, %v15163_v6  ;;  %11228 = vmatprep.mubr.msk.f32.mxu1 %vm175_vm1, %v14444_v62  ;;  %v13027_v6 = vpack.c.bf16 %v9003_v57, %v9002_v22  ;;  %v15223_v22 = vsel %vm2014_vm3, %v1991_v21, %v1992_v55  ;;  %v1994_v57 = vrot.slane %v14600_v2, 3  ;;  %v83_v21 = vld [vmem:[%s18781_s2] sm:$0xff] }
  0x66   :  { %11588 = vmatprep.mubr.msk.f32.mxu0 %vm175_vm1, %v15168_v41  ;;  %13022 = vmatpush3.bf16.msra.mxu1 %v13019_v44  ;;  %v13171_v41 = vpack.c.bf16 %v9255_v40, %v9254_v10  ;;  %v9005_v44 = vld [vmem:[%s18781_s2 + $0xb8] sm:$0xff]  ;;  %v15228_v10 = vsel %vm2014_vm3, %v1992_v55, %v1993_v38  ;;  %v1995_v40 = vrot.slane %v14610_v7, 3  ;;  %v1996_v55 = vrot.slane %v14650_v31, 3 }
  0x67   :  { %13166 = vmatpush3.bf16.msra.mxu0 %v13163_v3  ;;  %13024 = vmatprep.subr.bf16.mxu1 %v13023_v42  ;;  %v9256_v3 = vld [vmem:[%s18779_s1 + $0x1d0] sm:$0xff] }
  0x68   :  { %11229 = vmatmul.mubr.msk.f32.gmra.mrb[6].mxu1 %vm175_vm1, %v14454_v1  ;;  %13168 = vmatprep.subr.bf16.mxu0 %v13167_v29 }
  0x69   :  { %11589 = vmatmul.mubr.msk.f32.gmra.mrb[6].mxu0 %vm175_vm1, %v15193_v63  ;;  %11231 = vmatprep.mubr.msk.f32.mxu1 %vm175_vm1, %v14494_v14  ;;  %v13031_v63 = vpack.c.bf16 %v9005_v44, %v9004_v9  ;;  %v15252_v9 = vsel %vm2014_vm3, %v1994_v57, %v1995_v40  ;;  %v1997_v44 = vrot.slane %v14660_v39, 3 }
  0x6a   :  { %11591 = vmatprep.mubr.msk.f32.mxu0 %vm175_vm1, %v15198_v50  ;;  %13026 = vmatpush3.bf16.msra.mxu1 %v13023_v42  ;;  %v13175_v50 = vpack.c.bf16 %v9257_v0, %v9256_v3  ;;  %v84_v42 = vld [vmem:[%s18781_s2 + $0x8] sm:$0xff]  ;;  %v1999_v0 = vrot.slane %v14710_v19, 3 }
  0x6b   :  { %13170 = vmatpush3.bf16.msra.mxu0 %v13167_v29  ;;  %13028 = vmatprep.subr.bf16.mxu1 %v13027_v6  ;;  %v15247_v29 = vsel %vm2014_vm3, %v1993_v38, %v1994_v57  ;;  %v15255_v3 = vpack.c.bf16 %v84_v42, %v83_v21  ;;  %v15272_v38 = vsel %vm2014_vm3, %v1996_v55, %v1997_v44  ;;  %v2002_v42 = vrot.slane %v14790_v54, 3 }
  0x6c   :  { %11232 = vmatmul.mubr.msk.f32.gmra.mrb[8].mxu1 %vm175_vm1, %v14504_v18  ;;  %13172 = vmatprep.subr.bf16.mxu0 %v13171_v41 }
  0x6d   :  { %11592 = vmatmul.mubr.msk.f32.gmra.mrb[8].mxu0 %vm175_vm1, %v15223_v22  ;;  %11234 = vmatprep.mubr.msk.f32.mxu1 %vm175_vm1, %v14544_v35 }
  0x6e   :  { %11594 = vmatprep.mubr.msk.f32.mxu0 %vm175_vm1, %v15228_v10  ;;  %13030 = vmatpush3.bf16.msra.mxu1 %v13027_v6  ;;  %v15267_v6 = vsel %vm2014_vm3, %v1995_v40, %v1996_v55  ;;  %v2001_v40 = vrot.slane %v14754_v27, 3 }
  0x6f   :  { %13174 = vmatpush3.bf16.msra.mxu0 %v13171_v41  ;;  %13032 = vmatprep.subr.bf16.mxu1 %v13031_v63  ;;  %v1998_v41 = vrot.slane %v14700_v13, 3 }
  0x70   :  { %11235 = vmatmul.mubr.msk.f32.gmra.mrb[10].mxu1 %vm175_vm1, %v14560_v43  ;;  %13176 = vmatprep.subr.bf16.mxu0 %v13175_v50 }
  0x71   :  { %11595 = vmatmul.mubr.msk.f32.gmra.mrb[10].mxu0 %vm175_vm1, %v15247_v29  ;;  %11237 = vmatprep.mubr.msk.f32.mxu1 %vm175_vm1, %v14600_v2  ;;  %v15291_v57 = vsel %vm2014_vm3, %v1998_v41, %v1999_v0 }
  0x72   :  { %11597 = vmatprep.mubr.msk.f32.mxu0 %vm175_vm1, %v15252_v9  ;;  %13034 = vmatpush3.bf16.msra.mxu1 %v13031_v63  ;;  %v15286_v63 = vsel %vm2014_vm3, %v1997_v44, %v1998_v41  ;;  %18965 = vst [vmem:[#allocation62_spill] sm:$0xff] %v15291_v57  ;;  %v2003_v44 = vrot.slane %v14800_v28, 3  ;;  %v15322_v41 = vsel %vm2014_vm3, %v2001_v40, %v2002_v42 }
  0x73   :  { %13178 = vmatpush3.bf16.msra.mxu0 %v13175_v50  ;;  %13036 = vmatprep.subr.bf16.mxu1 %v15255_v3  ;;  %v2000_v50 = vrot.slane %v14738_v30, 3  ;;  %18968 = vst [vmem:[#allocation65_spill] sm:$0xff] %v15322_v41 }
  0x74   :  { %11238 = vmatmul.mubr.msk.f32.gmra.mrb[12].mxu1 %vm175_vm1, %v14610_v7 }
  0x75   :  { %11598 = vmatmul.mubr.msk.f32.gmra.mrb[12].mxu0 %vm175_vm1, %v15267_v6  ;;  %11240 = vmatprep.mubr.msk.f32.mxu1 %vm175_vm1, %v14650_v31  ;;  %v15304_v21 = vsel %vm2014_vm3, %v1999_v0, %v2000_v50  ;;  %v15309_v55 = vsel %vm2014_vm3, %v2000_v50, %v2001_v40  ;;  %v2004_v0 = vrot.slane %v14831_v52, 3  ;;  %v15327_v50 = vsel %vm2014_vm3, %v2002_v42, %v2003_v44 }
  0x76   :  { %11600 = vmatprep.mubr.msk.f32.mxu0 %vm175_vm1, %v15272_v38  ;;  %18966 = vst [vmem:[#allocation63_spill] sm:$0xff] %v15304_v21  ;;  %18967 = vst [vmem:[#allocation64_spill] sm:$0xff] %v15309_v55  ;;  %v2006_v42 = vrot.slane %v14870_v12, 3 }
  0x77   :  { %18969 = vst [vmem:[#allocation66_spill] sm:$0xff] %v15327_v50  ;;  %v15340_v40 = vsel %vm2014_vm3, %v2003_v44, %v2004_v0 }
  0x78   :  { %11241 = vmatmul.mubr.msk.f32.gmra.mrb[14].mxu1 %vm175_vm1, %v14660_v39  ;;  %18970 = vst [vmem:[#allocation67_spill] sm:$0xff] %v15340_v40 }
  0x79   :  { %11601 = vmatmul.mubr.msk.f32.gmra.mrb[14].mxu0 %vm175_vm1, %v15286_v63  ;;  %11243 = vmatprep.mubr.msk.f32.mxu1 %vm175_vm1, %v14700_v13 }
  0x7a   :  { %11603 = vmatprep.mubr.msk.f32.mxu0 %vm175_vm1, %v15291_v57  ;;  %v2005_v57 = vrot.slane %v14842_v20, 3 }
  0x7c   :  { %11244 = vmatmul.mubr.msk.f32.gmra.mrb[16].mxu1 %vm175_vm1, %v14710_v19  ;;  %v15358_v44 = vsel %vm2014_vm3, %v2005_v57, %v2006_v42 }
  0x7d   :  { %11604 = vmatmul.mubr.msk.f32.gmra.mrb[16].mxu0 %vm175_vm1, %v15304_v21  ;;  %11246 = vmatprep.mubr.msk.f32.mxu1 %vm175_vm1, %v14738_v30  ;;  %v2007_v21 = vrot.slane %v14880_v46, 3  ;;  %18972 = vst [vmem:[#allocation69_spill] sm:$0xff] %v15358_v44 }
  0x7e   :  { %11606 = vmatprep.mubr.msk.f32.mxu0 %vm175_vm1, %v15309_v55  ;;  %v15345_v55 = vsel %vm2014_vm3, %v2004_v0, %v2005_v57  ;;  %v2008_v0 = vrot.slane %v14908_v34, 3 }
  0x7f   :  { %18971 = vst [vmem:[#allocation68_spill] sm:$0xff] %v15345_v55 }
  0x80   :  { %11247 = vmatmul.mubr.msk.f32.gmra.mrb[18].mxu1 %vm175_vm1, %v14754_v27  ;;  %v15376_v57 = vsel %vm2014_vm3, %v2007_v21, %v2008_v0 }
  0x81   :  { %11607 = vmatmul.mubr.msk.f32.gmra.mrb[18].mxu0 %vm175_vm1, %v15322_v41  ;;  %11249 = vmatprep.mubr.msk.f32.mxu1 %vm175_vm1, %v14790_v54  ;;  %v2009_v41 = vrot.slane %v14918_v4, 3  ;;  %18974 = vst [vmem:[#allocation71_spill] sm:$0xff] %v15376_v57 }
  0x82   :  { %11609 = vmatprep.mubr.msk.f32.mxu0 %vm175_vm1, %v15327_v50  ;;  %v15363_v50 = vsel %vm2014_vm3, %v2006_v42, %v2007_v21  ;;  %v2010_v42 = vrot.slane %v14946_v32, 3 }
  0x83   :  { %18973 = vst [vmem:[#allocation70_spill] sm:$0xff] %v15363_v50 }
  0x84   :  { %11250 = vmatmul.mubr.msk.f32.gmra.mrb[20].mxu1 %vm175_vm1, %v14800_v28  ;;  %v15394_v21 = vsel %vm2014_vm3, %v2009_v41, %v2010_v42 }
  0x85   :  { %11610 = vmatmul.mubr.msk.f32.gmra.mrb[20].mxu0 %vm175_vm1, %v15340_v40  ;;  %11252 = vmatprep.mubr.msk.f32.mxu1 %vm175_vm1, %v14831_v52  ;;  %v2011_v40 = vrot.slane %v14956_v15, 3  ;;  %18976 = vst [vmem:[#allocation73_spill] sm:$0xff] %v15394_v21 }
  0x86   :  { %11612 = vmatprep.mubr.msk.f32.mxu0 %vm175_vm1, %v15345_v55  ;;  %v15381_v55 = vsel %vm2014_vm3, %v2008_v0, %v2009_v41  ;;  %v2012_v0 = vrot.slane %v14984_v58, 3 }
  0x87   :  { %18975 = vst [vmem:[#allocation72_spill] sm:$0xff] %v15381_v55 }
  0x88   :  { %11253 = vmatmul.mubr.msk.f32.gmra.mrb[22].mxu1 %vm175_vm1, %v14842_v20  ;;  %v15412_v41 = vsel %vm2014_vm3, %v2011_v40, %v2012_v0 }
  0x89   :  { %11613 = vmatmul.mubr.msk.f32.gmra.mrb[22].mxu0 %vm175_vm1, %v15358_v44  ;;  %11255 = vmatprep.mubr.msk.f32.mxu1 %vm175_vm1, %v14870_v12  ;;  %v2013_v44 = vrot.slane %v14994_v37, 3  ;;  %18978 = vst [vmem:[#allocation75_spill] sm:$0xff] %v15412_v41 }
  0x8a   :  { %11615 = vmatprep.mubr.msk.f32.mxu0 %vm175_vm1, %v15363_v50  ;;  %v15399_v50 = vsel %vm2014_vm3, %v2010_v42, %v2011_v40  ;;  %v18980_v40 = vrot.slane %v14343_v25, 3 }
  0x8b   :  { %18977 = vst [vmem:[#allocation74_spill] sm:$0xff] %v15399_v50  ;;  %v15416_v42 = vsel %vm2014_vm3, %v2012_v0, %v2013_v44 }
  0x8c   :  { %11256 = vmatmul.mubr.msk.f32.gmra.mrb[24].mxu1 %vm175_vm1, %v14880_v46  ;;  %18979 = vst [vmem:[#allocation76_spill] sm:$0xff] %v15416_v42  ;;  %v15433_v0 = vsel %vm2014_vm3, %v2013_v44, %v18980_v40  ;;  %v86_v44 = vld [vmem:[%s18781_s2 + $0x18] sm:$0xff] }
  0x8d   :  { %11616 = vmatmul.mubr.msk.f32.gmra.mrb[24].mxu0 %vm175_vm1, %v15376_v57  ;;  %11258 = vmatprep.mubr.msk.f32.mxu1 %vm175_vm1, %v14908_v34  ;;  %v2684_v57 = vrot.slane %v14348_v26, 4  ;;  %v2685_v26 = vrot.slane %v14399_v45, 4 }
  0x8e   :  { %11618 = vmatprep.mubr.msk.f32.mxu0 %vm175_vm1, %v15381_v55  ;;  %v18867_v55 = vrot.slane %v14343_v25, 4 }
  0x8f   :  { %v15459_v45 = vsel %vm2715_vm4, %v2684_v57, %v2685_v26 }
  0x90   :  { %11259 = vmatmul.mubr.msk.f32.gmra.mrb[26].mxu1 %vm175_vm1, %v14918_v4 }
  0x91   :  { %11619 = vmatmul.mubr.msk.f32.gmra.mrb[26].mxu0 %vm175_vm1, %v15394_v21  ;;  %11261 = vmatprep.mubr.msk.f32.mxu1 %vm175_vm1, %v14946_v32 }
  0x92   :  { %11621 = vmatprep.mubr.msk.f32.mxu0 %vm175_vm1, %v15399_v50  ;;  %v15440_v50 = vsel %vm2715_vm4, %v18867_v55, %v2684_v57  ;;  %v2688_v55 = vrot.slane %v14418_v53, 4  ;;  %v88_v57 = vld [vmem:[%s18781_s2 + $0x28] sm:$0xff]  ;;  %v2689_v53 = vrot.slane %v14444_v62, 4  ;;  %v90_v62 = vld [vmem:[%s18781_s2 + $0x38] sm:$0xff] }
  0x94   :  { %11262 = vmatmul.mubr.msk.f32.gmra.mrb[28].mxu1 %vm175_vm1, %v14956_v15 }
  0x95   :  { %11622 = vmatmul.mubr.msk.f32.gmra.mrb[28].mxu0 %vm175_vm1, %v15412_v41  ;;  %11264 = vmatprep.mubr.msk.f32.mxu1 %vm175_vm1, %v14984_v58  ;;  %v2686_v41 = vrot.slane %v14404_v47, 4  ;;  %v2687_v47 = vrot.slane %v14412_v51, 4 }
  0x96   :  { %11624 = vmatprep.mubr.msk.f32.mxu0 %vm175_vm1, %v15416_v42  ;;  %v85_v42 = vld [vmem:[%s18781_s2 + $0x10] sm:$0xff] }
  0x97   :  { %v15464_v40 = vsel %vm2715_vm4, %v2685_v26, %v2686_v41  ;;  %v13039_v21 = vpack.c.bf16 %v86_v44, %v85_v42  ;;  %v15483_v51 = vsel %vm2715_vm4, %v2686_v41, %v2687_v47  ;;  %v2690_v42 = vrot.slane %v14454_v1, 4 }
  0x98   :  { %11265 = vmatmul.mubr.msk.f32.gmra.mrb[30].mxu1 %vm175_vm1, %v14994_v37  ;;  %v15508_v1 = vsel %vm2715_vm4, %v2688_v55, %v2689_v53  ;;  %v2692_v41 = vrot.slane %v14504_v18, 4 }
  0x99   :  { %11625 = vmatmul.mubr.msk.f32.gmra.mrb[30].mxu0 %vm175_vm1, %v15433_v0  ;;  %11291 = vmatprep.mubr.msk.f32.mxu1 %vm175_vm1, %v14372_v36  ;;  %v87_v36 = vld [vmem:[%s18781_s2 + $0x20] sm:$0xff] }
  0x9a   :  { %11723 = vmatprep.mubr.msk.f32.mxu0 %vm175_vm1, %v15440_v50  ;;  %v13043_v26 = vpack.c.bf16 %v88_v57, %v87_v36  ;;  %v2696_v57 = vrot.slane %v14610_v7, 4 }
  0x9c   :  { %11292 = vmatmul.mubr.msk.f32.vlgmr.msra.gmra.mrb[32].mxu1 %vm175_vm1, %v14428_v56  ;;  %v15489_v56 = vsel %vm2715_vm4, %v2687_v47, %v2688_v55 }
  0x9d   :  { %11724 = vmatmul.mubr.msk.f32.vlgmr.msra.gmra.mrb[0].mxu0 %vm175_vm1, %v15459_v45  ;;  %11294 = vmatprep.mubr.msk.f32.mxu1 %vm175_vm1, %v14437_v59  ;;  %v89_v59 = vld [vmem:[%s18781_s2 + $0x30] sm:$0xff] }
  0x9e   :  { %11726 = vmatprep.mubr.msk.f32.mxu0 %vm175_vm1, %v15464_v40  ;;  %13038 = vmatpush3.bf16.msra.mxu1 %v15255_v3  ;;  %v15513_v3 = vsel %vm2715_vm4, %v2689_v53, %v2690_v42  ;;  %v13047_v44 = vpack.c.bf16 %v90_v62, %v89_v59 }
  0x9f   :  { %13040 = vmatprep.subr.bf16.mxu1 %v13039_v21 }
  0xa0   :  { %11295 = vmatmul.mubr.msk.f32.gmra.mrb[34].mxu1 %vm175_vm1, %v14467_v5  ;;  %v2691_v5 = vrot.slane %v14494_v14, 4  ;;  %v92_v14 = vld [vmem:[%s18781_s2 + $0x48] sm:$0xff] }
  0xa1   :  { %11727 = vmatmul.mubr.msk.f32.gmra.mrb[2].mxu0 %vm175_vm1, %v15483_v51  ;;  %11297 = vmatprep.mubr.msk.f32.mxu1 %vm175_vm1, %v14487_v11  ;;  %v91_v11 = vld [vmem:[%s18781_s2 + $0x40] sm:$0xff] }
  0xa2   :  { %11729 = vmatprep.mubr.msk.f32.mxu0 %vm175_vm1, %v15489_v56  ;;  %13042 = vmatpush3.bf16.msra.mxu1 %v13039_v21  ;;  %v15532_v18 = vsel %vm2715_vm4, %v2690_v42, %v2691_v5  ;;  %v15537_v55 = vsel %vm2715_vm4, %v2691_v5, %v2692_v41  ;;  %v2694_v21 = vrot.slane %v14560_v43, 4  ;;  %v13051_v47 = vpack.c.bf16 %v92_v14, %v91_v11  ;;  %v18984_v5 = vld [vmem:[#allocation19_spill] sm:$0xff] }
  0xa3   :  { %13044 = vmatprep.subr.bf16.mxu1 %v13043_v26  ;;  %v2704_v11 = vrot.slane %v14800_v28, 4  ;;  %v18988_v14 = vld [vmem:[#allocation23_spill] sm:$0xff] }
  0xa4   :  { %11298 = vmatmul.mubr.msk.f32.gmra.mrb[36].mxu1 %vm175_vm1, %v14520_v23  ;;  %v2693_v23 = vrot.slane %v14544_v35, 4  ;;  %v94_v35 = vld [vmem:[%s18781_s2 + $0x58] sm:$0xff] }
  0xa5   :  { %11730 = vmatmul.mubr.msk.f32.gmra.mrb[4].mxu0 %vm175_vm1, %v15508_v1  ;;  %11300 = vmatprep.mubr.msk.f32.mxu1 %vm175_vm1, %v14538_v33  ;;  %v93_v33 = vld [vmem:[%s18781_s2 + $0x50] sm:$0xff] }
  0xa6   :  { %11732 = vmatprep.mubr.msk.f32.mxu0 %vm175_vm1, %v15513_v3  ;;  %13046 = vmatpush3.bf16.msra.mxu1 %v13043_v26  ;;  %v15556_v43 = vsel %vm2715_vm4, %v2692_v41, %v2693_v23  ;;  %v15561_v36 = vsel %vm2715_vm4, %v2693_v23, %v2694_v21  ;;  %v13055_v53 = vpack.c.bf16 %v94_v35, %v93_v33  ;;  %v2698_v26 = vrot.slane %v14660_v39, 4  ;;  %v18985_v41 = vld [vmem:[#allocation21_spill] sm:$0xff] }
  0xa7   :  { %13048 = vmatprep.subr.bf16.mxu1 %v13047_v44  ;;  %v18989_v23 = vld [vmem:[#allocation25_spill] sm:$0xff]  ;;  %v2706_v35 = vrot.slane %v14842_v20, 4 }
  0xa8   :  { %11301 = vmatmul.mubr.msk.f32.gmra.mrb[38].mxu1 %vm175_vm1, %v14576_v49  ;;  %v2695_v49 = vrot.slane %v14600_v2, 4  ;;  %v9115_v2 = vld [vmem:[%s18781_s2 + $0xc8] sm:$0xff] }
  0xa9   :  { %11733 = vmatmul.mubr.msk.f32.gmra.mrb[6].mxu0 %vm175_vm1, %v15532_v18  ;;  %11303 = vmatprep.mubr.msk.f32.mxu1 %vm175_vm1, %v14593_v60  ;;  %v9114_v60 = vld [vmem:[%s18781_s2 + $0xc0] sm:$0xff] }
  0xaa   :  { %11735 = vmatprep.mubr.msk.f32.mxu0 %vm175_vm1, %v15537_v55  ;;  %13050 = vmatpush3.bf16.msra.mxu1 %v13047_v44  ;;  %v15580_v7 = vsel %vm2715_vm4, %v2694_v21, %v2695_v49  ;;  %v15585_v42 = vsel %vm2715_vm4, %v2695_v49, %v2696_v57  ;;  %v15588_v59 = vpack.c.bf16 %v9115_v2, %v9114_v60  ;;  %v2703_v44 = vrot.slane %v14790_v54, 4  ;;  %v18992_v49 = vld [vmem:[#allocation27_spill] sm:$0xff] }
  0xab   :  { %13052 = vmatprep.subr.bf16.mxu1 %v13051_v47  ;;  %v2707_v60 = vrot.slane %v14870_v12, 4 }
  0xac   :  { %11304 = vmatmul.mubr.msk.f32.gmra.mrb[40].mxu1 %vm175_vm1, %v14626_v16  ;;  %v2697_v16 = vrot.slane %v14650_v31, 4  ;;  %v2699_v31 = vrot.slane %v14700_v13, 4  ;;  %v15660_v33 = vsel %vm2715_vm4, %v2703_v44, %v2704_v11 }
  0xad   :  { %11736 = vmatmul.mubr.msk.f32.gmra.mrb[8].mxu0 %vm175_vm1, %v15556_v43  ;;  %11306 = vmatprep.mubr.msk.f32.mxu1 %vm175_vm1, %v14643_v24  ;;  %18991 = vst [vmem:[#allocation25_spill] sm:$0xff] %v15660_v33 }
  0xae   :  { %11738 = vmatprep.mubr.msk.f32.mxu0 %vm175_vm1, %v15561_v36  ;;  %13054 = vmatpush3.bf16.msra.mxu1 %v13051_v47  ;;  %v15600_v24 = vsel %vm2715_vm4, %v2696_v57, %v2697_v16  ;;  %v15605_v39 = vsel %vm2715_vm4, %v2697_v16, %v2698_v26  ;;  %v15619_v13 = vsel %vm2715_vm4, %v2698_v26, %v2699_v31  ;;  %v2705_v47 = vrot.slane %v14831_v52, 4  ;;  %v18993_v57 = vld [vmem:[#allocation29_spill] sm:$0xff]  ;;  %v18996_v26 = vld [vmem:[#allocation31_spill] sm:$0xff] }
  0xaf   :  { %13056 = vmatprep.subr.bf16.mxu1 %v13055_v53  ;;  %v2708_v16 = vrot.slane %v14880_v46, 4 }
  0xb0   :  { %11307 = vmatmul.mubr.msk.f32.gmra.mrb[42].mxu1 %vm175_vm1, %v14676_v48  ;;  %v2700_v48 = vrot.slane %v14710_v19, 4  ;;  %v2701_v19 = vrot.slane %v14738_v30, 4  ;;  %v15678_v2 = vsel %vm2715_vm4, %v2705_v47, %v2706_v35 }
  0xb1   :  { %11739 = vmatmul.mubr.msk.f32.gmra.mrb[10].mxu0 %vm175_vm1, %v15580_v7  ;;  %11309 = vmatprep.mubr.msk.f32.mxu1 %vm175_vm1, %v14693_v61  ;;  %v18981_v61 = vld [vmem:[#allocation17_spill] sm:$0xff]  ;;  %18995 = vst [vmem:[#allocation29_spill] sm:$0xff] %v15678_v2 }
  0xb2   :  { %11741 = vmatprep.mubr.msk.f32.mxu0 %vm175_vm1, %v15585_v42  ;;  %13058 = vmatpush3.bf16.msra.mxu1 %v13055_v53  ;;  %18982 = vst [vmem:[#allocation17_spill] sm:$0xff] %v15619_v13  ;;  %v15624_v62 = vsel %vm2715_vm4, %v2699_v31, %v2700_v48  ;;  %v15637_v30 = vsel %vm2715_vm4, %v2700_v48, %v2701_v19  ;;  %v18997_v31 = vld [vmem:[#allocation33_spill] sm:$0xff] }
  0xb3   :  { %13084 = vmatprep.subr.bf16.mxu1 %v15588_v59  ;;  %18983 = vst [vmem:[#allocation77_spill] sm:$0xff] %v15624_v62  ;;  %18986 = vst [vmem:[#allocation19_spill] sm:$0xff] %v15637_v30  ;;  %v15673_v53 = vsel %vm2715_vm4, %v2704_v11, %v2705_v47  ;;  %v15691_v48 = vsel %vm2715_vm4, %v2706_v35, %v2707_v60  ;;  %v2711_v11 = vrot.slane %v14946_v32, 4  ;;  %v19004_v47 = vld [vmem:[#allocation39_spill] sm:$0xff]  ;;  %v19005_v35 = vld [vmem:[#allocation41_spill] sm:$0xff] }
  0xb4   :  { %11310 = vmatmul.mubr.msk.f32.gmra.mrb[44].mxu1 %vm175_vm1, %v14720_v8  ;;  %v2702_v8 = vrot.slane %v14754_v27, 4  ;;  %18994 = vst [vmem:[#allocation27_spill] sm:$0xff] %v15673_v53  ;;  %18998 = vst [vmem:[#allocation31_spill] sm:$0xff] %v15691_v48 }
  0xb5   :  { %11742 = vmatmul.mubr.msk.f32.gmra.mrb[12].mxu0 %vm175_vm1, %v15600_v24  ;;  %11312 = vmatprep.mubr.msk.f32.mxu1 %vm175_vm1, %v18981_v61  ;;  %v2709_v61 = vrot.slane %v14908_v34, 4 }
  0xb6   :  { %11744 = vmatprep.mubr.msk.f32.mxu0 %vm175_vm1, %v15605_v39  ;;  %v15642_v27 = vsel %vm2715_vm4, %v2701_v19, %v2702_v8  ;;  %v15655_v21 = vsel %vm2715_vm4, %v2702_v8, %v2703_v44  ;;  %v15696_v19 = vsel %vm2715_vm4, %v2707_v60, %v2708_v16  ;;  %v2710_v8 = vrot.slane %v14918_v4, 4 }
  0xb7   :  { %18987 = vst [vmem:[#allocation21_spill] sm:$0xff] %v15642_v27  ;;  %18990 = vst [vmem:[#allocation23_spill] sm:$0xff] %v15655_v21  ;;  %v15709_v44 = vsel %vm2715_vm4, %v2708_v16, %v2709_v61  ;;  %v2714_v16 = vrot.slane %v14994_v37, 4 }
  0xb8   :  { %11313 = vmatmul.mubr.msk.f32.gmra.mrb[46].mxu1 %vm175_vm1, %v18984_v5  ;;  %18999 = vst [vmem:[#allocation33_spill] sm:$0xff] %v15696_v19  ;;  %v19000_v5 = vld [vmem:[#allocation35_spill] sm:$0xff] }
  0xb9   :  { %11745 = vmatmul.mubr.msk.f32.gmra.mrb[14].mxu0 %vm175_vm1, %v15619_v13  ;;  %11315 = vmatprep.mubr.msk.f32.mxu1 %vm175_vm1, %v18985_v41  ;;  %v19001_v41 = vld [vmem:[#allocation37_spill] sm:$0xff]  ;;  %19002 = vst [vmem:[#allocation35_spill] sm:$0xff] %v15709_v44 }
  0xba   :  { %11747 = vmatprep.mubr.msk.f32.mxu0 %vm175_vm1, %v15624_v62  ;;  %v19056_v62 = vld [vmem:[#allocation60_spill] sm:$0xff] }
  0xbc   :  { %11316 = vmatmul.mubr.msk.f32.gmra.mrb[48].mxu1 %vm175_vm1, %v18988_v14  ;;  %v15714_v14 = vsel %vm2715_vm4, %v2709_v61, %v2710_v8 }
  0xbd   :  { %11748 = vmatmul.mubr.msk.f32.gmra.mrb[16].mxu0 %vm175_vm1, %v15637_v30  ;;  %11318 = vmatprep.mubr.msk.f32.mxu1 %vm175_vm1, %v18989_v23  ;;  %19003 = vst [vmem:[#allocation37_spill] sm:$0xff] %v15714_v14  ;;  %v2712_v23 = vrot.slane %v14956_v15, 4 }
  0xbe   :  { %11750 = vmatprep.mubr.msk.f32.mxu0 %vm175_vm1, %v15642_v27  ;;  %v19054_v27 = vld [vmem:[#allocation58_spill] sm:$0xff] }
  0xbf   :  { %v15732_v60 = vsel %vm2715_vm4, %v2711_v11, %v2712_v23 }
  0xc0   :  { %11319 = vmatmul.mubr.msk.f32.gmra.mrb[50].mxu1 %vm175_vm1, %v18992_v49  ;;  %v15727_v49 = vsel %vm2715_vm4, %v2710_v8, %v2711_v11  ;;  %19007 = vst [vmem:[#allocation41_spill] sm:$0xff] %v15732_v60  ;;  %v19014_v11 = vrot.slane %v14343_v25, 4  ;;  %v14208_v25 = vld [vmem:[%s18780_s0] sm:$0xff] }
  0xc1   :  { %11751 = vmatmul.mubr.msk.f32.gmra.mrb[18].mxu0 %vm175_vm1, %v15655_v21  ;;  %11321 = vmatprep.mubr.msk.f32.mxu1 %vm175_vm1, %v18993_v57  ;;  %19006 = vst [vmem:[#allocation39_spill] sm:$0xff] %v15727_v49  ;;  %v2713_v57 = vrot.slane %v14984_v58, 4 }
  0xc2   :  { %11753 = vmatprep.mubr.msk.f32.mxu0 %vm175_vm1, %v15660_v33 }
  0xc3   :  { %v15745_v61 = vsel %vm2715_vm4, %v2712_v23, %v2713_v57  ;;  %v15749_v8 = vsel %vm2715_vm4, %v2713_v57, %v2714_v16  ;;  %v15763_v23 = vsel %vm2715_vm4, %v2714_v16, %v19014_v11  ;;  %v19016_v57 = vld [vmem:[#allocation51_spill] sm:$0xff] }
  0xc4   :  { %11322 = vmatmul.mubr.msk.f32.gmra.mrb[52].mxu1 %vm175_vm1, %v18996_v26  ;;  %v19008_v26 = vld [vmem:[#allocation43_spill] sm:$0xff] }
  0xc5   :  { %11754 = vmatmul.mubr.msk.f32.gmra.mrb[20].mxu0 %vm175_vm1, %v15673_v53  ;;  %11324 = vmatprep.mubr.msk.f32.mxu1 %vm175_vm1, %v18997_v31  ;;  %v19009_v31 = vld [vmem:[#allocation45_spill] sm:$0xff]  ;;  %19010 = vst [vmem:[#allocation43_spill] sm:$0xff] %v15745_v61  ;;  %v19051_v53 = vld [vmem:[#allocation55_spill] sm:$0xff] }
  0xc6   :  { %11756 = vmatprep.mubr.msk.f32.mxu0 %vm175_vm1, %v15678_v2  ;;  %19011 = vst [vmem:[#allocation45_spill] sm:$0xff] %v15749_v8  ;;  %v19050_v2 = vld [vmem:[#allocation54_spill] sm:$0xff] }
  0xc8   :  { %11325 = vmatmul.mubr.msk.f32.gmra.mrb[54].mxu1 %vm175_vm1, %v19000_v5  ;;  %v19012_v5 = vld [vmem:[#allocation47_spill] sm:$0xff] }
  0xc9   :  { %11757 = vmatmul.mubr.msk.f32.gmra.mrb[22].mxu0 %vm175_vm1, %v15691_v48  ;;  %11327 = vmatprep.mubr.msk.f32.mxu1 %vm175_vm1, %v19001_v41  ;;  %v19013_v41 = vld [vmem:[#allocation49_spill] sm:$0xff]  ;;  %19015 = vst [vmem:[#allocation47_spill] sm:$0xff] %v15763_v23  ;;  %v9294_v48 = vld [vmem:[%s18781_s2 + $0x1a0] sm:$0xff] }
  0xca   :  { %11759 = vmatprep.mubr.msk.f32.mxu0 %vm175_vm1, %v15696_v19 }
  0xcc   :  { %11328 = vmatmul.mubr.msk.f32.gmra.mrb[56].mxu1 %vm175_vm1, %v19004_v47  ;;  %v9116_v47 = vld [vmem:[%s18781_s2 + $0xd0] sm:$0xff] }
  0xcd   :  { %11760 = vmatmul.mubr.msk.f32.gmra.mrb[24].mxu0 %vm175_vm1, %v15709_v44  ;;  %11330 = vmatprep.mubr.msk.f32.mxu1 %vm175_vm1, %v19005_v35  ;;  %v9117_v35 = vld [vmem:[%s18781_s2 + $0xd8] sm:$0xff] }
  0xce   :  { %11762 = vmatprep.mubr.msk.f32.mxu0 %vm175_vm1, %v15714_v14  ;;  %v13087_v16 = vpack.c.bf16 %v9117_v35, %v9116_v47  ;;  %v9120_v47 = vld [vmem:[%s18781_s2 + $0xf0] sm:$0xff]  ;;  %v9121_v35 = vld [vmem:[%s18781_s2 + $0xf8] sm:$0xff] }
  0xd0   :  { %11331 = vmatmul.mubr.msk.f32.gmra.mrb[58].mxu1 %vm175_vm1, %v19008_v26  ;;  %v9118_v26 = vld [vmem:[%s18781_s2 + $0xe0] sm:$0xff] }
  0xd1   :  { %11763 = vmatmul.mubr.msk.f32.gmra.mrb[26].mxu0 %vm175_vm1, %v15727_v49  ;;  %11333 = vmatprep.mubr.msk.f32.mxu1 %vm175_vm1, %v19009_v31  ;;  %v9119_v31 = vld [vmem:[%s18781_s2 + $0xe8] sm:$0xff]  ;;  %v19049_v49 = vld [vmem:[#allocation53_spill] sm:$0xff] }
  0xd2   :  { %11765 = vmatprep.mubr.msk.f32.mxu0 %vm175_vm1, %v15732_v60  ;;  %v13091_v11 = vpack.c.bf16 %v9119_v31, %v9118_v26  ;;  %v9122_v26 = vld [vmem:[%s18781_s2 + $0x100] sm:$0xff]  ;;  %v9123_v31 = vld [vmem:[%s18781_s2 + $0x108] sm:$0xff]  ;;  %v19048_v60 = vld [vmem:[#allocation52_spill] sm:$0xff] }
  0xd4   :  { %11334 = vmatmul.mubr.msk.f32.gmra.mrb[60].mxu1 %vm175_vm1, %v19012_v5  ;;  %v14209_v5 = vld [vmem:[%s18780_s0 + $0x8] sm:$0xff] }
  0xd5   :  { %11766 = vmatmul.mubr.msk.f32.gmra.mrb[28].mxu0 %vm175_vm1, %v15745_v61  ;;  %11336 = vmatprep.mubr.msk.f32.mxu1 %vm175_vm1, %v19013_v41  ;;  %v14210_v41 = vld [vmem:[%s18780_s0 + $0x10] sm:$0xff] }
  0xd6   :  { %11768 = vmatprep.mubr.msk.f32.mxu0 %vm175_vm1, %v15749_v8  ;;  %v19046_v8 = vld [vmem:[#allocation48_spill] sm:$0xff] }
  0xd7   :  { %v9292_v61 = vld [vmem:[%s18781_s2 + $0x190] sm:$0xff] }
  0xd8   :  { %11337 = vmatmul.mubr.msk.f32.gmra.mrb[62].mxu1 %vm175_vm1, %v19016_v57  ;;  %v14211_v57 = vld [vmem:[%s18780_s0 + $0x18] sm:$0xff] }
  0xd9   :  { %11769 = vmatmul.mubr.msk.f32.gmra.mrb[30].mxu0 %vm175_vm1, %v15763_v23  ;;  %11363 = vmatprep.mubr.msk.f32.mxu1 %vm175_vm1, %v14208_v25  ;;  %v13095_v25 = vpack.c.bf16 %v9121_v35, %v9120_v47  ;;  %v9124_v47 = vld [vmem:[%s18781_s2 + $0x110] sm:$0xff]  ;;  %v9125_v35 = vld [vmem:[%s18781_s2 + $0x118] sm:$0xff] }
  0xdc   :  { %11364 = vmatmul.mubr.msk.f32.vlgmr.msra.gmra.mrb[32].mxu1 %vm175_vm1, %v14209_v5  ;;  %v14213_v5 = vld [vmem:[%s18780_s0 + $0x28] sm:$0xff] }
  0xdd   :  { %11366 = vmatprep.mubr.msk.f32.mxu1 %vm175_vm1, %v14210_v41  ;;  %13086 = vmatpush3.bf16.msra.mxu1 %v15588_v59  ;;  %v14212_v59 = vld [vmem:[%s18780_s0 + $0x20] sm:$0xff]  ;;  %v13099_v41 = vpack.c.bf16 %v9123_v31, %v9122_v26  ;;  %v9203_v31 = vld [vmem:[%s18781_s2 + $0x128] sm:$0xff] }
  0xde   :  { %13088 = vmatprep.subr.bf16.mxu1 %v13087_v16  ;;  %v9202_v26 = vld [vmem:[%s18781_s2 + $0x120] sm:$0xff] }
  0xe0   :  { %11367 = vmatmul.mubr.msk.f32.gmra.mrb[34].mxu1 %vm175_vm1, %v14211_v57  ;;  %v14215_v57 = vld [vmem:[%s18780_s0 + $0x38] sm:$0xff] }
  0xe1   :  { %11369 = vmatprep.mubr.msk.f32.mxu1 %vm175_vm1, %v14212_v59  ;;  %13090 = vmatpush3.bf16.msra.mxu1 %v13087_v16  ;;  %v14214_v16 = vld [vmem:[%s18780_s0 + $0x30] sm:$0xff]  ;;  %v13103_v59 = vpack.c.bf16 %v9125_v35, %v9124_v47  ;;  %v14219_v47 = vld [vmem:[%s18780_s0 + $0x58] sm:$0xff]  ;;  %v14220_v35 = vld [vmem:[%s18780_s0 + $0x60] sm:$0xff] }
  0xe2   :  { %13092 = vmatprep.subr.bf16.mxu1 %v13091_v11 }
  0xe4   :  { %11370 = vmatmul.mubr.msk.f32.gmra.mrb[36].mxu1 %vm175_vm1, %v14213_v5  ;;  %v14217_v5 = vld [vmem:[%s18780_s0 + $0x48] sm:$0xff] }
  0xe5   :  { %11372 = vmatprep.mubr.msk.f32.mxu1 %vm175_vm1, %v14214_v16  ;;  %13094 = vmatpush3.bf16.msra.mxu1 %v13091_v11  ;;  %v14216_v11 = vld [vmem:[%s18780_s0 + $0x40] sm:$0xff]  ;;  %v13131_v16 = vpack.c.bf16 %v9203_v31, %v9202_v26  ;;  %v14225_v26 = vld [vmem:[%s18780_s0 + $0x88] sm:$0xff]  ;;  %v14226_v31 = vld [vmem:[%s18780_s0 + $0x90] sm:$0xff] }
  0xe6   :  { %13096 = vmatprep.subr.bf16.mxu1 %v13095_v25 }
  0xe8   :  { %11373 = vmatmul.mubr.msk.f32.gmra.mrb[38].mxu1 %vm175_vm1, %v14215_v57  ;;  %v14222_v57 = vld [vmem:[%s18780_s0 + $0x70] sm:$0xff] }
  0xe9   :  { %11375 = vmatprep.mubr.msk.f32.mxu1 %vm175_vm1, %v14216_v11  ;;  %13098 = vmatpush3.bf16.msra.mxu1 %v13095_v25  ;;  %v14218_v25 = vld [vmem:[%s18780_s0 + $0x50] sm:$0xff]  ;;  %v14223_v11 = vld [vmem:[%s18780_s0 + $0x78] sm:$0xff] }
  0xea   :  { %13100 = vmatprep.subr.bf16.mxu1 %v13099_v41 }
  0xec   :  { %11376 = vmatmul.mubr.msk.f32.gmra.mrb[40].mxu1 %vm175_vm1, %v14217_v5  ;;  %v14227_v5 = vld [vmem:[%s18780_s0 + $0x98] sm:$0xff] }
  0xed   :  { %11378 = vmatprep.mubr.msk.f32.mxu1 %vm175_vm1, %v14218_v25  ;;  %13102 = vmatpush3.bf16.msra.mxu1 %v13099_v41  ;;  %v14221_v41 = vld [vmem:[%s18780_s0 + $0x68] sm:$0xff] }
  0xee   :  { %13104 = vmatprep.subr.bf16.mxu1 %v13103_v59  ;;  %v19021_v25 = vld [vmem:[#allocation7_spill] sm:$0xff] }
  0xf0   :  { %11379 = vmatmul.mubr.msk.f32.gmra.mrb[42].mxu1 %vm175_vm1, %v14219_v47 }
  0xf1   :  { %11381 = vmatprep.mubr.msk.f32.mxu1 %vm175_vm1, %v14220_v35  ;;  %13106 = vmatpush3.bf16.msra.mxu1 %v13103_v59  ;;  %v14224_v59 = vld [vmem:[%s18780_s0 + $0x80] sm:$0xff]  ;;  %v9211_v35 = vld [vmem:[%s18781_s2 + $0x168] sm:$0xff] }
  0xf2   :  { %13132 = vmatprep.subr.bf16.mxu1 %v13131_v16 }
  0xf4   :  { %11382 = vmatmul.mubr.msk.f32.gmra.mrb[44].mxu1 %vm175_vm1, %v14221_v41  ;;  %v19022_v41 = vld [vmem:[#allocation8_spill] sm:$0xff] }
  0xf5   :  { %11384 = vmatprep.mubr.msk.f32.mxu1 %vm175_vm1, %v14222_v57  ;;  %v19023_v57 = vld [vmem:[#allocation9_spill] sm:$0xff] }
  0xf8   :  { %11385 = vmatmul.mubr.msk.f32.gmra.mrb[46].mxu1 %vm175_vm1, %v14223_v11 }
  0xf9   :  { %11387 = vmatprep.mubr.msk.f32.mxu1 %vm175_vm1, %v14224_v59  ;;  %v9212_v59 = vld [vmem:[%s18781_s2 + $0x170] sm:$0xff] }
  0xfc   :  { %11388 = vmatmul.mubr.msk.f32.gmra.mrb[48].mxu1 %vm175_vm1, %v14225_v26  ;;  %v9213_v26 = vld [vmem:[%s18781_s2 + $0x178] sm:$0xff] }
  0xfd   :  { %11390 = vmatprep.mubr.msk.f32.mxu1 %vm175_vm1, %v14226_v31  ;;  %v19024_v31 = vld [vmem:[#allocation10_spill] sm:$0xff] }
 0x100   :  { %11391 = vmatmul.mubr.msk.f32.gmra.mrb[50].mxu1 %vm175_vm1, %v14227_v5  ;;  %v19025_v5 = vld [vmem:[#allocation11_spill] sm:$0xff] }
 0x101   :  { %11393 = vmatprep.mubr.msk.f32.mxu1 %vm175_vm1, %v14790_v54  ;;  %v9204_v54 = vld [vmem:[%s18781_s2 + $0x130] sm:$0xff] }
 0x104   :  { %11394 = vmatmul.mubr.msk.f32.gmra.mrb[52].mxu1 %vm175_vm1, %v14800_v28  ;;  %v9205_v28 = vld [vmem:[%s18781_s2 + $0x138] sm:$0xff] }
 0x105   :  { %11396 = vmatprep.mubr.msk.f32.mxu1 %vm175_vm1, %v14831_v52  ;;  %v19017_v52 = vld [vmem:[#allocation3_spill] sm:$0xff] }
 0x108   :  { %11397 = vmatmul.mubr.msk.f32.gmra.mrb[54].mxu1 %vm175_vm1, %v14842_v20  ;;  %v13135_v20 = vpack.c.bf16 %v9205_v28, %v9204_v54  ;;  %v13151_v54 = vpack.c.bf16 %v9213_v26, %v9212_v59  ;;  %v9290_v28 = vld [vmem:[%s18781_s2 + $0x180] sm:$0xff]  ;;  %v19034_v26 = vld [vmem:[#allocation24_spill] sm:$0xff] }
 0x109   :  { %11399 = vmatprep.mubr.msk.f32.mxu1 %vm175_vm1, %v14870_v12  ;;  %v9206_v12 = vld [vmem:[%s18781_s2 + $0x140] sm:$0xff] }
 0x10c   :  { %11400 = vmatmul.mubr.msk.f32.gmra.mrb[56].mxu1 %vm175_vm1, %v14880_v46  ;;  %v9207_v46 = vld [vmem:[%s18781_s2 + $0x148] sm:$0xff] }
 0x10d   :  { %11402 = vmatprep.mubr.msk.f32.mxu1 %vm175_vm1, %v14908_v34  ;;  %v19018_v34 = vld [vmem:[#allocation4_spill] sm:$0xff] }
 0x110   :  { %11403 = vmatmul.mubr.msk.f32.gmra.mrb[58].mxu1 %vm175_vm1, %v14918_v4  ;;  %v19019_v4 = vld [vmem:[#allocation5_spill] sm:$0xff] }
 0x111   :  { %11405 = vmatprep.mubr.msk.f32.mxu1 %vm175_vm1, %v14946_v32  ;;  %v13139_v32 = vpack.c.bf16 %v9207_v46, %v9206_v12  ;;  %v19027_v12 = vld [vmem:[#allocation13_spill] sm:$0xff] }
 0x114   :  { %11406 = vmatmul.mubr.msk.f32.gmra.mrb[60].mxu1 %vm175_vm1, %v14956_v15  ;;  %v9208_v15 = vld [vmem:[%s18781_s2 + $0x150] sm:$0xff] }
 0x115   :  { %11408 = vmatprep.mubr.msk.f32.mxu1 %vm175_vm1, %v14984_v58  ;;  %v9209_v58 = vld [vmem:[%s18781_s2 + $0x158] sm:$0xff] }
 0x116   :  { %v13143_v47 = vpack.c.bf16 %v9209_v58, %v9208_v15  ;;  %v19029_v15 = vld [vmem:[#allocation15_spill] sm:$0xff] }
 0x118   :  { %11409 = vmatmul.mubr.msk.f32.gmra.mrb[62].mxu1 %vm175_vm1, %v14994_v37  ;;  %v19020_v37 = vld [vmem:[#allocation6_spill] sm:$0xff] }
 0x119   :  { %11507 = vmatprep.mubr.msk.f32.mxu1 %vm175_vm1, %v19017_v52  ;;  %v9291_v52 = vld [vmem:[%s18781_s2 + $0x188] sm:$0xff] }
 0x11a   :  { %v13179_v46 = vpack.c.bf16 %v9291_v52, %v9290_v28  ;;  %v19036_v28 = vld [vmem:[#allocation28_spill] sm:$0xff]  ;;  %v19037_v52 = vld [vmem:[#allocation30_spill] sm:$0xff] }
 0x11c   :  { %11508 = vmatmul.mubr.msk.f32.vlgmr.msra.gmra.mrb[32].mxu1 %vm175_vm1, %v19018_v34 }
 0x11d   :  { %11510 = vmatprep.mubr.msk.f32.mxu1 %vm175_vm1, %v19019_v4  ;;  %13134 = vmatpush3.bf16.msra.mxu1 %v13131_v16  ;;  %v9210_v16 = vld [vmem:[%s18781_s2 + $0x160] sm:$0xff] }
 0x11e   :  { %13136 = vmatprep.subr.bf16.mxu1 %v13135_v20  ;;  %v13147_v11 = vpack.c.bf16 %v9211_v35, %v9210_v16 }
 0x120   :  { %11511 = vmatmul.mubr.msk.f32.gmra.mrb[34].mxu1 %vm175_vm1, %v19020_v37 }
 0x121   :  { %11513 = vmatprep.mubr.msk.f32.mxu1 %vm175_vm1, %v19021_v25  ;;  %13138 = vmatpush3.bf16.msra.mxu1 %v13135_v20  ;;  %v19026_v20 = vld [vmem:[#allocation12_spill] sm:$0xff] }
 0x122   :  { %13140 = vmatprep.subr.bf16.mxu1 %v13139_v32  ;;  %v19030_v25 = vld [vmem:[#allocation16_spill] sm:$0xff] }
 0x124   :  { %11514 = vmatmul.mubr.msk.f32.gmra.mrb[36].mxu1 %vm175_vm1, %v19022_v41  ;;  %v19032_v41 = vld [vmem:[#allocation20_spill] sm:$0xff] }
 0x125   :  { %11516 = vmatprep.mubr.msk.f32.mxu1 %vm175_vm1, %v19023_v57  ;;  %13142 = vmatpush3.bf16.msra.mxu1 %v13139_v32  ;;  %v19028_v32 = vld [vmem:[#allocation14_spill] sm:$0xff] }
 0x126   :  { %13144 = vmatprep.subr.bf16.mxu1 %v13143_v47  ;;  %v19033_v57 = vld [vmem:[#allocation22_spill] sm:$0xff] }
 0x128   :  { %11517 = vmatmul.mubr.msk.f32.gmra.mrb[38].mxu1 %vm175_vm1, %v19024_v31  ;;  %v19035_v31 = vld [vmem:[#allocation26_spill] sm:$0xff] }
 0x129   :  { %11519 = vmatprep.mubr.msk.f32.mxu1 %vm175_vm1, %v19025_v5  ;;  %13146 = vmatpush3.bf16.msra.mxu1 %v13143_v47  ;;  %v19031_v47 = vld [vmem:[#allocation18_spill] sm:$0xff] }
 0x12a   :  { %13148 = vmatprep.subr.bf16.mxu1 %v13147_v11 }
 0x12c   :  { %11520 = vmatmul.mubr.msk.f32.gmra.mrb[40].mxu1 %vm175_vm1, %v19026_v20 }
 0x12d   :  { %11522 = vmatprep.mubr.msk.f32.mxu1 %vm175_vm1, %v19027_v12  ;;  %13150 = vmatpush3.bf16.msra.mxu1 %v13147_v11 }
 0x12e   :  { %13152 = vmatprep.subr.bf16.mxu1 %v13151_v54 }
 0x12f   :  { %v15968_v34 = vpop.f32.mrb[0].mxu1 }
 0x130   :  { %v15970_v4 = vpop.f32.mrb[1].mxu1  ;;  %11523 = vmatmul.mubr.msk.f32.gmra.mrb[42].mxu1 %vm175_vm1, %v19028_v32  ;;  %v19038_v32 = vld [vmem:[#allocation32_spill] sm:$0xff] }
 0x131   :  { %11525 = vmatprep.mubr.msk.f32.mxu1 %vm175_vm1, %v19029_v15  ;;  %13154 = vmatpush3.bf16.msra.mxu1 %v13151_v54  ;;  %v19039_v15 = vld [vmem:[#allocation34_spill] sm:$0xff] }
 0x132   :  { %13180 = vmatprep.subr.bf16.mxu1 %v13179_v46 }
 0x133   :  { %v15976_v58 = vpop.f32.mrb[2].mxu1 }
 0x134   :  { %v15978_v37 = vpop.f32.mrb[3].mxu1  ;;  %11526 = vmatmul.mubr.msk.f32.gmra.mrb[44].mxu1 %vm175_vm1, %v19030_v25 }
 0x135   :  { %11528 = vmatprep.mubr.msk.f32.mxu1 %vm175_vm1, %v19031_v47 }
 0x137   :  { %v15984_v16 = vpop.f32.mrb[4].mxu1 }
 0x138   :  { %v15986_v35 = vpop.f32.mrb[5].mxu1  ;;  %11529 = vmatmul.mubr.msk.f32.gmra.mrb[46].mxu1 %vm175_vm1, %v19032_v41  ;;  %v19040_v41 = vld [vmem:[#allocation36_spill] sm:$0xff] }
 0x139   :  { %11531 = vmatprep.mubr.msk.f32.mxu1 %vm175_vm1, %v19033_v57  ;;  %v19041_v57 = vld [vmem:[#allocation38_spill] sm:$0xff] }
 0x13b   :  { %v15992_v11 = vpop.f32.mrb[6].mxu1 }
 0x13c   :  { %v15994_v59 = vpop.f32.mrb[7].mxu1  ;;  %11532 = vmatmul.mubr.msk.f32.gmra.mrb[48].mxu1 %vm175_vm1, %v19034_v26 }
 0x13d   :  { %11534 = vmatprep.mubr.msk.f32.mxu1 %vm175_vm1, %v19035_v31 }
 0x13f   :  { %v16000_v5 = vpop.f32.mrb[8].mxu1 }
 0x140   :  { %v16002_v54 = vpop.f32.mrb[9].mxu1  ;;  %11535 = vmatmul.mubr.msk.f32.gmra.mrb[50].mxu1 %vm175_vm1, %v19036_v28  ;;  %v19042_v28 = vld [vmem:[#allocation40_spill] sm:$0xff] }
 0x141   :  { %11537 = vmatprep.mubr.msk.f32.mxu1 %vm175_vm1, %v19037_v52  ;;  %v19043_v52 = vld [vmem:[#allocation42_spill] sm:$0xff] }
 0x143   :  { %v16008_v20 = vpop.f32.mrb[10].mxu1 }
 0x144   :  { %v16010_v12 = vpop.f32.mrb[11].mxu1  ;;  %11538 = vmatmul.mubr.msk.f32.gmra.mrb[52].mxu1 %vm175_vm1, %v19038_v32 }
 0x145   :  { %11540 = vmatprep.mubr.msk.f32.mxu1 %vm175_vm1, %v19039_v15 }
 0x147   :  { %v16016_v25 = vpop.f32.mrb[12].mxu1 }
 0x148   :  { %v16018_v47 = vpop.f32.mrb[13].mxu1  ;;  %11541 = vmatmul.mubr.msk.f32.gmra.mrb[54].mxu1 %vm175_vm1, %v19040_v41  ;;  %v19045_v41 = vld [vmem:[#allocation46_spill] sm:$0xff] }
 0x149   :  { %11543 = vmatprep.mubr.msk.f32.mxu1 %vm175_vm1, %v19041_v57 }
 0x14b   :  { %v16024_v26 = vpop.f32.mrb[14].mxu1 }
 0x14c   :  { %v16026_v31 = vpop.f32.mrb[15].mxu1  ;;  %11544 = vmatmul.mubr.msk.f32.gmra.mrb[56].mxu1 %vm175_vm1, %v19042_v28  ;;  %v19047_v28 = vld [vmem:[#allocation50_spill] sm:$0xff] }
 0x14d   :  { %11546 = vmatprep.mubr.msk.f32.mxu1 %vm175_vm1, %v19043_v52 }
 0x14f   :  { %v16032_v32 = vpop.f32.mrb[16].mxu1 }
 0x150   :  { %v16034_v15 = vpop.f32.mrb[17].mxu1  ;;  %11547 = vmatmul.mubr.msk.f32.gmra.mrb[58].mxu1 %vm175_vm1, %v19044_v17  ;;  %v9293_v17 = vld [vmem:[%s18781_s2 + $0x198] sm:$0xff] }
 0x151   :  { %11549 = vmatprep.mubr.msk.f32.mxu1 %vm175_vm1, %v19045_v41  ;;  %v13183_v14 = vpack.c.bf16 %v9293_v17, %v9292_v61 }
 0x153   :  { %v16040_v57 = vpop.f32.mrb[18].mxu1 }
 0x154   :  { %v16042_v23 = vpop.f32.mrb[19].mxu1  ;;  %11550 = vmatmul.mubr.msk.f32.gmra.mrb[60].mxu1 %vm175_vm1, %v19046_v8  ;;  %v9335_v8 = vld [vmem:[%s18782_s4 + $0x58] sm:$0xff] }
 0x155   :  { %11552 = vmatprep.mubr.msk.f32.mxu1 %vm175_vm1, %v19047_v28  ;;  %v9336_v28 = vld [vmem:[%s18782_s4 + $0x60] sm:$0xff] }
 0x156   :  { %v13203_v44 = vpack.c.bf16 %v9336_v28, %v9335_v8  ;;  %v9296_v8 = vld [vmem:[%s18781_s2 + $0x1b0] sm:$0xff]  ;;  %v9297_v28 = vld [vmem:[%s18781_s2 + $0x1b8] sm:$0xff] }
 0x157   :  { %v16048_v52 = vpop.f32.mrb[20].mxu1 }
 0x158   :  { %v16056_v41 = vpop.f32.mrb[21].mxu1  ;;  %11553 = vmatmul.mubr.msk.f32.gmra.mrb[62].mxu1 %vm175_vm1, %v19048_v60  ;;  %13204 = vmatprep.subr.bf16.mxu0 %v13203_v44 }
 0x159   :  { %11651 = vmatprep.mubr.msk.f32.mxu1 %vm175_vm1, %v19049_v49  ;;  %v9295_v49 = vld [vmem:[%s18781_s2 + $0x1a8] sm:$0xff]  ;;  %13206 = vmatpush3.bf16.msra.mxu0 %v13203_v44 }
 0x15a   :  { %v13187_v61 = vpack.c.bf16 %v9295_v49, %v9294_v48  ;;  %v13191_v48 = vpack.c.bf16 %v9297_v28, %v9296_v8  ;;  %v9299_v49 = vld [vmem:[%s18781_s2 + $0x1c8] sm:$0xff]  ;;  %v9300_v28 = vld [vmem:[%s18781_s2 + $0x1d0] sm:$0xff] }
 0x15b   :  { %v16068_v19 = vpop.f32.mrb[22].mxu1 }
 0x15c   :  { %v16076_v60 = vpop.f32.mrb[23].mxu1  ;;  %11652 = vmatmul.mubr.msk.f32.vlgmr.msra.gmra.mrb[32].mxu1 %vm175_vm1, %v19050_v2  ;;  %v19052_v2 = vld [vmem:[#allocation56_spill] sm:$0xff] }
 0x15d   :  { %11654 = vmatprep.mubr.msk.f32.mxu1 %vm175_vm1, %v19051_v53  ;;  %13182 = vmatpush3.bf16.msra.mxu1 %v13179_v46  ;;  %v19053_v53 = vld [vmem:[#allocation57_spill] sm:$0xff]  ;;  %v9298_v46 = vld [vmem:[%s18781_s2 + $0x1c0] sm:$0xff] }
 0x15e   :  { %13184 = vmatprep.subr.bf16.mxu1 %v13183_v14 }
 0x15f   :  { %v16082_v17 = vpop.f32.mrb[24].mxu1 }
 0x160   :  { %v16090_v33 = vpop.f32.mrb[25].mxu1  ;;  %11655 = vmatmul.mubr.msk.f32.gmra.mrb[34].mxu1 %vm175_vm1, %v19052_v2  ;;  %v19055_v2 = vld [vmem:[#allocation59_spill] sm:$0xff] }
 0x161   :  { %11657 = vmatprep.mubr.msk.f32.mxu1 %vm175_vm1, %v19053_v53  ;;  %13186 = vmatpush3.bf16.msra.mxu1 %v13183_v14  ;;  %v13195_v14 = vpack.c.bf16 %v9299_v49, %v9298_v46  ;;  %v9301_v53 = vld [vmem:[%s18781_s2 + $0x1d8] sm:$0xff] }
 0x162   :  { %13188 = vmatprep.subr.bf16.mxu1 %v13187_v61  ;;  %v9412_v49 = vld [vmem:[%s18783_s5 + $0x58] sm:$0xff] }
 0x163   :  { %v16096_v44 = vpop.f32.mrb[26].mxu1 }
 0x164   :  { %v16104_v21 = vpop.f32.mrb[27].mxu1  ;;  %11658 = vmatmul.mubr.msk.f32.gmra.mrb[36].mxu1 %vm175_vm1, %v19054_v27  ;;  %v19057_v27 = vld [vmem:[#allocation61_spill] sm:$0xff] }
 0x165   :  { %11660 = vmatprep.mubr.msk.f32.mxu1 %vm175_vm1, %v19055_v2  ;;  %13190 = vmatpush3.bf16.msra.mxu1 %v13187_v61  ;;  %v13199_v61 = vpack.c.bf16 %v9301_v53, %v9300_v28  ;;  %v9413_v2 = vld [vmem:[%s18783_s5 + $0x60] sm:$0xff] }
 0x166   :  { %13192 = vmatprep.subr.bf16.mxu1 %v13191_v48 }
 0x167   :  { %v16110_v8 = vpop.f32.mrb[28].mxu1 }
 0x168   :  { %v16118_v30 = vpop.f32.mrb[29].mxu1  ;;  %11661 = vmatmul.mubr.msk.f32.gmra.mrb[38].mxu1 %vm175_vm1, %v19056_v62  ;;  %v16138_v62 = vpack.c.bf16 %v9413_v2, %v9412_v49  ;;  %v19059_v49 = vld [vmem:[#allocation63_spill] sm:$0xff]  ;;  %v19060_v2 = vld [vmem:[#allocation64_spill] sm:$0xff] }
 0x169   :  { %11663 = vmatprep.mubr.msk.f32.mxu1 %vm175_vm1, %v19057_v27  ;;  %13194 = vmatpush3.bf16.msra.mxu1 %v13191_v48 }
 0x16a   :  { %13196 = vmatprep.subr.bf16.mxu1 %v13195_v14 }
 0x16b   :  { %v16124_v46 = vpop.f32.mrb[30].mxu1 }
 0x16c   :  { %v16132_v13 = vpop.f32.mrb[31].mxu1  ;;  %11664 = vmatmul.mubr.msk.f32.gmra.mrb[40].mxu1 %vm175_vm1, %v15223_v22 }
 0x16d   :  { %11666 = vmatprep.mubr.msk.f32.mxu1 %vm175_vm1, %v15228_v10  ;;  %13198 = vmatpush3.bf16.msra.mxu1 %v13195_v14 }
 0x16e   :  { %13200 = vmatprep.subr.bf16.mxu1 %v13199_v61 }
 0x170   :  { %v11725_v48 = vpop.f32.mrb[0].mxu0  ;;  %11667 = vmatmul.mubr.msk.f32.gmra.mrb[42].mxu1 %vm175_vm1, %v15247_v29 }
 0x171   :  { %v16143_v28 = vadd.f32 %v11725_v48, %v15968_v34  ;;  %v2923_v53 = vpop.f32.mrb[1].mxu0  ;;  %11669 = vmatprep.mubr.msk.f32.mxu1 %vm175_vm1, %v15252_v9  ;;  %13202 = vmatpush3.bf16.msra.mxu1 %v13199_v61  ;;  %v19058_v61 = vld [vmem:[#allocation62_spill] sm:$0xff]  ;;  %v19061_v48 = vld [vmem:[#allocation65_spill] sm:$0xff] }
 0x172   :  { %v16148_v22 = vadd.f32 %v2923_v53, %v15970_v4  ;;  %13244 = vmatprep.subr.bf16.mxu1 %v16138_v62 }
 0x174   :  { %v11728_v10 = vpop.f32.mrb[2].mxu0  ;;  %11670 = vmatmul.mubr.msk.f32.gmra.mrb[44].mxu1 %vm175_vm1, %v15267_v6 }
 0x175   :  { %v16154_v14 = vadd.f32 %v11728_v10, %v15976_v58  ;;  %v2933_v29 = vpop.f32.mrb[3].mxu0  ;;  %11672 = vmatprep.mubr.msk.f32.mxu1 %vm175_vm1, %v15272_v38  ;;  %v19062_v10 = vld [vmem:[#allocation66_spill] sm:$0xff] }
 0x176   :  { %v16159_v34 = vadd.f32 %v2933_v29, %v15978_v37 }
 0x178   :  { %v11731_v9 = vpop.f32.mrb[4].mxu0  ;;  %11673 = vmatmul.mubr.msk.f32.gmra.mrb[46].mxu1 %vm175_vm1, %v15286_v63 }
 0x179   :  { %v16164_v4 = vadd.f32 %v11731_v9, %v15984_v16  ;;  %v2943_v27 = vpop.f32.mrb[5].mxu0  ;;  %11675 = vmatprep.mubr.msk.f32.mxu1 %vm175_vm1, %v19058_v61  ;;  %v19063_v9 = vld [vmem:[#allocation67_spill] sm:$0xff]  ;;  %v19064_v61 = vld [vmem:[#allocation68_spill] sm:$0xff] }
 0x17a   :  { %v16169_v6 = vadd.f32 %v2943_v27, %v15986_v35 }
 0x17c   :  { %v11734_v58 = vpop.f32.mrb[6].mxu0  ;;  %11676 = vmatmul.mubr.msk.f32.gmra.mrb[48].mxu1 %vm175_vm1, %v19059_v49  ;;  %v19065_v49 = vld [vmem:[#allocation69_spill] sm:$0xff] }
 0x17d   :  { %v16174_v38 = vadd.f32 %v11734_v58, %v15992_v11  ;;  %v2953_v37 = vpop.f32.mrb[7].mxu0  ;;  %11678 = vmatprep.mubr.msk.f32.mxu1 %vm175_vm1, %v19060_v2  ;;  %v19066_v2 = vld [vmem:[#allocation70_spill] sm:$0xff] }
 0x17e   :  { %v16179_v63 = vadd.f32 %v2953_v37, %v15994_v59 }
 0x180   :  { %v11737_v16 = vpop.f32.mrb[8].mxu0  ;;  %11679 = vmatmul.mubr.msk.f32.gmra.mrb[50].mxu1 %vm175_vm1, %v19061_v48  ;;  %v19067_v48 = vld [vmem:[#allocation71_spill] sm:$0xff] }
 0x181   :  { %v16184_v35 = vadd.f32 %v11737_v16, %v16000_v5  ;;  %v2963_v53 = vpop.f32.mrb[9].mxu0  ;;  %11681 = vmatprep.mubr.msk.f32.mxu1 %vm175_vm1, %v19062_v10  ;;  %v19068_v10 = vld [vmem:[#allocation72_spill] sm:$0xff] }
 0x182   :  { %v16189_v11 = vadd.f32 %v2963_v53, %v16002_v54 }
 0x184   :  { %v11740_v29 = vpop.f32.mrb[10].mxu0  ;;  %11682 = vmatmul.mubr.msk.f32.gmra.mrb[52].mxu1 %vm175_vm1, %v19063_v9  ;;  %v19069_v9 = vld [vmem:[#allocation73_spill] sm:$0xff] }
 0x185   :  { %v16194_v59 = vadd.f32 %v11740_v29, %v16008_v20  ;;  %v2973_v27 = vpop.f32.mrb[11].mxu0  ;;  %11684 = vmatprep.mubr.msk.f32.mxu1 %vm175_vm1, %v19064_v61  ;;  %v19070_v61 = vld [vmem:[#allocation74_spill] sm:$0xff] }
 0x186   :  { %v16199_v5 = vadd.f32 %v2973_v27, %v16010_v12 }
 0x188   :  { %v11743_v58 = vpop.f32.mrb[12].mxu0  ;;  %11685 = vmatmul.mubr.msk.f32.gmra.mrb[54].mxu1 %vm175_vm1, %v19065_v49  ;;  %v19071_v49 = vld [vmem:[#allocation75_spill] sm:$0xff] }
 0x189   :  { %v16204_v54 = vadd.f32 %v11743_v58, %v16016_v25  ;;  %v2983_v37 = vpop.f32.mrb[13].mxu0  ;;  %11687 = vmatprep.mubr.msk.f32.mxu1 %vm175_vm1, %v19066_v2  ;;  %v19072_v2 = vld [vmem:[#allocation76_spill] sm:$0xff] }
 0x18a   :  { %v16209_v20 = vadd.f32 %v2983_v37, %v16018_v47 }
 0x18c   :  { %v11746_v16 = vpop.f32.mrb[14].mxu0  ;;  %11688 = vmatmul.mubr.msk.f32.gmra.mrb[56].mxu1 %vm175_vm1, %v19067_v48 }
 0x18d   :  { %v16214_v12 = vadd.f32 %v11746_v16, %v16024_v26  ;;  %v2993_v53 = vpop.f32.mrb[15].mxu0  ;;  %11690 = vmatprep.mubr.msk.f32.mxu1 %vm175_vm1, %v19068_v10 }
 0x18e   :  { %v16219_v25 = vadd.f32 %v2993_v53, %v16026_v31 }
 0x190   :  { %v11749_v29 = vpop.f32.mrb[16].mxu0  ;;  %11691 = vmatmul.mubr.msk.f32.gmra.mrb[58].mxu1 %vm175_vm1, %v19069_v9  ;;  %v19087_v9 = vld [vmem:[#allocation41_spill] sm:$0xff] }
 0x191   :  { %v16224_v47 = vadd.f32 %v11749_v29, %v16032_v32  ;;  %v3003_v27 = vpop.f32.mrb[17].mxu0  ;;  %11693 = vmatprep.mubr.msk.f32.mxu1 %vm175_vm1, %v19070_v61  ;;  %v19086_v29 = vld [vmem:[#allocation39_spill] sm:$0xff]  ;;  %v19089_v61 = vld [vmem:[#allocation45_spill] sm:$0xff] }
 0x192   :  { %v16229_v26 = vadd.f32 %v3003_v27, %v16034_v15  ;;  %v19088_v27 = vld [vmem:[#allocation43_spill] sm:$0xff] }
 0x194   :  { %v11752_v58 = vpop.f32.mrb[18].mxu0  ;;  %11694 = vmatmul.mubr.msk.f32.gmra.mrb[60].mxu1 %vm175_vm1, %v19071_v49  ;;  %v9337_v49 = vld [vmem:[%s18782_s4 + $0x68] sm:$0xff] }
 0x195   :  { %v16234_v31 = vadd.f32 %v11752_v58, %v16040_v57  ;;  %v3013_v37 = vpop.f32.mrb[19].mxu0  ;;  %11696 = vmatprep.mubr.msk.f32.mxu1 %vm175_vm1, %v19072_v2  ;;  %v19090_v58 = vld [vmem:[#allocation47_spill] sm:$0xff] }
 0x196   :  { %v16239_v32 = vadd.f32 %v3013_v37, %v16042_v23  ;;  %v9338_v37 = vld [vmem:[%s18782_s4 + $0x70] sm:$0xff]  ;;  %v9414_v2 = vld [vmem:[%s18783_s5 + $0x68] sm:$0xff] }
 0x198   :  { %v11755_v16 = vpop.f32.mrb[20].mxu0  ;;  %11697 = vmatmul.mubr.msk.f32.gmra.mrb[62].mxu1 %vm175_vm1, %v15433_v0 }
 0x199   :  { %v16244_v15 = vadd.f32 %v11755_v16, %v16048_v52  ;;  %v3023_v48 = vpop.f32.mrb[21].mxu0  ;;  %11795 = vmatprep.mubr.msk.f32.mxu1 %vm175_vm1, %v15440_v50  ;;  %v13207_v16 = vpack.c.bf16 %v9338_v37, %v9337_v49  ;;  %v16423_v49 = vld [vmem:[%s18784_s3] ss:$0 sm:$0xff] }
 0x19a   :  { %v16249_v57 = vadd.f32 %v3023_v48, %v16056_v41  ;;  %v9415_v48 = vld [vmem:[%s18783_s5 + $0x70] sm:$0xff] }
 0x19b   :  { %13208 = vmatprep.subr.bf16.mxu0 %v13207_v16 }
 0x19c   :  { %v11758_v53 = vpop.f32.mrb[22].mxu0  ;;  %11796 = vmatmul.mubr.msk.f32.vlgmr.msra.gmra.mrb[32].mxu1 %vm175_vm1, %v15459_v45  ;;  %13210 = vmatpush3.bf16.msra.mxu0 %v13207_v16 }
 0x19d   :  { %v16254_v23 = vadd.f32 %v11758_v53, %v16068_v19  ;;  %v3033_v10 = vpop.f32.mrb[23].mxu0  ;;  %11798 = vmatprep.mubr.msk.f32.mxu1 %vm175_vm1, %v15464_v40  ;;  %13246 = vmatpush3.bf16.msra.mxu1 %v16138_v62  ;;  %v19085_v62 = vld [vmem:[#allocation37_spill] sm:$0xff]  ;;  %v13247_v53 = vpack.c.bf16 %v9415_v48, %v9414_v2 }
 0x19e   :  { %v16260_v0 = vadd.f32 %v3033_v10, %v16076_v60  ;;  %v9339_v10 = vld [vmem:[%s18782_s4 + $0x78] sm:$0xff] }
 0x19f   :  { %13248 = vmatprep.subr.bf16.mxu1 %v13247_v53 }
 0x1a0   :  { %v11761_v50 = vpop.f32.mrb[24].mxu0  ;;  %11799 = vmatmul.mubr.msk.f32.gmra.mrb[34].mxu1 %vm175_vm1, %v15483_v51 }
 0x1a1   :  { %v16265_v52 = vadd.f32 %v11761_v50, %v16082_v17  ;;  %v3043_v45 = vpop.f32.mrb[25].mxu0  ;;  %11801 = vmatprep.mubr.msk.f32.mxu1 %vm175_vm1, %v15489_v56  ;;  %v9340_v50 = vld [vmem:[%s18782_s4 + $0x80] sm:$0xff]  ;;  %13250 = vmatpush3.bf16.msra.mxu1 %v13247_v53 }
 0x1a2   :  { %v16270_v19 = vadd.f32 %v3043_v45, %v16090_v33  ;;  %v9416_v45 = vld [vmem:[%s18783_s5 + $0x78] sm:$0xff] }
 0x1a4   :  { %v11764_v40 = vpop.f32.mrb[26].mxu0  ;;  %11802 = vmatmul.mubr.msk.f32.gmra.mrb[36].mxu1 %vm175_vm1, %v15508_v1 }
 0x1a5   :  { %v16275_v41 = vadd.f32 %v11764_v40, %v16096_v44  ;;  %v3053_v60 = vpop.f32.mrb[27].mxu0  ;;  %11804 = vmatprep.mubr.msk.f32.mxu1 %vm175_vm1, %v15513_v3  ;;  %v13211_v40 = vpack.c.bf16 %v9340_v50, %v9339_v10 }
 0x1a6   :  { %v16280_v51 = vadd.f32 %v3053_v60, %v16104_v21  ;;  %v9417_v60 = vld [vmem:[%s18783_s5 + $0x80] sm:$0xff] }
 0x1a7   :  { %13212 = vmatprep.subr.bf16.mxu0 %v13211_v40 }
 0x1a8   :  { %v11767_v17 = vpop.f32.mrb[28].mxu0  ;;  %11805 = vmatmul.mubr.msk.f32.gmra.mrb[38].mxu1 %vm175_vm1, %v15532_v18  ;;  %13214 = vmatpush3.bf16.msra.mxu0 %v13211_v40 }
 0x1a9   :  { %v16285_v56 = vadd.f32 %v11767_v17, %v16110_v8  ;;  %v3063_v33 = vpop.f32.mrb[29].mxu0  ;;  %11807 = vmatprep.mubr.msk.f32.mxu1 %vm175_vm1, %v15537_v55  ;;  %v19074_v55 = vld [vmem:[#allocation17_spill] sm:$0xff]  ;;  %v13251_v17 = vpack.c.bf16 %v9417_v60, %v9416_v45 }
 0x1aa   :  { %v16290_v1 = vadd.f32 %v3063_v33, %v16118_v30  ;;  %v19082_v30 = vld [vmem:[#allocation31_spill] sm:$0xff]  ;;  %v19083_v8 = vld [vmem:[#allocation33_spill] sm:$0xff] }
 0x1ab   :  { %13252 = vmatprep.subr.bf16.mxu1 %v13251_v17  ;;  %v9341_v33 = vld [vmem:[%s18782_s4 + $0x88] sm:$0xff] }
 0x1ac   :  { %v11770_v44 = vpop.f32.mrb[30].mxu0  ;;  %11808 = vmatmul.mubr.msk.f32.gmra.mrb[40].mxu1 %vm175_vm1, %v15556_v43  ;;  %v19075_v43 = vld [vmem:[#allocation77_spill] sm:$0xff] }
 0x1ad   :  { %v16295_v3 = vadd.f32 %v11770_v44, %v16124_v46  ;;  %v3073_v21 = vpop.f32.mrb[31].mxu0  ;;  %11810 = vmatprep.mubr.msk.f32.mxu1 %vm175_vm1, %v15561_v36  ;;  %v19076_v36 = vld [vmem:[#allocation19_spill] sm:$0xff]  ;;  %v9342_v44 = vld [vmem:[%s18782_s4 + $0x90] sm:$0xff]  ;;  %13254 = vmatpush3.bf16.msra.mxu1 %v13251_v17 }
 0x1ae   :  { %v16300_v18 = vadd.f32 %v3073_v21, %v16132_v13  ;;  %v19077_v13 = vld [vmem:[#allocation21_spill] sm:$0xff]  ;;  %v19084_v46 = vld [vmem:[#allocation35_spill] sm:$0xff]  ;;  %v3585_v17 = vld [vmem:[%s18782_s4 + $0x10] sm:$0xff] }
 0x1af   :  { %v9418_v21 = vld [vmem:[%s18783_s5 + $0x88] sm:$0xff] }
 0x1b0   :  { %19073 = vst [vmem:[#allocation49_spill] sm:$0xff] %v16300_v18  ;;  %11811 = vmatmul.mubr.msk.f32.gmra.mrb[42].mxu1 %vm175_vm1, %v15580_v7  ;;  %v19078_v7 = vld [vmem:[#allocation23_spill] sm:$0xff] }
 0x1b1   :  { %11813 = vmatprep.mubr.msk.f32.mxu1 %vm175_vm1, %v15585_v42  ;;  %v19079_v42 = vld [vmem:[#allocation25_spill] sm:$0xff] }
 0x1b4   :  { %11814 = vmatmul.mubr.msk.f32.gmra.mrb[44].mxu1 %vm175_vm1, %v15600_v24  ;;  %v19080_v24 = vld [vmem:[#allocation27_spill] sm:$0xff] }
 0x1b5   :  { %11816 = vmatprep.mubr.msk.f32.mxu1 %vm175_vm1, %v15605_v39  ;;  %v19081_v39 = vld [vmem:[#allocation29_spill] sm:$0xff] }
 0x1b8   :  { %11817 = vmatmul.mubr.msk.f32.gmra.mrb[46].mxu1 %vm175_vm1, %v19074_v55  ;;  %v13215_v55 = vpack.c.bf16 %v9342_v44, %v9341_v33 }
 0x1b9   :  { %11819 = vmatprep.mubr.msk.f32.mxu1 %vm175_vm1, %v19075_v43  ;;  %v9419_v43 = vld [vmem:[%s18783_s5 + $0x90] sm:$0xff] }
 0x1ba   :  { %13216 = vmatprep.subr.bf16.mxu0 %v13215_v55 }
 0x1bb   :  { %13218 = vmatpush3.bf16.msra.mxu0 %v13215_v55  ;;  %v3588_v55 = vld [vmem:[%s18782_s4 + $0x28] sm:$0xff] }
 0x1bc   :  { %11820 = vmatmul.mubr.msk.f32.gmra.mrb[48].mxu1 %vm175_vm1, %v19076_v36  ;;  %v13255_v36 = vpack.c.bf16 %v9419_v43, %v9418_v21  ;;  %v3587_v21 = vld [vmem:[%s18782_s4 + $0x20] sm:$0xff] }
 0x1bd   :  { %11822 = vmatprep.mubr.msk.f32.mxu1 %vm175_vm1, %v19077_v13  ;;  %v9343_v13 = vld [vmem:[%s18782_s4 + $0x98] sm:$0xff] }
 0x1be   :  { %13256 = vmatprep.subr.bf16.mxu1 %v13255_v36 }
 0x1bf   :  { %13258 = vmatpush3.bf16.msra.mxu1 %v13255_v36 }
 0x1c0   :  { %11823 = vmatmul.mubr.msk.f32.gmra.mrb[50].mxu1 %vm175_vm1, %v19078_v7  ;;  %v9344_v7 = vld [vmem:[%s18782_s4 + $0xa0] sm:$0xff] }
 0x1c1   :  { %11825 = vmatprep.mubr.msk.f32.mxu1 %vm175_vm1, %v19079_v42  ;;  %v9420_v42 = vld [vmem:[%s18783_s5 + $0x98] sm:$0xff] }
 0x1c4   :  { %11826 = vmatmul.mubr.msk.f32.gmra.mrb[52].mxu1 %vm175_vm1, %v19080_v24  ;;  %v13219_v24 = vpack.c.bf16 %v9344_v7, %v9343_v13  ;;  %v3599_v13 = vld [vmem:[%s18783_s5 + $0x28] sm:$0xff]  ;;  %v3589_v7 = vld [vmem:[%s18782_s4 + $0x30] sm:$0xff] }
 0x1c5   :  { %11828 = vmatprep.mubr.msk.f32.mxu1 %vm175_vm1, %v19081_v39  ;;  %v9421_v39 = vld [vmem:[%s18783_s5 + $0xa0] sm:$0xff] }
 0x1c6   :  { %13220 = vmatprep.subr.bf16.mxu0 %v13219_v24 }
 0x1c7   :  { %13222 = vmatpush3.bf16.msra.mxu0 %v13219_v24 }
 0x1c8   :  { %11829 = vmatmul.mubr.msk.f32.gmra.mrb[54].mxu1 %vm175_vm1, %v19082_v30  ;;  %v13259_v30 = vpack.c.bf16 %v9421_v39, %v9420_v42 }
 0x1c9   :  { %11831 = vmatprep.mubr.msk.f32.mxu1 %vm175_vm1, %v19083_v8  ;;  %v9345_v8 = vld [vmem:[%s18782_s4 + $0xa8] sm:$0xf] }
 0x1ca   :  { %13260 = vmatprep.subr.bf16.mxu1 %v13259_v30  ;;  %11863 = vmatprep.subr.msk.mxu0 %vm3778_vm5, %v9345_v8 }
 0x1cb   :  { %13262 = vmatpush3.bf16.msra.mxu1 %v13259_v30  ;;  %11864 = vmatpush3.msk.msra.mxu0 %vm3778_vm5, %v9345_v8  ;;  %v3590_v8 = vld [vmem:[%s18782_s4 + $0x38] sm:$0xff] }
 0x1cc   :  { %11832 = vmatmul.mubr.msk.f32.gmra.mrb[56].mxu1 %vm175_vm1, %v19084_v46  ;;  %v9422_v46 = vld [vmem:[%s18783_s5 + $0xa8] sm:$0xf] }
 0x1cd   :  { %11834 = vmatprep.mubr.msk.f32.mxu1 %vm175_vm1, %v19085_v62  ;;  %12003 = vmatprep.subr.msk.mxu1 %vm3778_vm5, %v9422_v46  ;;  %v3583_v62 = vld [vmem:[%s18782_s4] sm:$0xff] }
 0x1cf   :  { %12004 = vmatpush3.msk.msra.mxu1 %vm3778_vm5, %v9422_v46  ;;  %v3600_v46 = vld [vmem:[%s18783_s5 + $0x30] sm:$0xff] }
 0x1d0   :  { %11835 = vmatmul.mubr.msk.f32.gmra.mrb[58].mxu1 %vm175_vm1, %v19086_v29  ;;  %v3584_v29 = vld [vmem:[%s18782_s4 + $0x8] sm:$0xff] }
 0x1d1   :  { %11837 = vmatprep.mubr.msk.f32.mxu1 %vm175_vm1, %v19087_v9  ;;  %v3594_v9 = vld [vmem:[%s18783_s5] sm:$0xff] }
 0x1d4   :  { %11838 = vmatmul.mubr.msk.f32.gmra.mrb[60].mxu1 %vm175_vm1, %v19088_v27  ;;  %v16411_v27 = vpack.c.bf16 %v3584_v29, %v3583_v62  ;;  %v3601_v62 = vld [vmem:[%s18783_s5 + $0x38] sm:$0xff] }
 0x1d5   :  { %11840 = vmatprep.mubr.msk.f32.mxu1 %vm175_vm1, %v19089_v61  ;;  %v3595_v61 = vld [vmem:[%s18783_s5 + $0x8] sm:$0xff] }
 0x1d6   :  { %13224 = vmatprep.subr.bf16.mxu0 %v16411_v27 }
 0x1d8   :  { %11841 = vmatmul.mubr.msk.f32.gmra.mrb[62].mxu1 %vm175_vm1, %v19090_v58  ;;  %v16416_v58 = vpack.c.bf16 %v3595_v61, %v3594_v9 }
 0x1da   :  { %13264 = vmatprep.subr.bf16.mxu1 %v16416_v58 }
 0x26f   :  { %v11797_v37 = vpop.f32.mrb[32].mxu1 }
 0x270   :  { %v3385_v2 = vmax.f32 %v16143_v28, %v11797_v37  ;;  %v3193_v16 = vpop.f32.mrb[33].mxu1  ;;  %v3586_v28 = vld [vmem:[%s18782_s4 + $0x18] sm:$0xff] }
 0x271   :  { %v3384_v48 = vmax.f32 %v16148_v22, %v3193_v16  ;;  %v3596_v22 = vld [vmem:[%s18783_s5 + $0x10] sm:$0xff]  ;;  %v16467_v30 = vpack.c.bf16 %v3586_v28, %v3585_v17  ;;  %v3591_v16 = vld [vmem:[%s18782_s4 + $0x40] sm:$0xff]  ;;  %v3603_v17 = vld [vmem:[%s18783_s5 + $0x48] sm:$0xff] }
 0x272   :  { %v16428_v53 = vadd.f32 %v16423_v49, %v3385_v2  ;;  %v16482_v2 = vpack.c.bf16 %v3588_v55, %v3587_v21  ;;  %v9489_v28 = vld [vmem:[%s18782_s4 + $0xb0] sm:$0xff]  ;;  %v16511_v21 = vpack.c.bf16 %v3590_v8, %v3589_v7  ;;  %v9534_v8 = vld [vmem:[%s18783_s5 + $0xb8] sm:$0xff] }
 0x273   :  { %v3422_v10 = vadd.f32 %v16423_v49, %v3384_v48  ;;  %v11800_v50 = vpop.f32.mrb[34].mxu1  ;;  %v3592_v48 = vld [vmem:[%s18782_s4 + $0x48] sm:$0xff]  ;;  %v9533_v7 = vld [vmem:[%s18783_s5 + $0xb0] sm:$0xff] }
 0x274   :  { %v3455_v45 = vmax.f32 %v16428_v53, 0.0  ;;  %v3387_v40 = vmax.f32 %v16154_v14, %v11800_v50  ;;  %v3203_v60 = vpop.f32.mrb[35].mxu1  ;;  %v3597_v14 = vld [vmem:[%s18783_s5 + $0x18] sm:$0xff]  ;;  %v3602_v53 = vld [vmem:[%s18783_s5 + $0x40] sm:$0xff] }
 0x275   :  { %v3454_v33 = vmax.f32 %v3422_v10, 0.0  ;;  %v3386_v44 = vmax.f32 %v16159_v34, %v3203_v60  ;;  %v3598_v34 = vld [vmem:[%s18783_s5 + $0x20] sm:$0xff]  ;;  %v16480_v37 = vpack.c.bf16 %v3597_v14, %v3596_v22  ;;  %v9490_v22 = vld [vmem:[%s18782_s4 + $0xb8] sm:$0xff]  ;;  %v16519_v18 = vpack.c.bf16 %v3603_v17, %v3602_v53 }
 0x276   :  { %v3487_v43 = vrot.slane %v3455_v45, 1  ;;  %v16453_v36 = vadd.f32 %v16423_v49, %v3387_v40  ;;  %v19092_v10 = vld [vmem:[#allocation2_spill] sm:$0xff]  ;;  %v16497_v60 = vpack.c.bf16 %v3599_v13, %v3598_v34  ;;  %v16514_v13 = vpack.c.bf16 %v3601_v62, %v3600_v46 }
 0x277   :  { %v16464_v42 = vrot.slane %v3454_v33, 1  ;;  %v3424_v24 = vadd.f32 %v16423_v49, %v3386_v44  ;;  %v11803_v39 = vpop.f32.mrb[36].mxu1  ;;  %vm5535_vm7 = vcmp.lt.s32.totalorder %v19092_v10, 2 }
 0x278   :  { %v3457_v29 = vmax.f32 %v16453_v36, 0.0  ;;  %v3389_v9 = vmax.f32 %v16164_v4, %v11803_v39  ;;  %v3213_v61 = vpop.f32.mrb[37].mxu1 }
 0x279   :  { %19091 = vst [vmem:[#allocation51_spill] sm:$0xff] %v16464_v42  ;;  %v3548_v4 = vsel %vm129_vm0, %v16464_v42, %v3487_v43  ;;  %v3456_v50 = vmax.f32 %v3424_v24, 0.0  ;;  %v3388_v40 = vmax.f32 %v16169_v6, %v3213_v61  ;;  %v16516_v24 = vpack.c.bf16 %v3592_v48, %v3591_v16 }
 0x27a   :  { %v16508_v44 = vmax.f32 %v3454_v33, %v3548_v4  ;;  %v3489_v14 = vrot.slane %v3457_v29, 1  ;;  %v3427_v6 = vadd.f32 %v16423_v49, %v3389_v9  ;;  %v16521_v33 = vpack.c.bf16 %v9490_v22, %v9489_v28 }
 0x27b   :  { %v3488_v55 = vrot.slane %v3456_v50, 1  ;;  %v3426_v36 = vadd.f32 %v16423_v49, %v3388_v40  ;;  %v11806_v34 = vpop.f32.mrb[38].mxu1 }
 0x27c   :  { %v3459_v39 = vmax.f32 %v3427_v6, 0.0  ;;  %v3391_v61 = vmax.f32 %v16174_v38, %v11806_v34  ;;  %v3223_v42 = vpop.f32.mrb[39].mxu1  ;;  %v3605_v22 = vrot.slane %v16508_v44, 2  ;;  %v16543_v6 = vpack.c.bf16 %v9534_v8, %v9533_v7 }
 0x27d   :  { %v3546_v46 = vsel %vm129_vm0, %v3488_v55, %v3489_v14  ;;  %v3547_v62 = vsel %vm129_vm0, %v3487_v43, %v3488_v55  ;;  %v3458_v38 = vmax.f32 %v3426_v36, 0.0  ;;  %v3390_v9 = vmax.f32 %v16179_v63, %v3223_v42 }
 0x27e   :  { %v16534_v16 = vmax.f32 %v3455_v45, %v3547_v62  ;;  %v16536_v48 = vmax.f32 %v3456_v50, %v3546_v46  ;;  %v3491_v53 = vrot.slane %v3459_v39, 1  ;;  %v16539_v4 = vadd.f32 %v16423_v49, %v3391_v61 }
 0x27f   :  { %v3490_v40 = vrot.slane %v3458_v38, 1  ;;  %v3428_v17 = vadd.f32 %v16423_v49, %v3390_v9  ;;  %v11809_v28 = vpop.f32.mrb[40].mxu1 }
 0x280   :  { %v3461_v43 = vmax.f32 %v16539_v4, 0.0  ;;  %v3393_v63 = vmax.f32 %v16184_v35, %v11809_v28  ;;  %v3233_v45 = vpop.f32.mrb[41].mxu1  ;;  %v3606_v42 = vrot.slane %v16534_v16, 2  ;;  %v3607_v50 = vrot.slane %v16536_v48, 2 }
 0x281   :  { %v3544_v55 = vsel %vm129_vm0, %v3490_v40, %v3491_v53  ;;  %v3545_v36 = vsel %vm129_vm0, %v3489_v14, %v3490_v40  ;;  %v3460_v34 = vmax.f32 %v3428_v17, 0.0  ;;  %v3392_v61 = vmax.f32 %v16189_v11, %v3233_v45 }
 0x282   :  { %v16554_v7 = vmax.f32 %v3457_v29, %v3545_v36  ;;  %v16556_v8 = vmax.f32 %v3458_v38, %v3544_v55  ;;  %v3493_v46 = vrot.slane %v3461_v43, 1  ;;  %v16559_v35 = vadd.f32 %v16423_v49, %v3393_v63 }
 0x283   :  { %v3492_v62 = vrot.slane %v3460_v34, 1  ;;  %v3430_v9 = vadd.f32 %v16423_v49, %v3392_v61  ;;  %v11812_v4 = vpop.f32.mrb[42].mxu1  ;;  %v3667_v14 = vsel %vm1313_vm2, %v3605_v22, %v3606_v42  ;;  %v3666_v11 = vsel %vm1313_vm2, %v3606_v42, %v3607_v50 }
 0x284   :  { %v3463_v29 = vmax.f32 %v16559_v35, 0.0  ;;  %v3395_v38 = vmax.f32 %v16194_v59, %v11812_v4  ;;  %11865 = vmatprep.mubr.msk.f32.mxu0 %vm3681_vm6, %v3667_v14  ;;  %12005 = vmatprep.mubr.msk.f32.mxu1 %vm3681_vm6, %v3667_v14  ;;  %v3243_v40 = vpop.f32.mrb[43].mxu1  ;;  %v3608_v17 = vrot.slane %v16554_v7, 2  ;;  %v3609_v28 = vrot.slane %v16556_v8, 2 }
 0x285   :  { %v3542_v63 = vsel %vm129_vm0, %v3492_v62, %v3493_v46  ;;  %v3543_v45 = vsel %vm129_vm0, %v3491_v53, %v3492_v62  ;;  %v3462_v42 = vmax.f32 %v3430_v9, 0.0  ;;  %v3394_v55 = vmax.f32 %v16199_v5, %v3243_v40  ;;  %11866 = vmatmul.mubr.msk.f32.vlgmr.msra.gmra.mrb[32].mxu0 %vm3681_vm6, %v3666_v11  ;;  %12006 = vmatmul.mubr.msk.f32.vlgmr.msra.gmra.mrb[64].mxu1 %vm3681_vm6, %v3666_v11 }
 0x286   :  { %v16581_v59 = vmax.f32 %v3459_v39, %v3543_v45  ;;  %v16583_v36 = vmax.f32 %v3460_v34, %v3542_v63  ;;  %v3495_v61 = vrot.slane %v3463_v29, 1  ;;  %v16588_v4 = vadd.f32 %v16423_v49, %v3395_v38  ;;  %13226 = vmatpush3.bf16.msra.mxu0 %v16411_v27  ;;  %13266 = vmatpush3.bf16.msra.mxu1 %v16416_v58 }
 0x287   :  { %v3494_v53 = vrot.slane %v3462_v42, 1  ;;  %v3432_v5 = vadd.f32 %v16423_v49, %v3394_v55  ;;  %v11815_v62 = vpop.f32.mrb[44].mxu1  ;;  %v3665_v39 = vsel %vm1313_vm2, %v3607_v50, %v3608_v17  ;;  %v3664_v34 = vsel %vm1313_vm2, %v3608_v17, %v3609_v28  ;;  %13228 = vmatprep.subr.bf16.mxu0 %v16467_v30  ;;  %13268 = vmatprep.subr.bf16.mxu1 %v16480_v37 }
 0x288   :  { %v3465_v9 = vmax.f32 %v16588_v4, 0.0  ;;  %v3397_v27 = vmax.f32 %v16204_v54, %v11815_v62  ;;  %11868 = vmatprep.mubr.msk.f32.mxu0 %vm3681_vm6, %v3665_v39  ;;  %12008 = vmatprep.mubr.msk.f32.mxu1 %vm3681_vm6, %v3665_v39  ;;  %v3253_v58 = vpop.f32.mrb[45].mxu1  ;;  %v3610_v14 = vrot.slane %v16581_v59, 2  ;;  %v3611_v50 = vrot.slane %v16583_v36, 2 }
 0x289   :  { %v3540_v11 = vsel %vm129_vm0, %v3494_v53, %v3495_v61  ;;  %v3541_v38 = vsel %vm129_vm0, %v3493_v46, %v3494_v53  ;;  %v3464_v40 = vmax.f32 %v3432_v5, 0.0  ;;  %v3396_v17 = vmax.f32 %v16209_v20, %v3253_v58  ;;  %11869 = vmatmul.mubr.msk.f32.gmra.mrb[34].mxu0 %vm3681_vm6, %v3664_v34  ;;  %12009 = vmatmul.mubr.msk.f32.gmra.mrb[66].mxu1 %vm3681_vm6, %v3664_v34 }
 0x28a   :  { %v16612_v54 = vmax.f32 %v3461_v43, %v3541_v38  ;;  %v16614_v63 = vmax.f32 %v3462_v42, %v3540_v11  ;;  %v3497_v45 = vrot.slane %v3465_v9, 1  ;;  %v16619_v55 = vadd.f32 %v16423_v49, %v3397_v27  ;;  %13230 = vmatpush3.bf16.msra.mxu0 %v16467_v30  ;;  %13270 = vmatpush3.bf16.msra.mxu1 %v16480_v37 }
 0x28b   :  { %v3496_v46 = vrot.slane %v3464_v40, 1  ;;  %v3434_v20 = vadd.f32 %v16423_v49, %v3396_v17  ;;  %v11818_v53 = vpop.f32.mrb[46].mxu1  ;;  %v3663_v43 = vsel %vm1313_vm2, %v3609_v28, %v3610_v14  ;;  %v3662_v42 = vsel %vm1313_vm2, %v3610_v14, %v3611_v50  ;;  %13232 = vmatprep.subr.bf16.mxu0 %v16482_v2  ;;  %13272 = vmatprep.subr.bf16.mxu1 %v16497_v60 }
 0x28c   :  { %v3467_v5 = vmax.f32 %v16619_v55, 0.0  ;;  %v3399_v30 = vmax.f32 %v16214_v12, %v11818_v53  ;;  %11871 = vmatprep.mubr.msk.f32.mxu0 %vm3681_vm6, %v3663_v43  ;;  %12011 = vmatprep.mubr.msk.f32.mxu1 %vm3681_vm6, %v3663_v43  ;;  %v3263_v37 = vpop.f32.mrb[47].mxu1  ;;  %v3612_v62 = vrot.slane %v16612_v54, 2  ;;  %v3613_v28 = vrot.slane %v16614_v63, 2 }
 0x28d   :  { %v3538_v39 = vsel %vm129_vm0, %v3496_v46, %v3497_v45  ;;  %v3539_v34 = vsel %vm129_vm0, %v3495_v61, %v3496_v46  ;;  %v3466_v27 = vmax.f32 %v3434_v20, 0.0  ;;  %v3398_v58 = vmax.f32 %v16219_v25, %v3263_v37  ;;  %11872 = vmatmul.mubr.msk.f32.gmra.mrb[36].mxu0 %vm3681_vm6, %v3662_v42  ;;  %12012 = vmatmul.mubr.msk.f32.gmra.mrb[68].mxu1 %vm3681_vm6, %v3662_v42 }
 0x28e   :  { %v16645_v12 = vmax.f32 %v3463_v29, %v3539_v34  ;;  %v16647_v14 = vmax.f32 %v3464_v40, %v3538_v39  ;;  %v3499_v11 = vrot.slane %v3467_v5, 1  ;;  %v16652_v38 = vadd.f32 %v16423_v49, %v3399_v30  ;;  %13234 = vmatpush3.bf16.msra.mxu0 %v16482_v2  ;;  %13274 = vmatpush3.bf16.msra.mxu1 %v16497_v60 }
 0x28f   :  { %v3498_v25 = vrot.slane %v3466_v27, 1  ;;  %v3436_v61 = vadd.f32 %v16423_v49, %v3398_v58  ;;  %v11821_v17 = vpop.f32.mrb[48].mxu1  ;;  %v3661_v35 = vsel %vm1313_vm2, %v3611_v50, %v3612_v62  ;;  %v3660_v29 = vsel %vm1313_vm2, %v3612_v62, %v3613_v28  ;;  %13236 = vmatprep.subr.bf16.mxu0 %v16511_v21  ;;  %13276 = vmatprep.subr.bf16.mxu1 %v16514_v13 }
 0x290   :  { %v3469_v40 = vmax.f32 %v16652_v38, 0.0  ;;  %v3401_v2 = vmax.f32 %v16224_v47, %v11821_v17  ;;  %11874 = vmatprep.mubr.msk.f32.mxu0 %vm3681_vm6, %v3661_v35  ;;  %12014 = vmatprep.mubr.msk.f32.mxu1 %vm3681_vm6, %v3661_v35  ;;  %v3273_v60 = vpop.f32.mrb[49].mxu1  ;;  %v3614_v46 = vrot.slane %v16645_v12, 2  ;;  %v3615_v50 = vrot.slane %v16647_v14, 2 }
 0x291   :  { %v3536_v20 = vsel %vm129_vm0, %v3498_v25, %v3499_v11  ;;  %v3537_v53 = vsel %vm129_vm0, %v3497_v45, %v3498_v25  ;;  %v3468_v43 = vmax.f32 %v3436_v61, 0.0  ;;  %v3400_v42 = vmax.f32 %v16229_v26, %v3273_v60  ;;  %11875 = vmatmul.mubr.msk.f32.gmra.mrb[38].mxu0 %vm3681_vm6, %v3660_v29  ;;  %12015 = vmatmul.mubr.msk.f32.gmra.mrb[70].mxu1 %vm3681_vm6, %v3660_v29  ;;  %v3604_v25 = vld [vmem:[%s18783_s5 + $0x50] sm:$0xf] }
 0x292   :  { %v16678_v47 = vmax.f32 %v3465_v9, %v3537_v53  ;;  %v16680_v30 = vmax.f32 %v3466_v27, %v3536_v20  ;;  %v3501_v37 = vrot.slane %v3469_v40, 1  ;;  %v16685_v62 = vadd.f32 %v16423_v49, %v3401_v2  ;;  %13238 = vmatpush3.bf16.msra.mxu0 %v16511_v21  ;;  %13278 = vmatpush3.bf16.msra.mxu1 %v16514_v13  ;;  %v3593_v21 = vld [vmem:[%s18782_s4 + $0x50] sm:$0xf] }
 0x293   :  { %v3500_v26 = vrot.slane %v3468_v43, 1  ;;  %v3438_v45 = vadd.f32 %v16423_v49, %v3400_v42  ;;  %v11824_v39 = vpop.f32.mrb[50].mxu1  ;;  %v3659_v4 = vsel %vm1313_vm2, %v3613_v28, %v3614_v46  ;;  %v3658_v9 = vsel %vm1313_vm2, %v3614_v46, %v3615_v50  ;;  %13240 = vmatprep.subr.bf16.mxu0 %v16516_v24  ;;  %13280 = vmatprep.subr.bf16.mxu1 %v16519_v18 }
 0x294   :  { %v3471_v13 = vmax.f32 %v16685_v62, 0.0  ;;  %v3403_v34 = vmax.f32 %v16234_v31, %v11824_v39  ;;  %11877 = vmatprep.mubr.msk.f32.mxu0 %vm3681_vm6, %v3659_v4  ;;  %12017 = vmatprep.mubr.msk.f32.mxu1 %vm3681_vm6, %v3659_v4  ;;  %v3283_v28 = vpop.f32.mrb[51].mxu1  ;;  %v3616_v27 = vrot.slane %v16678_v47, 2  ;;  %v3617_v58 = vrot.slane %v16680_v30, 2 }
 0x295   :  { %v3534_v61 = vsel %vm129_vm0, %v3500_v26, %v3501_v37  ;;  %v3535_v17 = vsel %vm129_vm0, %v3499_v11, %v3500_v26  ;;  %v3470_v31 = vmax.f32 %v3438_v45, 0.0  ;;  %v3402_v35 = vmax.f32 %v16239_v32, %v3283_v28  ;;  %11878 = vmatmul.mubr.msk.f32.gmra.mrb[40].mxu0 %vm3681_vm6, %v3658_v9  ;;  %12018 = vmatmul.mubr.msk.f32.gmra.mrb[72].mxu1 %vm3681_vm6, %v3658_v9 }
 0x296   :  { %v16717_v29 = vmax.f32 %v3467_v5, %v3535_v17  ;;  %v16719_v2 = vmax.f32 %v3468_v43, %v3534_v61  ;;  %v3503_v60 = vrot.slane %v3471_v13, 1  ;;  %v16724_v46 = vadd.f32 %v16423_v49, %v3403_v34  ;;  %13242 = vmatpush3.bf16.msra.mxu0 %v16516_v24  ;;  %13282 = vmatpush3.bf16.msra.mxu1 %v16519_v18 }
 0x297   :  { %v3502_v32 = vrot.slane %v3470_v31, 1  ;;  %v3440_v11 = vadd.f32 %v16423_v49, %v3402_v35  ;;  %v11827_v20 = vpop.f32.mrb[52].mxu1  ;;  %v3657_v55 = vsel %vm1313_vm2, %v3615_v50, %v3616_v27  ;;  %v3656_v5 = vsel %vm1313_vm2, %v3616_v27, %v3617_v58  ;;  %11933 = vmatprep.subr.msk.mxu0 %vm3778_vm5, %v3593_v21  ;;  %12073 = vmatprep.subr.msk.mxu1 %vm3778_vm5, %v3604_v25 }
 0x298   :  { %v3473_v53 = vmax.f32 %v16724_v46, 0.0  ;;  %v3405_v24 = vmax.f32 %v16244_v15, %v11827_v20  ;;  %11880 = vmatprep.mubr.msk.f32.mxu0 %vm3681_vm6, %v3657_v55  ;;  %12020 = vmatprep.mubr.msk.f32.mxu1 %vm3681_vm6, %v3657_v55  ;;  %v3293_v18 = vpop.f32.mrb[53].mxu1  ;;  %v3618_v43 = vrot.slane %v16717_v29, 2  ;;  %v3619_v50 = vrot.slane %v16719_v2, 2 }
 0x299   :  { %v3532_v42 = vsel %vm129_vm0, %v3502_v32, %v3503_v60  ;;  %v3533_v26 = vsel %vm129_vm0, %v3501_v37, %v3502_v32  ;;  %v3472_v45 = vmax.f32 %v3440_v11, 0.0  ;;  %v3404_v39 = vmax.f32 %v16249_v57, %v3293_v18  ;;  %11881 = vmatmul.mubr.msk.f32.gmra.mrb[42].mxu0 %vm3681_vm6, %v3656_v5  ;;  %12021 = vmatmul.mubr.msk.f32.gmra.mrb[74].mxu1 %vm3681_vm6, %v3656_v5 }
 0x29a   :  { %v16750_v15 = vmax.f32 %v3469_v40, %v3533_v26  ;;  %v16752_v4 = vmax.f32 %v3470_v31, %v3532_v42  ;;  %v3505_v9 = vrot.slane %v3473_v53, 1  ;;  %v16755_v34 = vadd.f32 %v16423_v49, %v3405_v24  ;;  %11934 = vmatpush3.msk.msra.mxu0 %vm3778_vm5, %v3593_v21  ;;  %12074 = vmatpush3.msk.msra.mxu1 %vm3778_vm5, %v3604_v25 }
 0x29b   :  { %v3504_v37 = vrot.slane %v3472_v45, 1  ;;  %v3442_v57 = vadd.f32 %v16423_v49, %v3404_v39  ;;  %v11830_v28 = vpop.f32.mrb[54].mxu1  ;;  %v3655_v27 = vsel %vm1313_vm2, %v3617_v58, %v3618_v43  ;;  %v3654_v38 = vsel %vm1313_vm2, %v3618_v43, %v3619_v50  ;;  %13284 = vmatprep.subr.bf16.mxu0 %v16521_v33  ;;  %13304 = vmatprep.subr.bf16.mxu1 %v16543_v6 }
 0x29c   :  { %v3475_v40 = vmax.f32 %v16755_v34, 0.0  ;;  %v3407_v21 = vmax.f32 %v16254_v23, %v11830_v28  ;;  %11883 = vmatprep.mubr.msk.f32.mxu0 %vm3681_vm6, %v3655_v27  ;;  %12023 = vmatprep.mubr.msk.f32.mxu1 %vm3681_vm6, %v3655_v27  ;;  %v3303_v25 = vpop.f32.mrb[55].mxu1  ;;  %v3620_v61 = vrot.slane %v16750_v15, 2  ;;  %v3621_v58 = vrot.slane %v16752_v4, 2 }
 0x29d   :  { %v3530_v17 = vsel %vm129_vm0, %v3504_v37, %v3505_v9  ;;  %v3531_v31 = vsel %vm129_vm0, %v3503_v60, %v3504_v37  ;;  %v3474_v35 = vmax.f32 %v3442_v57, 0.0  ;;  %v3406_v46 = vmax.f32 %v16260_v0, %v3303_v25  ;;  %11884 = vmatmul.mubr.msk.f32.gmra.mrb[44].mxu0 %vm3681_vm6, %v3654_v38  ;;  %12024 = vmatmul.mubr.msk.f32.gmra.mrb[76].mxu1 %vm3681_vm6, %v3654_v38 }
 0x29e   :  { %v16781_v23 = vmax.f32 %v3471_v13, %v3531_v31  ;;  %v16783_v32 = vmax.f32 %v3472_v45, %v3530_v17  ;;  %v3507_v11 = vrot.slane %v3475_v40, 1  ;;  %v16786_v20 = vadd.f32 %v16423_v49, %v3407_v21 }
 0x29f   :  { %v3506_v55 = vrot.slane %v3474_v35, 1  ;;  %v3444_v60 = vadd.f32 %v16423_v49, %v3406_v46  ;;  %v11833_v5 = vpop.f32.mrb[56].mxu1  ;;  %v3653_v0 = vsel %vm1313_vm2, %v3619_v50, %v3620_v61  ;;  %v3652_v24 = vsel %vm1313_vm2, %v3620_v61, %v3621_v58 }
 0x2a0   :  { %v3477_v62 = vmax.f32 %v16786_v20, 0.0  ;;  %v3409_v13 = vmax.f32 %v16265_v52, %v11833_v5  ;;  %11886 = vmatprep.mubr.msk.f32.mxu0 %vm3681_vm6, %v3653_v0  ;;  %12026 = vmatprep.mubr.msk.f32.mxu1 %vm3681_vm6, %v3653_v0  ;;  %v3313_v18 = vpop.f32.mrb[57].mxu1  ;;  %v3622_v43 = vrot.slane %v16781_v23, 2  ;;  %v3623_v42 = vrot.slane %v16783_v32, 2 }
 0x2a1   :  { %v3528_v26 = vsel %vm129_vm0, %v3506_v55, %v3507_v11  ;;  %v3529_v50 = vsel %vm129_vm0, %v3505_v9, %v3506_v55  ;;  %v3476_v45 = vmax.f32 %v3444_v60, 0.0  ;;  %v3408_v39 = vmax.f32 %v16270_v19, %v3313_v18  ;;  %11887 = vmatmul.mubr.msk.f32.gmra.mrb[46].mxu0 %vm3681_vm6, %v3652_v24  ;;  %12027 = vmatmul.mubr.msk.f32.gmra.mrb[78].mxu1 %vm3681_vm6, %v3652_v24 }
 0x2a2   :  { %v16806_v52 = vmax.f32 %v3473_v53, %v3529_v50  ;;  %v16808_v34 = vmax.f32 %v3474_v35, %v3528_v26  ;;  %v3509_v37 = vrot.slane %v3477_v62, 1  ;;  %v16811_v57 = vadd.f32 %v16423_v49, %v3409_v13 }
 0x2a3   :  { %v3508_v28 = vrot.slane %v3476_v45, 1  ;;  %v3446_v27 = vadd.f32 %v16423_v49, %v3408_v39  ;;  %v11836_v38 = vpop.f32.mrb[58].mxu1  ;;  %v3651_v9 = vsel %vm1313_vm2, %v3621_v58, %v3622_v43  ;;  %v3650_v19 = vsel %vm1313_vm2, %v3622_v43, %v3623_v42 }
 0x2a4   :  { %v3479_v21 = vmax.f32 %v16811_v57, 0.0  ;;  %v3411_v53 = vmax.f32 %v16275_v41, %v11836_v38  ;;  %11889 = vmatprep.mubr.msk.f32.mxu0 %vm3681_vm6, %v3651_v9  ;;  %12029 = vmatprep.mubr.msk.f32.mxu1 %vm3681_vm6, %v3651_v9  ;;  %v3323_v25 = vpop.f32.mrb[59].mxu1  ;;  %v3624_v61 = vrot.slane %v16806_v52, 2  ;;  %v3625_v17 = vrot.slane %v16808_v34, 2 }
 0x2a5   :  { %v3526_v31 = vsel %vm129_vm0, %v3508_v28, %v3509_v37  ;;  %v3527_v58 = vsel %vm129_vm0, %v3507_v11, %v3508_v28  ;;  %v3478_v35 = vmax.f32 %v3446_v27, 0.0  ;;  %v3410_v46 = vmax.f32 %v16280_v51, %v3323_v25  ;;  %11890 = vmatmul.mubr.msk.f32.gmra.mrb[48].mxu0 %vm3681_vm6, %v3650_v19  ;;  %12030 = vmatmul.mubr.msk.f32.gmra.mrb[80].mxu1 %vm3681_vm6, %v3650_v19 }
 0x2a6   :  { %v16831_v41 = vmax.f32 %v3475_v40, %v3527_v58  ;;  %v16833_v20 = vmax.f32 %v3476_v45, %v3526_v31  ;;  %v3511_v55 = vrot.slane %v3479_v21, 1  ;;  %v3449_v60 = vadd.f32 %v16423_v49, %v3411_v53 }
 0x2a7   :  { %v3510_v5 = vrot.slane %v3478_v35, 1  ;;  %v3448_v0 = vadd.f32 %v16423_v49, %v3410_v46  ;;  %v11839_v24 = vpop.f32.mrb[60].mxu1  ;;  %v3649_v11 = vsel %vm1313_vm2, %v3623_v42, %v3624_v61  ;;  %v3648_v51 = vsel %vm1313_vm2, %v3624_v61, %v3625_v17  ;;  %v19093_v46 = vld [vmem:[#allocation49_spill] sm:$0xff] }
 0x2a8   :  { %v3481_v13 = vmax.f32 %v3449_v60, 0.0  ;;  %v3413_v18 = vmax.f32 %v16285_v56, %v11839_v24  ;;  %11892 = vmatprep.mubr.msk.f32.mxu0 %vm3681_vm6, %v3649_v11  ;;  %12032 = vmatprep.mubr.msk.f32.mxu1 %vm3681_vm6, %v3649_v11  ;;  %v3333_v40 = vpop.f32.mrb[61].mxu1  ;;  %v3626_v43 = vrot.slane %v16831_v41, 2  ;;  %v3627_v26 = vrot.slane %v16833_v20, 2 }
 0x2a9   :  { %v3524_v50 = vsel %vm129_vm0, %v3510_v5, %v3511_v55  ;;  %v3525_v42 = vsel %vm129_vm0, %v3509_v37, %v3510_v5  ;;  %v3480_v45 = vmax.f32 %v3448_v0, 0.0  ;;  %v3412_v39 = vmax.f32 %v16290_v1, %v3333_v40  ;;  %11893 = vmatmul.mubr.msk.f32.gmra.mrb[50].mxu0 %vm3681_vm6, %v3648_v51  ;;  %12033 = vmatmul.mubr.msk.f32.gmra.mrb[82].mxu1 %vm3681_vm6, %v3648_v51 }
 0x2aa   :  { %v16853_v56 = vmax.f32 %v3477_v62, %v3525_v42  ;;  %v16855_v57 = vmax.f32 %v3478_v35, %v3524_v50  ;;  %v3513_v28 = vrot.slane %v3481_v13, 1  ;;  %v3451_v27 = vadd.f32 %v16423_v49, %v3413_v18 }
 0x2ab   :  { %v3512_v38 = vrot.slane %v3480_v45, 1  ;;  %v3450_v9 = vadd.f32 %v16423_v49, %v3412_v39  ;;  %v11842_v19 = vpop.f32.mrb[62].mxu1  ;;  %v3647_v37 = vsel %vm1313_vm2, %v3625_v17, %v3626_v43  ;;  %v3646_v1 = vsel %vm1313_vm2, %v3626_v43, %v3627_v26 }
 0x2ac   :  { %v3483_v53 = vmax.f32 %v3451_v27, 0.0  ;;  %v3415_v25 = vmax.f32 %v16295_v3, %v11842_v19  ;;  %11895 = vmatprep.mubr.msk.f32.mxu0 %vm3681_vm6, %v3647_v37  ;;  %12035 = vmatprep.mubr.msk.f32.mxu1 %vm3681_vm6, %v3647_v37  ;;  %v3343_v62 = vpop.f32.mrb[63].mxu1  ;;  %v3628_v61 = vrot.slane %v16853_v56, 2  ;;  %v3629_v31 = vrot.slane %v16855_v57, 2 }
 0x2ad   :  { %v3522_v58 = vsel %vm129_vm0, %v3512_v38, %v3513_v28  ;;  %v3523_v17 = vsel %vm129_vm0, %v3511_v55, %v3512_v38  ;;  %v3482_v35 = vmax.f32 %v3450_v9, 0.0  ;;  %v3414_v60 = vmax.f32 %v19093_v46, %v3343_v62  ;;  %11896 = vmatmul.mubr.msk.f32.gmra.mrb[52].mxu0 %vm3681_vm6, %v3646_v1  ;;  %12036 = vmatmul.mubr.msk.f32.gmra.mrb[84].mxu1 %vm3681_vm6, %v3646_v1  ;;  %v19094_v9 = vld [vmem:[#allocation51_spill] sm:$0xff] }
 0x2ae   :  { %v16875_v3 = vmax.f32 %v3479_v21, %v3523_v17  ;;  %v16877_v5 = vmax.f32 %v3480_v45, %v3522_v58  ;;  %v3515_v0 = vrot.slane %v3483_v53, 1  ;;  %v3453_v24 = vadd.f32 %v16423_v49, %v3415_v25 }
 0x2af   :  { %v3514_v11 = vrot.slane %v3482_v35, 1  ;;  %v3452_v51 = vadd.f32 %v16423_v49, %v3414_v60  ;;  %v3645_v55 = vsel %vm1313_vm2, %v3627_v26, %v3628_v61  ;;  %v3644_v18 = vsel %vm1313_vm2, %v3628_v61, %v3629_v31 }
 0x2b0   :  { %v3485_v40 = vmax.f32 %v3453_v24, 0.0  ;;  %11898 = vmatprep.mubr.msk.f32.mxu0 %vm3681_vm6, %v3645_v55  ;;  %12038 = vmatprep.mubr.msk.f32.mxu1 %vm3681_vm6, %v3645_v55  ;;  %v3630_v21 = vrot.slane %v16875_v3, 2  ;;  %v3631_v43 = vrot.slane %v16877_v5, 2  ;;  %v9492_v55 = vld [vmem:[%s18782_s4 + $0xc8] sm:$0xff] }
 0x2b1   :  { %v3520_v50 = vsel %vm129_vm0, %v3514_v11, %v3515_v0  ;;  %v3521_v49 = vsel %vm129_vm0, %v3513_v28, %v3514_v11  ;;  %v3484_v42 = vmax.f32 %v3452_v51, 0.0  ;;  %11899 = vmatmul.mubr.msk.f32.gmra.mrb[54].mxu0 %vm3681_vm6, %v3644_v18  ;;  %12039 = vmatmul.mubr.msk.f32.gmra.mrb[86].mxu1 %vm3681_vm6, %v3644_v18  ;;  %v9491_v51 = vld [vmem:[%s18782_s4 + $0xc0] sm:$0xff] }
 0x2b2   :  { %v16895_v26 = vmax.f32 %v3481_v13, %v3521_v49  ;;  %v16897_v45 = vmax.f32 %v3482_v35, %v3520_v50  ;;  %v3517_v39 = vrot.slane %v3485_v40, 1  ;;  %v3643_v27 = vsel %vm1313_vm2, %v3629_v31, %v3630_v21  ;;  %v9535_v18 = vld [vmem:[%s18783_s5 + $0xc0] sm:$0xff]  ;;  %v9494_v50 = vld [vmem:[%s18782_s4 + $0xd8] sm:$0xff]  ;;  %v9537_v49 = vld [vmem:[%s18783_s5 + $0xd0] sm:$0xff] }
 0x2b3   :  { %v3516_v38 = vrot.slane %v3484_v42, 1  ;;  %11901 = vmatprep.mubr.msk.f32.mxu0 %vm3681_vm6, %v3643_v27  ;;  %12041 = vmatprep.mubr.msk.f32.mxu1 %vm3681_vm6, %v3643_v27  ;;  %v3642_v28 = vsel %vm1313_vm2, %v3630_v21, %v3631_v43 }
 0x2b4   :  { %v3549_v19 = vsel %vm129_vm0, %v3517_v39, %v19094_v9  ;;  %v3632_v13 = vrot.slane %v16895_v26, 2  ;;  %v3633_v37 = vrot.slane %v16897_v45, 2 }
 0x2b5   :  { %v16910_v1 = vmax.f32 %v3485_v40, %v3549_v19  ;;  %v3518_v25 = vsel %vm129_vm0, %v3516_v38, %v3517_v39  ;;  %v3519_v62 = vsel %vm129_vm0, %v3515_v0, %v3516_v38  ;;  %11902 = vmatmul.mubr.msk.f32.gmra.mrb[56].mxu0 %vm3681_vm6, %v3642_v28  ;;  %12042 = vmatmul.mubr.msk.f32.gmra.mrb[88].mxu1 %vm3681_vm6, %v3642_v28  ;;  %v9495_v38 = vld [vmem:[%s18782_s4 + $0xe0] sm:$0xff]  ;;  %v9540_v28 = vld [vmem:[%s18783_s5 + $0xe8] sm:$0xff] }
 0x2b6   :  { %v16918_v61 = vmax.f32 %v3483_v53, %v3519_v62  ;;  %v16920_v31 = vmax.f32 %v3484_v42, %v3518_v25  ;;  %v3641_v58 = vsel %vm1313_vm2, %v3631_v43, %v3632_v13  ;;  %v3640_v17 = vsel %vm1313_vm2, %v3632_v13, %v3633_v37  ;;  %v9493_v43 = vld [vmem:[%s18782_s4 + $0xd0] sm:$0xff]  ;;  %v9538_v42 = vld [vmem:[%s18783_s5 + $0xd8] sm:$0xff] }
 0x2b7   :  { %11904 = vmatprep.mubr.msk.f32.mxu0 %vm3681_vm6, %v3641_v58  ;;  %12044 = vmatprep.mubr.msk.f32.mxu1 %vm3681_vm6, %v3641_v58  ;;  %v3636_v53 = vrot.slane %v16910_v1, 2  ;;  %v13287_v40 = vpack.c.bf16 %v9492_v55, %v9491_v51  ;;  %v13291_v39 = vpack.c.bf16 %v9494_v50, %v9493_v43  ;;  %v13311_v27 = vpack.c.bf16 %v9538_v42, %v9537_v49  ;;  %v9497_v13 = vld [vmem:[%s18782_s4 + $0xf0] sm:$0xff]  ;;  %v9542_v62 = vld [vmem:[%s18783_s5 + $0xf8] sm:$0xff]  ;;  %v9580_v50 = vld [vmem:[%s18782_s4 + $0x120] sm:$0xff] }
 0x2b8   :  { %v3634_v35 = vrot.slane %v16918_v61, 2  ;;  %v3635_v46 = vrot.slane %v16920_v31, 2  ;;  %v9541_v25 = vld [vmem:[%s18783_s5 + $0xf0] sm:$0xff]  ;;  %v4800_v55 = vrot.slane %v16534_v16, 4  ;;  %v4802_v43 = vrot.slane %v16554_v7, 4  ;;  %v9623_v49 = vld [vmem:[%s18783_s5 + $0x118] sm:$0xff] }
 0x2b9   :  { %11905 = vmatmul.mubr.msk.f32.gmra.mrb[58].mxu0 %vm3681_vm6, %v3640_v17  ;;  %12045 = vmatmul.mubr.msk.f32.gmra.mrb[90].mxu1 %vm3681_vm6, %v3640_v17  ;;  %v3668_v11 = vsel %vm1313_vm2, %v3636_v53, %v3605_v22  ;;  %v9536_v22 = vld [vmem:[%s18783_s5 + $0xc8] sm:$0xff]  ;;  %v13319_v17 = vpack.c.bf16 %v9542_v62, %v9541_v25  ;;  %v9624_v42 = vld [vmem:[%s18783_s5 + $0x120] sm:$0xff]  ;;  %v4805_v62 = vrot.slane %v16583_v36, 4 }
 0x2ba   :  { %v3639_v60 = vsel %vm1313_vm2, %v3633_v37, %v3634_v35  ;;  %v3638_v0 = vsel %vm1313_vm2, %v3634_v35, %v3635_v46  ;;  %v3637_v24 = vsel %vm1313_vm2, %v3635_v46, %v3636_v53  ;;  %v13307_v21 = vpack.c.bf16 %v9536_v22, %v9535_v18  ;;  %v9498_v37 = vld [vmem:[%s18782_s4 + $0xf8] sm:$0xff]  ;;  %v9499_v35 = vld [vmem:[%s18782_s4 + $0x100] sm:$0xf]  ;;  %v9577_v53 = vld [vmem:[%s18782_s4 + $0x108] sm:$0xff] }
 0x2bb   :  { %11907 = vmatprep.mubr.msk.f32.mxu0 %vm3681_vm6, %v3639_v60  ;;  %12047 = vmatprep.mubr.msk.f32.mxu1 %vm3681_vm6, %v3639_v60  ;;  %v13299_v58 = vpack.c.bf16 %v9498_v37, %v9497_v13  ;;  %v9543_v46 = vld [vmem:[%s18783_s5 + $0x100] sm:$0xf]  ;;  %v9578_v60 = vld [vmem:[%s18782_s4 + $0x110] sm:$0xff]  ;;  %v4799_v18 = vrot.slane %v16508_v44, 4  ;;  %v4801_v22 = vrot.slane %v16536_v48, 4  ;;  %v9625_v13 = vld [vmem:[%s18783_s5 + $0x128] sm:$0xff] }
 0x2bc   :  { %v9626_v37 = vld [vmem:[%s18783_s5 + $0x130] sm:$0xff] }
 0x2bd   :  { %11908 = vmatmul.mubr.msk.f32.gmra.mrb[60].mxu0 %vm3681_vm6, %v3638_v0  ;;  %12048 = vmatmul.mubr.msk.f32.gmra.mrb[92].mxu1 %vm3681_vm6, %v3638_v0  ;;  %v9621_v0 = vld [vmem:[%s18783_s5 + $0x108] sm:$0xff] }
 0x2be   :  { %11910 = vmatprep.mubr.msk.f32.mxu0 %vm3681_vm6, %v3637_v24  ;;  %12050 = vmatprep.mubr.msk.f32.mxu1 %vm3681_vm6, %v3637_v24  ;;  %v9622_v24 = vld [vmem:[%s18783_s5 + $0x110] sm:$0xff] }
 0x2bf   :  { %v17067_v51 = vpack.c.bf16 %v9622_v24, %v9621_v0  ;;  %v9627_v0 = vld [vmem:[%s18783_s5 + $0x138] sm:$0xff]  ;;  %v9628_v24 = vld [vmem:[%s18783_s5 + $0x140] sm:$0xff] }
 0x2c1   :  { %11911 = vmatmul.mubr.msk.f32.gmra.mrb[62].mxu0 %vm3681_vm6, %v3668_v11  ;;  %12051 = vmatmul.mubr.msk.f32.gmra.mrb[94].mxu1 %vm3681_vm6, %v3668_v11  ;;  %v17065_v11 = vpack.c.bf16 %v9578_v60, %v9577_v53  ;;  %v4806_v53 = vrot.slane %v16612_v54, 4  ;;  %v9584_v60 = vld [vmem:[%s18782_s4 + $0x140] sm:$0xff] }
 0x2c2   :  { %11935 = vmatprep.mubr.msk.f32.mxu0 %vm3681_vm6, %v16508_v44  ;;  %12075 = vmatprep.mubr.msk.f32.mxu1 %vm3681_vm6, %v16508_v44 }
 0x2c5   :  { %11936 = vmatmul.mubr.msk.f32.vlgmr.msra.gmra.mrb[32].mxu0 %vm3681_vm6, %v16534_v16  ;;  %12076 = vmatmul.mubr.msk.f32.vlgmr.msra.gmra.mrb[64].mxu1 %vm3681_vm6, %v16534_v16 }
 0x2c6   :  { %11938 = vmatprep.mubr.msk.f32.mxu0 %vm3681_vm6, %v16536_v48  ;;  %12078 = vmatprep.mubr.msk.f32.mxu1 %vm3681_vm6, %v16536_v48 }
 0x2c7   :  { %13286 = vmatpush3.bf16.msra.mxu0 %v16521_v33  ;;  %13306 = vmatpush3.bf16.msra.mxu1 %v16543_v6  ;;  %v9496_v33 = vld [vmem:[%s18782_s4 + $0xe8] sm:$0xff]  ;;  %v9539_v6 = vld [vmem:[%s18783_s5 + $0xe0] sm:$0xff] }
 0x2c8   :  { %13288 = vmatprep.subr.bf16.mxu0 %v13287_v40  ;;  %13308 = vmatprep.subr.bf16.mxu1 %v13307_v21  ;;  %v13295_v9 = vpack.c.bf16 %v9496_v33, %v9495_v38  ;;  %v13315_v19 = vpack.c.bf16 %v9540_v28, %v9539_v6  ;;  %v13347_v33 = vpack.c.bf16 %v9624_v42, %v9623_v49  ;;  %v9581_v6 = vld [vmem:[%s18782_s4 + $0x128] sm:$0xff]  ;;  %v9630_v42 = vld [vmem:[%s18783_s5 + $0x150] sm:$0xff] }
 0x2c9   :  { %11939 = vmatmul.mubr.msk.f32.gmra.mrb[34].mxu0 %vm3681_vm6, %v16554_v7  ;;  %12079 = vmatmul.mubr.msk.f32.gmra.mrb[66].mxu1 %vm3681_vm6, %v16554_v7  ;;  %v4859_v28 = vsel %vm2715_vm4, %v4801_v22, %v4802_v43  ;;  %v9629_v49 = vld [vmem:[%s18783_s5 + $0x148] sm:$0xff] }
 0x2ca   :  { %11941 = vmatprep.mubr.msk.f32.mxu0 %vm3681_vm6, %v16556_v8  ;;  %12081 = vmatprep.mubr.msk.f32.mxu1 %vm3681_vm6, %v16556_v8 }
 0x2cb   :  { %13290 = vmatpush3.bf16.msra.mxu0 %v13287_v40  ;;  %13310 = vmatpush3.bf16.msra.mxu1 %v13307_v21  ;;  %v9579_v40 = vld [vmem:[%s18782_s4 + $0x118] sm:$0xff]  ;;  %v4861_v21 = vsel %vm2715_vm4, %v4799_v18, %v4800_v55 }
 0x2cc   :  { %13292 = vmatprep.subr.bf16.mxu0 %v13291_v39  ;;  %13312 = vmatprep.subr.bf16.mxu1 %v13311_v27  ;;  %v13327_v38 = vpack.c.bf16 %v9580_v50, %v9579_v40  ;;  %v9585_v40 = vld [vmem:[%s18782_s4 + $0x148] sm:$0xff]  ;;  %v9586_v50 = vld [vmem:[%s18782_s4 + $0x150] sm:$0xff] }
 0x2cd   :  { %11942 = vmatmul.mubr.msk.f32.gmra.mrb[36].mxu0 %vm3681_vm6, %v16581_v59  ;;  %12082 = vmatmul.mubr.msk.f32.gmra.mrb[68].mxu1 %vm3681_vm6, %v16581_v59 }
 0x2ce   :  { %11944 = vmatprep.mubr.msk.f32.mxu0 %vm3681_vm6, %v16583_v36  ;;  %12084 = vmatprep.mubr.msk.f32.mxu1 %vm3681_vm6, %v16583_v36 }
 0x2cf   :  { %13294 = vmatpush3.bf16.msra.mxu0 %v13291_v39  ;;  %13314 = vmatpush3.bf16.msra.mxu1 %v13311_v27  ;;  %v4860_v39 = vsel %vm2715_vm4, %v4800_v55, %v4801_v22  ;;  %v4803_v27 = vrot.slane %v16556_v8, 4  ;;  %v13355_v22 = vpack.c.bf16 %v9628_v24, %v9627_v0 }
 0x2d0   :  { %13296 = vmatprep.subr.bf16.mxu0 %v13295_v9  ;;  %13316 = vmatprep.subr.bf16.mxu1 %v13315_v19 }
 0x2d1   :  { %11945 = vmatmul.mubr.msk.f32.gmra.mrb[38].mxu0 %vm3681_vm6, %v16612_v54  ;;  %12085 = vmatmul.mubr.msk.f32.gmra.mrb[70].mxu1 %vm3681_vm6, %v16612_v54  ;;  %v4858_v25 = vsel %vm2715_vm4, %v4802_v43, %v4803_v27  ;;  %v4808_v43 = vrot.slane %v16645_v12, 4 }
 0x2d2   :  { %11947 = vmatprep.mubr.msk.f32.mxu0 %vm3681_vm6, %v16614_v63  ;;  %12087 = vmatprep.mubr.msk.f32.mxu1 %vm3681_vm6, %v16614_v63 }
 0x2d3   :  { %13298 = vmatpush3.bf16.msra.mxu0 %v13295_v9  ;;  %13318 = vmatpush3.bf16.msra.mxu1 %v13315_v19  ;;  %v4804_v9 = vrot.slane %v16581_v59, 4  ;;  %v9582_v19 = vld [vmem:[%s18782_s4 + $0x130] sm:$0xff] }
 0x2d4   :  { %13300 = vmatprep.subr.bf16.mxu0 %v13299_v58  ;;  %13320 = vmatprep.subr.bf16.mxu1 %v13319_v17 }
 0x2d5   :  { %11948 = vmatmul.mubr.msk.f32.gmra.mrb[40].mxu0 %vm3681_vm6, %v16645_v12  ;;  %12088 = vmatmul.mubr.msk.f32.gmra.mrb[72].mxu1 %vm3681_vm6, %v16645_v12 }
 0x2d6   :  { %11950 = vmatprep.mubr.msk.f32.mxu0 %vm3681_vm6, %v16647_v14  ;;  %12090 = vmatprep.mubr.msk.f32.mxu1 %vm3681_vm6, %v16647_v14 }
 0x2d7   :  { %13302 = vmatpush3.bf16.msra.mxu0 %v13299_v58  ;;  %13322 = vmatpush3.bf16.msra.mxu1 %v13319_v17  ;;  %v13331_v58 = vpack.c.bf16 %v9582_v19, %v9581_v6  ;;  %v13351_v17 = vpack.c.bf16 %v9626_v37, %v9625_v13  ;;  %v4811_v19 = vrot.slane %v16680_v30, 4  ;;  %v9587_v13 = vld [vmem:[%s18782_s4 + $0x158] sm:$0xf] }
 0x2d8   :  { %12143 = vmatprep.subr.msk.mxu0 %vm3778_vm5, %v9499_v35  ;;  %12213 = vmatprep.subr.msk.mxu1 %vm3778_vm5, %v9543_v46  ;;  %v9631_v37 = vld [vmem:[%s18783_s5 + $0x158] sm:$0xf] }
 0x2d9   :  { %11951 = vmatmul.mubr.msk.f32.gmra.mrb[42].mxu0 %vm3681_vm6, %v16678_v47  ;;  %12091 = vmatmul.mubr.msk.f32.gmra.mrb[74].mxu1 %vm3681_vm6, %v16678_v47 }
 0x2da   :  { %11953 = vmatprep.mubr.msk.f32.mxu0 %vm3681_vm6, %v16680_v30  ;;  %12093 = vmatprep.mubr.msk.f32.mxu1 %vm3681_vm6, %v16680_v30 }
 0x2db   :  { %12144 = vmatpush3.msk.msra.mxu0 %vm3778_vm5, %v9499_v35  ;;  %12214 = vmatpush3.msk.msra.mxu1 %vm3778_vm5, %v9543_v46  ;;  %v9583_v35 = vld [vmem:[%s18782_s4 + $0x138] sm:$0xff]  ;;  %v4857_v46 = vsel %vm2715_vm4, %v4803_v27, %v4804_v9  ;;  %v4809_v27 = vrot.slane %v16647_v14, 4 }
 0x2dc   :  { %13324 = vmatprep.subr.bf16.mxu0 %v17065_v11  ;;  %13344 = vmatprep.subr.bf16.mxu1 %v17067_v51  ;;  %v13335_v55 = vpack.c.bf16 %v9584_v60, %v9583_v35  ;;  %v9709_v35 = vld [vmem:[%s18783_s5 + $0x160] sm:$0xff]  ;;  %v4813_v60 = vrot.slane %v16719_v2, 4 }
 0x2dd   :  { %11954 = vmatmul.mubr.msk.f32.gmra.mrb[44].mxu0 %vm3681_vm6, %v16717_v29  ;;  %12094 = vmatmul.mubr.msk.f32.gmra.mrb[76].mxu1 %vm3681_vm6, %v16717_v29 }
 0x2de   :  { %11956 = vmatprep.mubr.msk.f32.mxu0 %vm3681_vm6, %v16719_v2  ;;  %12096 = vmatprep.mubr.msk.f32.mxu1 %vm3681_vm6, %v16719_v2 }
 0x2e1   :  { %11957 = vmatmul.mubr.msk.f32.gmra.mrb[46].mxu0 %vm3681_vm6, %v16750_v15  ;;  %12097 = vmatmul.mubr.msk.f32.gmra.mrb[78].mxu1 %vm3681_vm6, %v16750_v15 }
 0x2e2   :  { %11959 = vmatprep.mubr.msk.f32.mxu0 %vm3681_vm6, %v16752_v4  ;;  %12099 = vmatprep.mubr.msk.f32.mxu1 %vm3681_vm6, %v16752_v4 }
 0x2e5   :  { %11960 = vmatmul.mubr.msk.f32.gmra.mrb[48].mxu0 %vm3681_vm6, %v16781_v23  ;;  %12100 = vmatmul.mubr.msk.f32.gmra.mrb[80].mxu1 %vm3681_vm6, %v16781_v23 }
 0x2e6   :  { %11962 = vmatprep.mubr.msk.f32.mxu0 %vm3681_vm6, %v16783_v32  ;;  %12102 = vmatprep.mubr.msk.f32.mxu1 %vm3681_vm6, %v16783_v32 }
 0x2e9   :  { %11963 = vmatmul.mubr.msk.f32.gmra.mrb[50].mxu0 %vm3681_vm6, %v16806_v52  ;;  %12103 = vmatmul.mubr.msk.f32.gmra.mrb[82].mxu1 %vm3681_vm6, %v16806_v52 }
 0x2ea   :  { %11965 = vmatprep.mubr.msk.f32.mxu0 %vm3681_vm6, %v16808_v34  ;;  %12105 = vmatprep.mubr.msk.f32.mxu1 %vm3681_vm6, %v16808_v34 }
 0x2ed   :  { %11966 = vmatmul.mubr.msk.f32.gmra.mrb[52].mxu0 %vm3681_vm6, %v16831_v41  ;;  %12106 = vmatmul.mubr.msk.f32.gmra.mrb[84].mxu1 %vm3681_vm6, %v16831_v41 }
 0x2ee   :  { %11968 = vmatprep.mubr.msk.f32.mxu0 %vm3681_vm6, %v16833_v20  ;;  %12108 = vmatprep.mubr.msk.f32.mxu1 %vm3681_vm6, %v16833_v20 }
 0x2f1   :  { %11969 = vmatmul.mubr.msk.f32.gmra.mrb[54].mxu0 %vm3681_vm6, %v16853_v56  ;;  %12109 = vmatmul.mubr.msk.f32.gmra.mrb[86].mxu1 %vm3681_vm6, %v16853_v56 }
 0x2f2   :  { %11971 = vmatprep.mubr.msk.f32.mxu0 %vm3681_vm6, %v16855_v57  ;;  %12111 = vmatprep.mubr.msk.f32.mxu1 %vm3681_vm6, %v16855_v57 }
 0x2f5   :  { %11972 = vmatmul.mubr.msk.f32.gmra.mrb[56].mxu0 %vm3681_vm6, %v16875_v3  ;;  %12112 = vmatmul.mubr.msk.f32.gmra.mrb[88].mxu1 %vm3681_vm6, %v16875_v3 }
 0x2f6   :  { %11974 = vmatprep.mubr.msk.f32.mxu0 %vm3681_vm6, %v16877_v5  ;;  %12114 = vmatprep.mubr.msk.f32.mxu1 %vm3681_vm6, %v16877_v5 }
 0x2f9   :  { %11975 = vmatmul.mubr.msk.f32.gmra.mrb[58].mxu0 %vm3681_vm6, %v16895_v26  ;;  %12115 = vmatmul.mubr.msk.f32.gmra.mrb[90].mxu1 %vm3681_vm6, %v16895_v26 }
 0x2fa   :  { %11977 = vmatprep.mubr.msk.f32.mxu0 %vm3681_vm6, %v16897_v45  ;;  %12117 = vmatprep.mubr.msk.f32.mxu1 %vm3681_vm6, %v16897_v45 }
 0x2fd   :  { %11978 = vmatmul.mubr.msk.f32.gmra.mrb[60].mxu0 %vm3681_vm6, %v16918_v61  ;;  %12118 = vmatmul.mubr.msk.f32.gmra.mrb[92].mxu1 %vm3681_vm6, %v16918_v61 }
 0x2fe   :  { %11980 = vmatprep.mubr.msk.f32.mxu0 %vm3681_vm6, %v16920_v31  ;;  %12120 = vmatprep.mubr.msk.f32.mxu1 %vm3681_vm6, %v16920_v31 }
 0x301   :  { %11981 = vmatmul.mubr.msk.f32.gmra.mrb[62].mxu0 %vm3681_vm6, %v16910_v1  ;;  %12121 = vmatmul.mubr.msk.f32.gmra.mrb[94].mxu1 %vm3681_vm6, %v16910_v1 }
 0x302   :  { %12145 = vmatprep.mubr.msk.f32.mxu0 %vm3681_vm6, %v4861_v21  ;;  %12215 = vmatprep.mubr.msk.f32.mxu1 %vm3681_vm6, %v4861_v21  ;;  %v4855_v21 = vsel %vm2715_vm4, %v4805_v62, %v4806_v53 }
 0x305   :  { %12146 = vmatmul.mubr.msk.f32.vlgmr.msra.gmra.mrb[32].mxu0 %vm3681_vm6, %v4860_v39  ;;  %12216 = vmatmul.mubr.msk.f32.vlgmr.msra.gmra.mrb[64].mxu1 %vm3681_vm6, %v4860_v39 }
 0x306   :  { %12148 = vmatprep.mubr.msk.f32.mxu0 %vm3681_vm6, %v4859_v28  ;;  %12218 = vmatprep.mubr.msk.f32.mxu1 %vm3681_vm6, %v4859_v28  ;;  %v4810_v28 = vrot.slane %v16678_v47, 4 }
 0x307   :  { %13326 = vmatpush3.bf16.msra.mxu0 %v17065_v11  ;;  %13346 = vmatpush3.bf16.msra.mxu1 %v17067_v51  ;;  %v4856_v11 = vsel %vm2715_vm4, %v4804_v9, %v4805_v62  ;;  %v4807_v51 = vrot.slane %v16614_v63, 4  ;;  %v4852_v9 = vsel %vm2715_vm4, %v4808_v43, %v4809_v27 }
 0x308   :  { %13328 = vmatprep.subr.bf16.mxu0 %v13327_v38  ;;  %13348 = vmatprep.subr.bf16.mxu1 %v13347_v33  ;;  %v4851_v62 = vsel %vm2715_vm4, %v4809_v27, %v4810_v28  ;;  %v4819_v27 = vrot.slane %v16808_v34, 4 }
 0x309   :  { %12149 = vmatmul.mubr.msk.f32.gmra.mrb[34].mxu0 %vm3681_vm6, %v4858_v25  ;;  %12219 = vmatmul.mubr.msk.f32.gmra.mrb[66].mxu1 %vm3681_vm6, %v4858_v25  ;;  %v4854_v39 = vsel %vm2715_vm4, %v4806_v53, %v4807_v51  ;;  %v4853_v6 = vsel %vm2715_vm4, %v4807_v51, %v4808_v43  ;;  %v9665_v25 = vld [vmem:[%s18782_s4 + $0x160] sm:$0xff]  ;;  %v4850_v53 = vsel %vm2715_vm4, %v4810_v28, %v4811_v19  ;;  %v4814_v51 = vrot.slane %v16750_v15, 4 }
 0x30a   :  { %12151 = vmatprep.mubr.msk.f32.mxu0 %vm3681_vm6, %v4857_v46  ;;  %12221 = vmatprep.mubr.msk.f32.mxu1 %vm3681_vm6, %v4857_v46  ;;  %v9710_v46 = vld [vmem:[%s18783_s5 + $0x168] sm:$0xff]  ;;  %v4821_v28 = vrot.slane %v16833_v20, 4 }
 0x30b   :  { %13330 = vmatpush3.bf16.msra.mxu0 %v13327_v38  ;;  %13350 = vmatpush3.bf16.msra.mxu1 %v13347_v33  ;;  %v13339_v38 = vpack.c.bf16 %v9586_v50, %v9585_v40  ;;  %v13359_v33 = vpack.c.bf16 %v9630_v42, %v9629_v49  ;;  %v17292_v24 = vpack.c.bf16 %v9710_v46, %v9709_v35  ;;  %v4817_v50 = vrot.slane %v16783_v32, 4 }
 0x30c   :  { %13332 = vmatprep.subr.bf16.mxu0 %v13331_v58  ;;  %13352 = vmatprep.subr.bf16.mxu1 %v13351_v17  ;;  %v4847_v40 = vsel %vm2715_vm4, %v4813_v60, %v4814_v51  ;;  %v4818_v42 = vrot.slane %v16806_v52, 4  ;;  %v4826_v46 = vrot.slane %v16895_v26, 4 }
 0x30d   :  { %12152 = vmatmul.mubr.msk.f32.gmra.mrb[36].mxu0 %vm3681_vm6, %v4856_v11  ;;  %12222 = vmatmul.mubr.msk.f32.gmra.mrb[68].mxu1 %vm3681_vm6, %v4856_v11 }
 0x30e   :  { %12154 = vmatprep.mubr.msk.f32.mxu0 %vm3681_vm6, %v4855_v21  ;;  %12224 = vmatprep.mubr.msk.f32.mxu1 %vm3681_vm6, %v4855_v21  ;;  %v4816_v21 = vrot.slane %v16781_v23, 4 }
 0x30f   :  { %13334 = vmatpush3.bf16.msra.mxu0 %v13331_v58  ;;  %13354 = vmatpush3.bf16.msra.mxu1 %v13351_v17  ;;  %v4812_v58 = vrot.slane %v16717_v29, 4  ;;  %v9666_v17 = vld [vmem:[%s18782_s4 + $0x168] sm:$0xff] }
 0x310   :  { %13336 = vmatprep.subr.bf16.mxu0 %v13335_v55  ;;  %13356 = vmatprep.subr.bf16.mxu1 %v13355_v22  ;;  %v17290_v0 = vpack.c.bf16 %v9666_v17, %v9665_v25  ;;  %v4825_v17 = vrot.slane %v16877_v5, 4 }
 0x311   :  { %12155 = vmatmul.mubr.msk.f32.gmra.mrb[38].mxu0 %vm3681_vm6, %v4854_v39  ;;  %12225 = vmatmul.mubr.msk.f32.gmra.mrb[70].mxu1 %vm3681_vm6, %v4854_v39  ;;  %v4849_v11 = vsel %vm2715_vm4, %v4811_v19, %v4812_v58  ;;  %v4844_v39 = vsel %vm2715_vm4, %v4816_v21, %v4817_v50  ;;  %v4822_v19 = vrot.slane %v16853_v56, 4 }
 0x312   :  { %12157 = vmatprep.mubr.msk.f32.mxu0 %vm3681_vm6, %v4853_v6  ;;  %12227 = vmatprep.mubr.msk.f32.mxu1 %vm3681_vm6, %v4853_v6  ;;  %v4842_v6 = vsel %vm2715_vm4, %v4818_v42, %v4819_v27 }
 0x313   :  { %13338 = vmatpush3.bf16.msra.mxu0 %v13335_v55  ;;  %13358 = vmatpush3.bf16.msra.mxu1 %v13355_v22  ;;  %v4848_v55 = vsel %vm2715_vm4, %v4812_v58, %v4813_v60  ;;  %v4815_v22 = vrot.slane %v16752_v4, 4  ;;  %v4839_v25 = vsel %vm2715_vm4, %v4821_v28, %v4822_v19  ;;  %v4827_v60 = vrot.slane %v16897_v45, 4 }
 0x314   :  { %13340 = vmatprep.subr.bf16.mxu0 %v13339_v38  ;;  %13360 = vmatprep.subr.bf16.mxu1 %v13359_v33 }
 0x315   :  { %12158 = vmatmul.mubr.msk.f32.gmra.mrb[40].mxu0 %vm3681_vm6, %v4852_v9  ;;  %12228 = vmatmul.mubr.msk.f32.gmra.mrb[72].mxu1 %vm3681_vm6, %v4852_v9  ;;  %v4846_v43 = vsel %vm2715_vm4, %v4814_v51, %v4815_v22  ;;  %v4845_v49 = vsel %vm2715_vm4, %v4815_v22, %v4816_v21  ;;  %v4828_v51 = vrot.slane %v16918_v61, 4  ;;  %v4829_v22 = vrot.slane %v16920_v31, 4 }
 0x316   :  { %12160 = vmatprep.mubr.msk.f32.mxu0 %vm3681_vm6, %v4851_v62  ;;  %12230 = vmatprep.mubr.msk.f32.mxu1 %vm3681_vm6, %v4851_v62  ;;  %v4824_v62 = vrot.slane %v16875_v3, 4  ;;  %v4830_v21 = vrot.slane %v16910_v1, 4 }
 0x317   :  { %13342 = vmatpush3.bf16.msra.mxu0 %v13339_v38  ;;  %13362 = vmatpush3.bf16.msra.mxu1 %v13359_v33  ;;  %v4843_v38 = vsel %vm2715_vm4, %v4817_v50, %v4818_v42  ;;  %v4820_v33 = vrot.slane %v16831_v41, 4  ;;  %v5503_v42 = vrot.slane %v16508_v44, 6 }
 0x318   :  { %12283 = vmatprep.subr.msk.mxu0 %vm3778_vm5, %v9587_v13  ;;  %12353 = vmatprep.subr.msk.mxu1 %vm3778_vm5, %v9631_v37  ;;  %v4831_v50 = vsel %vm2715_vm4, %v4829_v22, %v4830_v21 }
 0x319   :  { %12161 = vmatmul.mubr.msk.f32.gmra.mrb[42].mxu0 %vm3681_vm6, %v4850_v53  ;;  %12231 = vmatmul.mubr.msk.f32.gmra.mrb[74].mxu1 %vm3681_vm6, %v4850_v53  ;;  %v4841_v9 = vsel %vm2715_vm4, %v4819_v27, %v4820_v33  ;;  %v4836_v53 = vsel %vm2715_vm4, %v4824_v62, %v4825_v17  ;;  %v5505_v27 = vrot.slane %v16536_v48, 6 }
 0x31a   :  { %12163 = vmatprep.mubr.msk.f32.mxu0 %vm3681_vm6, %v4849_v11  ;;  %12233 = vmatprep.mubr.msk.f32.mxu1 %vm3681_vm6, %v4849_v11  ;;  %v4835_v11 = vsel %vm2715_vm4, %v4825_v17, %v4826_v46  ;;  %v5508_v17 = vrot.slane %v16581_v59, 6 }
 0x31b   :  { %12284 = vmatpush3.msk.msra.mxu0 %vm3778_vm5, %v9587_v13  ;;  %12354 = vmatpush3.msk.msra.mxu1 %vm3778_vm5, %v9631_v37  ;;  %v4840_v13 = vsel %vm2715_vm4, %v4820_v33, %v4821_v28  ;;  %v4823_v37 = vrot.slane %v16855_v57, 4  ;;  %v9711_v28 = vld [vmem:[%s18783_s5 + $0x170] sm:$0xff] }
 0x31c   :  { %13364 = vmatprep.subr.bf16.mxu0 %v17290_v0  ;;  %13384 = vmatprep.subr.bf16.mxu1 %v17292_v24 }
 0x31d   :  { %12164 = vmatmul.mubr.msk.f32.gmra.mrb[44].mxu0 %vm3681_vm6, %v4848_v55  ;;  %12234 = vmatmul.mubr.msk.f32.gmra.mrb[76].mxu1 %vm3681_vm6, %v4848_v55  ;;  %v4838_v58 = vsel %vm2715_vm4, %v4822_v19, %v4823_v37  ;;  %v4837_v35 = vsel %vm2715_vm4, %v4823_v37, %v4824_v62  ;;  %v4834_v55 = vsel %vm2715_vm4, %v4826_v46, %v4827_v60  ;;  %v9669_v62 = vld [vmem:[%s18782_s4 + $0x180] sm:$0xff] }
 0x31e   :  { %12166 = vmatprep.mubr.msk.f32.mxu0 %vm3681_vm6, %v4847_v40  ;;  %12236 = vmatprep.mubr.msk.f32.mxu1 %vm3681_vm6, %v4847_v40  ;;  %v4833_v40 = vsel %vm2715_vm4, %v4827_v60, %v4828_v51  ;;  %v9713_v46 = vld [vmem:[%s18783_s5 + $0x180] sm:$0xff] }
 0x321   :  { %12167 = vmatmul.mubr.msk.f32.gmra.mrb[46].mxu0 %vm3681_vm6, %v4846_v43  ;;  %12237 = vmatmul.mubr.msk.f32.gmra.mrb[78].mxu1 %vm3681_vm6, %v4846_v43  ;;  %v4832_v43 = vsel %vm2715_vm4, %v4828_v51, %v4829_v22  ;;  %v9671_v22 = vld [vmem:[%s18782_s4 + $0x190] sm:$0xff] }
 0x322   :  { %12169 = vmatprep.mubr.msk.f32.mxu0 %vm3681_vm6, %v4845_v49  ;;  %12239 = vmatprep.mubr.msk.f32.mxu1 %vm3681_vm6, %v4845_v49  ;;  %v5504_v49 = vrot.slane %v16534_v16, 6 }
 0x324   :  { %v5566_v33 = vsel %vm5535_vm7, %v5503_v42, %v5504_v49  ;;  %v5565_v19 = vsel %vm5535_vm7, %v5504_v49, %v5505_v27  ;;  %v5511_v49 = vrot.slane %v16614_v63, 6 }
 0x325   :  { %12170 = vmatmul.mubr.msk.f32.gmra.mrb[48].mxu0 %vm3681_vm6, %v4844_v39  ;;  %12240 = vmatmul.mubr.msk.f32.gmra.mrb[80].mxu1 %vm3681_vm6, %v4844_v39  ;;  %v4862_v39 = vsel %vm2715_vm4, %v4830_v21, %v4799_v18  ;;  %v9668_v18 = vld [vmem:[%s18782_s4 + $0x178] sm:$0xff]  ;;  %v9715_v21 = vld [vmem:[%s18783_s5 + $0x190] sm:$0xff] }
 0x326   :  { %12172 = vmatprep.mubr.msk.f32.mxu0 %vm3681_vm6, %v4843_v38  ;;  %12242 = vmatprep.mubr.msk.f32.mxu1 %vm3681_vm6, %v4843_v38  ;;  %v9667_v38 = vld [vmem:[%s18782_s4 + $0x170] sm:$0xff] }
 0x327   :  { %v13367_v37 = vpack.c.bf16 %v9668_v18, %v9667_v38  ;;  %v9673_v38 = vld [vmem:[%s18782_s4 + $0x1a0] sm:$0xff]  ;;  %v9674_v18 = vld [vmem:[%s18782_s4 + $0x1a8] sm:$0xff] }
 0x329   :  { %12173 = vmatmul.mubr.msk.f32.gmra.mrb[50].mxu0 %vm3681_vm6, %v4842_v6  ;;  %12243 = vmatmul.mubr.msk.f32.gmra.mrb[82].mxu1 %vm3681_vm6, %v4842_v6  ;;  %v5506_v6 = vrot.slane %v16554_v7, 6 }
 0x32a   :  { %12175 = vmatprep.mubr.msk.f32.mxu0 %vm3681_vm6, %v4841_v9  ;;  %12245 = vmatprep.mubr.msk.f32.mxu1 %vm3681_vm6, %v4841_v9  ;;  %v9712_v9 = vld [vmem:[%s18783_s5 + $0x178] sm:$0xff] }
 0x32d   :  { %12176 = vmatmul.mubr.msk.f32.gmra.mrb[52].mxu0 %vm3681_vm6, %v4840_v13  ;;  %12246 = vmatmul.mubr.msk.f32.gmra.mrb[84].mxu1 %vm3681_vm6, %v4840_v13  ;;  %v5507_v13 = vrot.slane %v16556_v8, 6 }
 0x32e   :  { %12178 = vmatprep.mubr.msk.f32.mxu0 %vm3681_vm6, %v4839_v25  ;;  %12248 = vmatprep.mubr.msk.f32.mxu1 %vm3681_vm6, %v4839_v25  ;;  %v13387_v25 = vpack.c.bf16 %v9712_v9, %v9711_v28  ;;  %v9717_v28 = vld [vmem:[%s18783_s5 + $0x1a0] sm:$0xff]  ;;  %v9718_v9 = vld [vmem:[%s18783_s5 + $0x1a8] sm:$0xff] }
 0x32f   :  { %v5563_v60 = vsel %vm5535_vm7, %v5506_v6, %v5507_v13 }
 0x331   :  { %12179 = vmatmul.mubr.msk.f32.gmra.mrb[54].mxu0 %vm3681_vm6, %v4838_v58  ;;  %12249 = vmatmul.mubr.msk.f32.gmra.mrb[86].mxu1 %vm3681_vm6, %v4838_v58  ;;  %v5564_v58 = vsel %vm5535_vm7, %v5505_v27, %v5506_v6  ;;  %v5512_v6 = vrot.slane %v16645_v12, 6 }
 0x332   :  { %12181 = vmatprep.mubr.msk.f32.mxu0 %vm3681_vm6, %v4837_v35  ;;  %12251 = vmatprep.mubr.msk.f32.mxu1 %vm3681_vm6, %v4837_v35  ;;  %v9670_v35 = vld [vmem:[%s18782_s4 + $0x188] sm:$0xff] }
 0x333   :  { %v13371_v51 = vpack.c.bf16 %v9670_v35, %v9669_v62  ;;  %v5558_v62 = vsel %vm5535_vm7, %v5511_v49, %v5512_v6  ;;  %v5515_v35 = vrot.slane %v16680_v30, 6 }
 0x335   :  { %12182 = vmatmul.mubr.msk.f32.gmra.mrb[56].mxu0 %vm3681_vm6, %v4836_v53  ;;  %12252 = vmatmul.mubr.msk.f32.gmra.mrb[88].mxu1 %vm3681_vm6, %v4836_v53  ;;  %v9714_v53 = vld [vmem:[%s18783_s5 + $0x188] sm:$0xff] }
 0x336   :  { %12184 = vmatprep.mubr.msk.f32.mxu0 %vm3681_vm6, %v4835_v11  ;;  %12254 = vmatprep.mubr.msk.f32.mxu1 %vm3681_vm6, %v4835_v11  ;;  %v5509_v11 = vrot.slane %v16583_v36, 6 }
 0x339   :  { %12185 = vmatmul.mubr.msk.f32.gmra.mrb[58].mxu0 %vm3681_vm6, %v4834_v55  ;;  %12255 = vmatmul.mubr.msk.f32.gmra.mrb[90].mxu1 %vm3681_vm6, %v4834_v55  ;;  %v13391_v55 = vpack.c.bf16 %v9714_v53, %v9713_v46  ;;  %v9675_v46 = vld [vmem:[%s18782_s4 + $0x1b0] sm:$0xf] }
 0x33a   :  { %12187 = vmatprep.mubr.msk.f32.mxu0 %vm3681_vm6, %v4833_v40  ;;  %12257 = vmatprep.mubr.msk.f32.mxu1 %vm3681_vm6, %v4833_v40  ;;  %v9672_v40 = vld [vmem:[%s18782_s4 + $0x198] sm:$0xff] }
 0x33d   :  { %12188 = vmatmul.mubr.msk.f32.gmra.mrb[60].mxu0 %vm3681_vm6, %v4832_v43  ;;  %12258 = vmatmul.mubr.msk.f32.gmra.mrb[92].mxu1 %vm3681_vm6, %v4832_v43  ;;  %v9716_v43 = vld [vmem:[%s18783_s5 + $0x198] sm:$0xff] }
 0x33e   :  { %12190 = vmatprep.mubr.msk.f32.mxu0 %vm3681_vm6, %v4831_v50  ;;  %12260 = vmatprep.mubr.msk.f32.mxu1 %vm3681_vm6, %v4831_v50  ;;  %v5561_v50 = vsel %vm5535_vm7, %v5508_v17, %v5509_v11  ;;  %v13395_v27 = vpack.c.bf16 %v9716_v43, %v9715_v21  ;;  %v5518_v21 = vrot.slane %v16750_v15, 6 }
 0x341   :  { %12191 = vmatmul.mubr.msk.f32.gmra.mrb[62].mxu0 %vm3681_vm6, %v4862_v39  ;;  %12261 = vmatmul.mubr.msk.f32.gmra.mrb[94].mxu1 %vm3681_vm6, %v4862_v39  ;;  %v13375_v39 = vpack.c.bf16 %v9672_v40, %v9671_v22 }
 0x342   :  { %12285 = vmatprep.mubr.msk.f32.mxu0 %vm3681_vm6, %v5566_v33  ;;  %12355 = vmatprep.mubr.msk.f32.mxu1 %vm3681_vm6, %v5566_v33 }
 0x345   :  { %12286 = vmatmul.mubr.msk.f32.vlgmr.msra.gmra.mrb[32].mxu0 %vm3681_vm6, %v5565_v19  ;;  %12356 = vmatmul.mubr.msk.f32.vlgmr.msra.gmra.mrb[64].mxu1 %vm3681_vm6, %v5565_v19 }
 0x346   :  { %12288 = vmatprep.mubr.msk.f32.mxu0 %vm3681_vm6, %v5564_v58  ;;  %12358 = vmatprep.mubr.msk.f32.mxu1 %vm3681_vm6, %v5564_v58  ;;  %v5514_v58 = vrot.slane %v16678_v47, 6 }
 0x347   :  { %13366 = vmatpush3.bf16.msra.mxu0 %v17290_v0  ;;  %13386 = vmatpush3.bf16.msra.mxu1 %v17292_v24  ;;  %v5562_v0 = vsel %vm5535_vm7, %v5507_v13, %v5508_v17  ;;  %v5510_v24 = vrot.slane %v16612_v54, 6  ;;  %v5513_v13 = vrot.slane %v16647_v14, 6 }
 0x348   :  { %13368 = vmatprep.subr.bf16.mxu0 %v13367_v37  ;;  %13388 = vmatprep.subr.bf16.mxu1 %v13387_v25  ;;  %v5555_v22 = vsel %vm5535_vm7, %v5514_v58, %v5515_v35 }
 0x349   :  { %12289 = vmatmul.mubr.msk.f32.gmra.mrb[34].mxu0 %vm3681_vm6, %v5563_v60  ;;  %12359 = vmatmul.mubr.msk.f32.gmra.mrb[66].mxu1 %vm3681_vm6, %v5563_v60  ;;  %v5560_v33 = vsel %vm5535_vm7, %v5509_v11, %v5510_v24  ;;  %v5559_v19 = vsel %vm5535_vm7, %v5510_v24, %v5511_v49  ;;  %v5557_v17 = vsel %vm5535_vm7, %v5512_v6, %v5513_v13  ;;  %v5516_v60 = vrot.slane %v16717_v29, 6  ;;  %v9719_v11 = vld [vmem:[%s18783_s5 + $0x1b0] sm:$0xf] }
 0x34a   :  { %12291 = vmatprep.mubr.msk.f32.mxu0 %vm3681_vm6, %v5562_v0  ;;  %12361 = vmatprep.mubr.msk.f32.mxu1 %vm3681_vm6, %v5562_v0  ;;  %v5556_v53 = vsel %vm5535_vm7, %v5513_v13, %v5514_v58  ;;  %v5517_v0 = vrot.slane %v16719_v2, 6  ;;  %v5522_v6 = vrot.slane %v16806_v52, 6 }
 0x34b   :  { %13370 = vmatpush3.bf16.msra.mxu0 %v13367_v37  ;;  %13390 = vmatpush3.bf16.msra.mxu1 %v13387_v25  ;;  %v13379_v37 = vpack.c.bf16 %v9674_v18, %v9673_v38  ;;  %v13399_v25 = vpack.c.bf16 %v9718_v9, %v9717_v28  ;;  %v5554_v40 = vsel %vm5535_vm7, %v5515_v35, %v5516_v60  ;;  %v5521_v38 = vrot.slane %v16783_v32, 6 }
 0x34c   :  { %13372 = vmatprep.subr.bf16.mxu0 %v13371_v51  ;;  %13392 = vmatprep.subr.bf16.mxu1 %v13391_v55  ;;  %v5553_v43 = vsel %vm5535_vm7, %v5516_v60, %v5517_v0  ;;  %v5552_v49 = vsel %vm5535_vm7, %v5517_v0, %v5518_v21  ;;  %v5523_v28 = vrot.slane %v16808_v34, 6  ;;  %v5529_v60 = vrot.slane %v16877_v5, 6 }
 0x34d   :  { %12292 = vmatmul.mubr.msk.f32.gmra.mrb[36].mxu0 %vm3681_vm6, %v5561_v50  ;;  %12362 = vmatmul.mubr.msk.f32.gmra.mrb[68].mxu1 %vm3681_vm6, %v5561_v50  ;;  %v5519_v50 = vrot.slane %v16752_v4, 6  ;;  %v5548_v9 = vsel %vm5535_vm7, %v5521_v38, %v5522_v6 }
 0x34e   :  { %12294 = vmatprep.mubr.msk.f32.mxu0 %vm3681_vm6, %v5560_v33  ;;  %12364 = vmatprep.mubr.msk.f32.mxu1 %vm3681_vm6, %v5560_v33  ;;  %v5547_v13 = vsel %vm5535_vm7, %v5522_v6, %v5523_v28 }
 0x34f   :  { %13374 = vmatpush3.bf16.msra.mxu0 %v13371_v51  ;;  %13394 = vmatpush3.bf16.msra.mxu1 %v13391_v55  ;;  %v9754_v51 = vld [vmem:[%s18785_s7 + $0x50] sm:$0xff]  ;;  %v9755_v55 = vld [vmem:[%s18785_s7 + $0x58] sm:$0xff] }
 0x350   :  { %13376 = vmatprep.subr.bf16.mxu0 %v13375_v39  ;;  %13396 = vmatprep.subr.bf16.mxu1 %v13395_v27  ;;  %v17527_v24 = vpack.c.bf16 %v9755_v55, %v9754_v51  ;;  %v5530_v51 = vrot.slane %v16895_v26, 6 }
 0x351   :  { %12295 = vmatmul.mubr.msk.f32.gmra.mrb[38].mxu0 %vm3681_vm6, %v5559_v19  ;;  %12365 = vmatmul.mubr.msk.f32.gmra.mrb[70].mxu1 %vm3681_vm6, %v5559_v19  ;;  %v5524_v19 = vrot.slane %v16831_v41, 6 }
 0x352   :  { %12297 = vmatprep.mubr.msk.f32.mxu0 %vm3681_vm6, %v5558_v62  ;;  %12367 = vmatprep.mubr.msk.f32.mxu1 %vm3681_vm6, %v5558_v62  ;;  %v5526_v62 = vrot.slane %v16853_v56, 6  ;;  %v5540_v0 = vsel %vm5535_vm7, %v5529_v60, %v5530_v51 }
 0x353   :  { %13378 = vmatpush3.bf16.msra.mxu0 %v13375_v39  ;;  %13398 = vmatpush3.bf16.msra.mxu1 %v13395_v27  ;;  %v5520_v39 = vrot.slane %v16781_v23, 6  ;;  %v5551_v27 = vsel %vm5535_vm7, %v5518_v21, %v5519_v50 }
 0x354   :  { %13380 = vmatprep.subr.bf16.mxu0 %v13379_v37  ;;  %13400 = vmatprep.subr.bf16.mxu1 %v13399_v25 }
 0x355   :  { %12298 = vmatmul.mubr.msk.f32.gmra.mrb[40].mxu0 %vm3681_vm6, %v5557_v17  ;;  %12368 = vmatmul.mubr.msk.f32.gmra.mrb[72].mxu1 %vm3681_vm6, %v5557_v17  ;;  %v5550_v33 = vsel %vm5535_vm7, %v5519_v50, %v5520_v39  ;;  %v5549_v18 = vsel %vm5535_vm7, %v5520_v39, %v5521_v38  ;;  %v5527_v17 = vrot.slane %v16855_v57, 6 }
 0x356   :  { %12300 = vmatprep.mubr.msk.f32.mxu0 %vm3681_vm6, %v5556_v53  ;;  %12370 = vmatprep.mubr.msk.f32.mxu1 %vm3681_vm6, %v5556_v53 }
 0x357   :  { %13382 = vmatpush3.bf16.msra.mxu0 %v13379_v37  ;;  %13402 = vmatpush3.bf16.msra.mxu1 %v13399_v25  ;;  %v5525_v37 = vrot.slane %v16833_v20, 6  ;;  %v5546_v25 = vsel %vm5535_vm7, %v5523_v28, %v5524_v19  ;;  %v5543_v53 = vsel %vm5535_vm7, %v5526_v62, %v5527_v17 }
 0x358   :  { %12423 = vmatprep.subr.msk.mxu0 %vm3778_vm5, %v9675_v46  ;;  %12493 = vmatprep.subr.msk.mxu1 %vm3778_vm5, %v9719_v11 }
 0x359   :  { %12301 = vmatmul.mubr.msk.f32.gmra.mrb[42].mxu0 %vm3681_vm6, %v5555_v22  ;;  %12371 = vmatmul.mubr.msk.f32.gmra.mrb[74].mxu1 %vm3681_vm6, %v5555_v22  ;;  %v5545_v58 = vsel %vm5535_vm7, %v5524_v19, %v5525_v37  ;;  %v5544_v35 = vsel %vm5535_vm7, %v5525_v37, %v5526_v62  ;;  %v5531_v22 = vrot.slane %v16897_v45, 6  ;;  %v6953_v19 = vld [vmem:[%s18785_s7 + $0x18] sm:$0xff] }
 0x35a   :  { %12303 = vmatprep.mubr.msk.f32.mxu0 %vm3681_vm6, %v5554_v40  ;;  %12373 = vmatprep.mubr.msk.f32.mxu1 %vm3681_vm6, %v5554_v40  ;;  %v5532_v40 = vrot.slane %v16918_v61, 6 }
 0x35b   :  { %12424 = vmatpush3.msk.msra.mxu0 %vm3778_vm5, %v9675_v46  ;;  %12494 = vmatpush3.msk.msra.mxu1 %vm3778_vm5, %v9719_v11  ;;  %v5528_v46 = vrot.slane %v16875_v3, 6  ;;  %v5539_v21 = vsel %vm5535_vm7, %v5530_v51, %v5531_v22  ;;  %v6958_v51 = vld [vmem:[%s18785_s7 + $0x40] sm:$0xff] }
 0x35c   :  { %13404 = vmatprep.subr.bf16.mxu0 %v17527_v24  ;;  %v5538_v50 = vsel %vm5535_vm7, %v5531_v22, %v5532_v40 }
 0x35d   :  { %12304 = vmatmul.mubr.msk.f32.gmra.mrb[44].mxu0 %vm3681_vm6, %v5553_v43  ;;  %12374 = vmatmul.mubr.msk.f32.gmra.mrb[76].mxu1 %vm3681_vm6, %v5553_v43  ;;  %v5542_v11 = vsel %vm5535_vm7, %v5527_v17, %v5528_v46  ;;  %v5541_v55 = vsel %vm5535_vm7, %v5528_v46, %v5529_v60  ;;  %v5533_v43 = vrot.slane %v16920_v31, 6  ;;  %v6955_v17 = vld [vmem:[%s18785_s7 + $0x28] sm:$0xff] }
 0x35e   :  { %12306 = vmatprep.mubr.msk.f32.mxu0 %vm3681_vm6, %v5552_v49  ;;  %12376 = vmatprep.mubr.msk.f32.mxu1 %vm3681_vm6, %v5552_v49  ;;  %v5534_v49 = vrot.slane %v16910_v1, 6 }
 0x35f   :  { %v5537_v39 = vsel %vm5535_vm7, %v5532_v40, %v5533_v43 }
 0x360   :  { %v5567_v38 = vsel %vm5535_vm7, %v5534_v49, %v5503_v42 }
 0x361   :  { %12307 = vmatmul.mubr.msk.f32.gmra.mrb[46].mxu0 %vm3681_vm6, %v5551_v27  ;;  %12377 = vmatmul.mubr.msk.f32.gmra.mrb[78].mxu1 %vm3681_vm6, %v5551_v27  ;;  %v5536_v27 = vsel %vm5535_vm7, %v5533_v43, %v5534_v49 }
 0x362   :  { %12309 = vmatprep.mubr.msk.f32.mxu0 %vm3681_vm6, %v5550_v33  ;;  %12379 = vmatprep.mubr.msk.f32.mxu1 %vm3681_vm6, %v5550_v33 }
 0x365   :  { %12310 = vmatmul.mubr.msk.f32.gmra.mrb[48].mxu0 %vm3681_vm6, %v5549_v18  ;;  %12380 = vmatmul.mubr.msk.f32.gmra.mrb[80].mxu1 %vm3681_vm6, %v5549_v18 }
 0x366   :  { %12312 = vmatprep.mubr.msk.f32.mxu0 %vm3681_vm6, %v5548_v9  ;;  %12382 = vmatprep.mubr.msk.f32.mxu1 %vm3681_vm6, %v5548_v9  ;;  %v6952_v9 = vld [vmem:[%s18785_s7 + $0x10] sm:$0xff] }
 0x369   :  { %12313 = vmatmul.mubr.msk.f32.gmra.mrb[50].mxu0 %vm3681_vm6, %v5547_v13  ;;  %12383 = vmatmul.mubr.msk.f32.gmra.mrb[82].mxu1 %vm3681_vm6, %v5547_v13 }
 0x36a   :  { %12315 = vmatprep.mubr.msk.f32.mxu0 %vm3681_vm6, %v5546_v25  ;;  %12385 = vmatprep.mubr.msk.f32.mxu1 %vm3681_vm6, %v5546_v25 }
 0x36d   :  { %12316 = vmatmul.mubr.msk.f32.gmra.mrb[52].mxu0 %vm3681_vm6, %v5545_v58  ;;  %12386 = vmatmul.mubr.msk.f32.gmra.mrb[84].mxu1 %vm3681_vm6, %v5545_v58  ;;  %v6954_v58 = vld [vmem:[%s18785_s7 + $0x20] sm:$0xff] }
 0x36e   :  { %12318 = vmatprep.mubr.msk.f32.mxu0 %vm3681_vm6, %v5544_v35  ;;  %12388 = vmatprep.mubr.msk.f32.mxu1 %vm3681_vm6, %v5544_v35  ;;  %v6956_v35 = vld [vmem:[%s18785_s7 + $0x30] sm:$0xff] }
 0x371   :  { %12319 = vmatmul.mubr.msk.f32.gmra.mrb[54].mxu0 %vm3681_vm6, %v5543_v53  ;;  %12389 = vmatmul.mubr.msk.f32.gmra.mrb[86].mxu1 %vm3681_vm6, %v5543_v53 }
 0x372   :  { %12321 = vmatprep.mubr.msk.f32.mxu0 %vm3681_vm6, %v5542_v11  ;;  %12391 = vmatprep.mubr.msk.f32.mxu1 %vm3681_vm6, %v5542_v11  ;;  %v6957_v11 = vld [vmem:[%s18785_s7 + $0x38] sm:$0xff] }
 0x375   :  { %12322 = vmatmul.mubr.msk.f32.gmra.mrb[56].mxu0 %vm3681_vm6, %v5541_v55  ;;  %12392 = vmatmul.mubr.msk.f32.gmra.mrb[88].mxu1 %vm3681_vm6, %v5541_v55  ;;  %v6959_v55 = vld [vmem:[%s18785_s7 + $0x48] sm:$0xff] }
 0x376   :  { %12324 = vmatprep.mubr.msk.f32.mxu0 %vm3681_vm6, %v5540_v0  ;;  %12394 = vmatprep.mubr.msk.f32.mxu1 %vm3681_vm6, %v5540_v0 }
 0x379   :  { %12325 = vmatmul.mubr.msk.f32.gmra.mrb[58].mxu0 %vm3681_vm6, %v5539_v21  ;;  %12395 = vmatmul.mubr.msk.f32.gmra.mrb[90].mxu1 %vm3681_vm6, %v5539_v21 }
 0x37a   :  { %12327 = vmatprep.mubr.msk.f32.mxu0 %vm3681_vm6, %v5538_v50  ;;  %12397 = vmatprep.mubr.msk.f32.mxu1 %vm3681_vm6, %v5538_v50 }
 0x37d   :  { %12328 = vmatmul.mubr.msk.f32.gmra.mrb[60].mxu0 %vm3681_vm6, %v5537_v39  ;;  %12398 = vmatmul.mubr.msk.f32.gmra.mrb[92].mxu1 %vm3681_vm6, %v5537_v39  ;;  %v17842_v39 = vpack.c.bf16 %v6953_v19, %v6952_v9 }
 0x37e   :  { %12330 = vmatprep.mubr.msk.f32.mxu0 %vm3681_vm6, %v5536_v27  ;;  %12400 = vmatprep.mubr.msk.f32.mxu1 %vm3681_vm6, %v5536_v27  ;;  %v17844_v27 = vpack.c.bf16 %v6955_v17, %v6954_v58 }
 0x381   :  { %12331 = vmatmul.mubr.msk.f32.gmra.mrb[62].mxu0 %vm3681_vm6, %v5567_v38  ;;  %12401 = vmatmul.mubr.msk.f32.gmra.mrb[94].mxu1 %vm3681_vm6, %v5567_v38 }
 0x382   :  { %12425 = vmatprep.mubr.msk.f32.mxu0 %vm3681_vm6, %v16534_v16  ;;  %12495 = vmatprep.mubr.msk.f32.mxu1 %vm3681_vm6, %v16534_v16  ;;  %v9756_v16 = vld [vmem:[%s18785_s7 + $0x60] sm:$0xff] }
 0x385   :  { %12426 = vmatmul.mubr.msk.f32.vlgmr.msra.gmra.mrb[32].mxu0 %vm3681_vm6, %v16536_v48  ;;  %12496 = vmatmul.mubr.msk.f32.vlgmr.msra.gmra.mrb[64].mxu1 %vm3681_vm6, %v16536_v48  ;;  %v9757_v48 = vld [vmem:[%s18785_s7 + $0x68] sm:$0xff] }
 0x386   :  { %12428 = vmatprep.mubr.msk.f32.mxu0 %vm3681_vm6, %v16554_v7  ;;  %12498 = vmatprep.mubr.msk.f32.mxu1 %vm3681_vm6, %v16554_v7  ;;  %v13407_v7 = vpack.c.bf16 %v9757_v48, %v9756_v16 }
 0x387   :  { %13406 = vmatpush3.bf16.msra.mxu0 %v17527_v24 }
 0x388   :  { %13408 = vmatprep.subr.bf16.mxu0 %v13407_v7 }
 0x389   :  { %12429 = vmatmul.mubr.msk.f32.gmra.mrb[34].mxu0 %vm3681_vm6, %v16556_v8  ;;  %12499 = vmatmul.mubr.msk.f32.gmra.mrb[66].mxu1 %vm3681_vm6, %v16556_v8  ;;  %v9758_v8 = vld [vmem:[%s18785_s7 + $0x70] sm:$0xff] }
 0x38a   :  { %12431 = vmatprep.mubr.msk.f32.mxu0 %vm3681_vm6, %v16581_v59  ;;  %12501 = vmatprep.mubr.msk.f32.mxu1 %vm3681_vm6, %v16581_v59  ;;  %v9759_v59 = vld [vmem:[%s18785_s7 + $0x78] sm:$0xff] }
 0x38b   :  { %13410 = vmatpush3.bf16.msra.mxu0 %v13407_v7 }
 0x38d   :  { %12432 = vmatmul.mubr.msk.f32.gmra.mrb[36].mxu0 %vm3681_vm6, %v16583_v36  ;;  %12502 = vmatmul.mubr.msk.f32.gmra.mrb[68].mxu1 %vm3681_vm6, %v16583_v36  ;;  %v9760_v36 = vld [vmem:[%s18785_s7 + $0x80] sm:$0xff] }
 0x38e   :  { %12434 = vmatprep.mubr.msk.f32.mxu0 %vm3681_vm6, %v16612_v54  ;;  %12504 = vmatprep.mubr.msk.f32.mxu1 %vm3681_vm6, %v16612_v54  ;;  %v9761_v54 = vld [vmem:[%s18785_s7 + $0x88] sm:$0xff] }
 0x391   :  { %12435 = vmatmul.mubr.msk.f32.gmra.mrb[38].mxu0 %vm3681_vm6, %v16614_v63  ;;  %12505 = vmatmul.mubr.msk.f32.gmra.mrb[70].mxu1 %vm3681_vm6, %v16614_v63  ;;  %v13415_v63 = vpack.c.bf16 %v9761_v54, %v9760_v36  ;;  %v9829_v36 = vld [vmem:[%s18785_s7 + $0xa8] sm:$0xff] }
 0x392   :  { %12437 = vmatprep.mubr.msk.f32.mxu0 %vm3681_vm6, %v16645_v12  ;;  %12507 = vmatprep.mubr.msk.f32.mxu1 %vm3681_vm6, %v16645_v12  ;;  %v9762_v12 = vld [vmem:[%s18785_s7 + $0x90] sm:$0xff] }
 0x395   :  { %12438 = vmatmul.mubr.msk.f32.gmra.mrb[40].mxu0 %vm3681_vm6, %v16647_v14  ;;  %12508 = vmatmul.mubr.msk.f32.gmra.mrb[72].mxu1 %vm3681_vm6, %v16647_v14  ;;  %v9763_v14 = vld [vmem:[%s18785_s7 + $0x98] sm:$0xff] }
 0x396   :  { %12440 = vmatprep.mubr.msk.f32.mxu0 %vm3681_vm6, %v16678_v47  ;;  %12510 = vmatprep.mubr.msk.f32.mxu1 %vm3681_vm6, %v16678_v47  ;;  %v13419_v47 = vpack.c.bf16 %v9763_v14, %v9762_v12 }
 0x399   :  { %12441 = vmatmul.mubr.msk.f32.gmra.mrb[42].mxu0 %vm3681_vm6, %v16680_v30  ;;  %12511 = vmatmul.mubr.msk.f32.gmra.mrb[74].mxu1 %vm3681_vm6, %v16680_v30  ;;  %v6950_v30 = vld [vmem:[%s18785_s7] sm:$0xff] }
 0x39a   :  { %12443 = vmatprep.mubr.msk.f32.mxu0 %vm3681_vm6, %v16717_v29  ;;  %12513 = vmatprep.mubr.msk.f32.mxu1 %vm3681_vm6, %v16717_v29  ;;  %v6951_v29 = vld [vmem:[%s18785_s7 + $0x8] sm:$0xff] }
 0x39d   :  { %12444 = vmatmul.mubr.msk.f32.gmra.mrb[44].mxu0 %vm3681_vm6, %v16719_v2  ;;  %12514 = vmatmul.mubr.msk.f32.gmra.mrb[76].mxu1 %vm3681_vm6, %v16719_v2  ;;  %v17792_v2 = vpack.c.bf16 %v6951_v29, %v6950_v30 }
 0x39e   :  { %12446 = vmatprep.mubr.msk.f32.mxu0 %vm3681_vm6, %v16750_v15  ;;  %12516 = vmatprep.mubr.msk.f32.mxu1 %vm3681_vm6, %v16750_v15 }
 0x3a1   :  { %12447 = vmatmul.mubr.msk.f32.gmra.mrb[46].mxu0 %vm3681_vm6, %v16752_v4  ;;  %12517 = vmatmul.mubr.msk.f32.gmra.mrb[78].mxu1 %vm3681_vm6, %v16752_v4  ;;  %v17798_v4 = vld [vmem:[%s18786_s6] ss:$0 sm:$0xff] }
 0x3a2   :  { %12449 = vmatprep.mubr.msk.f32.mxu0 %vm3681_vm6, %v16781_v23  ;;  %12519 = vmatprep.mubr.msk.f32.mxu1 %vm3681_vm6, %v16781_v23 }
 0x3a5   :  { %12450 = vmatmul.mubr.msk.f32.gmra.mrb[48].mxu0 %vm3681_vm6, %v16783_v32  ;;  %12520 = vmatmul.mubr.msk.f32.gmra.mrb[80].mxu1 %vm3681_vm6, %v16783_v32 }
 0x3a6   :  { %12452 = vmatprep.mubr.msk.f32.mxu0 %vm3681_vm6, %v16806_v52  ;;  %12522 = vmatprep.mubr.msk.f32.mxu1 %vm3681_vm6, %v16806_v52 }
 0x3a9   :  { %12453 = vmatmul.mubr.msk.f32.gmra.mrb[50].mxu0 %vm3681_vm6, %v16808_v34  ;;  %12523 = vmatmul.mubr.msk.f32.gmra.mrb[82].mxu1 %vm3681_vm6, %v16808_v34 }
 0x3aa   :  { %12455 = vmatprep.mubr.msk.f32.mxu0 %vm3681_vm6, %v16831_v41  ;;  %12525 = vmatprep.mubr.msk.f32.mxu1 %vm3681_vm6, %v16831_v41 }
 0x3ad   :  { %12456 = vmatmul.mubr.msk.f32.gmra.mrb[52].mxu0 %vm3681_vm6, %v16833_v20  ;;  %12526 = vmatmul.mubr.msk.f32.gmra.mrb[84].mxu1 %vm3681_vm6, %v16833_v20 }
 0x3ae   :  { %12458 = vmatprep.mubr.msk.f32.mxu0 %vm3681_vm6, %v16853_v56  ;;  %12528 = vmatprep.mubr.msk.f32.mxu1 %vm3681_vm6, %v16853_v56 }
 0x3b1   :  { %12459 = vmatmul.mubr.msk.f32.gmra.mrb[54].mxu0 %vm3681_vm6, %v16855_v57  ;;  %12529 = vmatmul.mubr.msk.f32.gmra.mrb[86].mxu1 %vm3681_vm6, %v16855_v57 }
 0x3b2   :  { %12461 = vmatprep.mubr.msk.f32.mxu0 %vm3681_vm6, %v16875_v3  ;;  %12531 = vmatprep.mubr.msk.f32.mxu1 %vm3681_vm6, %v16875_v3 }
 0x3b5   :  { %12462 = vmatmul.mubr.msk.f32.gmra.mrb[56].mxu0 %vm3681_vm6, %v16877_v5  ;;  %12532 = vmatmul.mubr.msk.f32.gmra.mrb[88].mxu1 %vm3681_vm6, %v16877_v5 }
 0x3b6   :  { %12464 = vmatprep.mubr.msk.f32.mxu0 %vm3681_vm6, %v16895_v26  ;;  %12534 = vmatprep.mubr.msk.f32.mxu1 %vm3681_vm6, %v16895_v26 }
 0x3b9   :  { %12465 = vmatmul.mubr.msk.f32.gmra.mrb[58].mxu0 %vm3681_vm6, %v16897_v45  ;;  %12535 = vmatmul.mubr.msk.f32.gmra.mrb[90].mxu1 %vm3681_vm6, %v16897_v45 }
 0x3ba   :  { %12467 = vmatprep.mubr.msk.f32.mxu0 %vm3681_vm6, %v16918_v61  ;;  %12537 = vmatprep.mubr.msk.f32.mxu1 %vm3681_vm6, %v16918_v61 }
 0x3bd   :  { %12468 = vmatmul.mubr.msk.f32.gmra.mrb[60].mxu0 %vm3681_vm6, %v16920_v31  ;;  %12538 = vmatmul.mubr.msk.f32.gmra.mrb[92].mxu1 %vm3681_vm6, %v16920_v31 }
 0x3be   :  { %12470 = vmatprep.mubr.msk.f32.mxu0 %vm3681_vm6, %v16910_v1  ;;  %12540 = vmatprep.mubr.msk.f32.mxu1 %vm3681_vm6, %v16910_v1 }
 0x3c1   :  { %12471 = vmatmul.mubr.msk.f32.gmra.mrb[62].mxu0 %vm3681_vm6, %v16508_v44  ;;  %12541 = vmatmul.mubr.msk.f32.gmra.mrb[94].mxu1 %vm3681_vm6, %v16508_v44  ;;  %v13411_v44 = vpack.c.bf16 %v9759_v59, %v9758_v8  ;;  %v17847_v8 = vpack.c.bf16 %v6957_v11, %v6956_v35  ;;  %v17849_v59 = vpack.c.bf16 %v6959_v55, %v6958_v51 }
 0x3c3   :  { %13412 = vmatprep.subr.bf16.mxu0 %v13411_v44 }
 0x3c4   :  { %13414 = vmatpush3.bf16.msra.mxu0 %v13411_v44  ;;  %v9828_v44 = vld [vmem:[%s18785_s7 + $0xa0] sm:$0xff] }
 0x3c5   :  { %13416 = vmatprep.subr.bf16.mxu0 %v13415_v63 }
 0x3c8   :  { %13418 = vmatpush3.bf16.msra.mxu0 %v13415_v63 }
 0x3c9   :  { %13420 = vmatprep.subr.bf16.mxu0 %v13419_v47 }
 0x3cc   :  { %13422 = vmatpush3.bf16.msra.mxu0 %v13419_v47 }
 0x3cd   :  { %13424 = vmatprep.subr.bf16.mxu0 %v17792_v2 }
 0x458   :  { %v12427_v15 = vpop.f32.mrb[32].mxu0  ;;  %v12497_v23 = vpop.f32.mrb[64].mxu1 }
 0x459   :  { %v6753_v32 = vmax.f32 %v12427_v15, %v12497_v23  ;;  %v6289_v52 = vpop.f32.mrb[33].mxu0  ;;  %v6561_v34 = vpop.f32.mrb[65].mxu1 }
 0x45a   :  { %v6752_v41 = vmax.f32 %v6289_v52, %v6561_v34 }
 0x45b   :  { %v6791_v20 = vadd.f32 %v17798_v4, %v6753_v32 }
 0x45c   :  { %v6790_v56 = vadd.f32 %v17798_v4, %v6752_v41  ;;  %v12430_v57 = vpop.f32.mrb[34].mxu0  ;;  %v12500_v3 = vpop.f32.mrb[66].mxu1 }
 0x45d   :  { %v6823_v5 = vmax.f32 %v6791_v20, 0.0  ;;  %v6755_v26 = vmax.f32 %v12430_v57, %v12500_v3  ;;  %v6299_v45 = vpop.f32.mrb[35].mxu0  ;;  %v6571_v1 = vpop.f32.mrb[67].mxu1  ;;  %v17870_v20 = vpack.c.bf16 %v9829_v36, %v9828_v44 }
 0x45e   :  { %v6822_v61 = vmax.f32 %v6790_v56, 0.0  ;;  %v6754_v31 = vmax.f32 %v6299_v45, %v6571_v1 }
 0x45f   :  { %v6855_v42 = vrot.slane %v6823_v5, 2  ;;  %v17803_v24 = vadd.f32 %v17798_v4, %v6755_v26 }
 0x460   :  { %v17805_v33 = vrot.slane %v6822_v61, 2  ;;  %v6792_v6 = vadd.f32 %v17798_v4, %v6754_v31  ;;  %v12433_v18 = vpop.f32.mrb[36].mxu0  ;;  %v12503_v28 = vpop.f32.mrb[68].mxu1 }
 0x461   :  { %v6825_v13 = vmax.f32 %v17803_v24, 0.0  ;;  %v6757_v37 = vmax.f32 %v12433_v18, %v12503_v28  ;;  %v6309_v25 = vpop.f32.mrb[37].mxu0  ;;  %v6581_v62 = vpop.f32.mrb[69].mxu1 }
 0x462   :  { %v6916_v46 = vsel %vm1313_vm2, %v17805_v33, %v6855_v42  ;;  %v6824_v53 = vmax.f32 %v6792_v6, 0.0  ;;  %v6756_v60 = vmax.f32 %v6309_v25, %v6581_v62 }
 0x463   :  { %v17836_v22 = vmax.f32 %v6822_v61, %v6916_v46  ;;  %v6857_v0 = vrot.slane %v6825_v13, 2  ;;  %v17839_v40 = vadd.f32 %v17798_v4, %v6757_v37 }
 0x464   :  { %v6856_v21 = vrot.slane %v6824_v53, 2  ;;  %v6794_v43 = vadd.f32 %v17798_v4, %v6756_v60  ;;  %v12436_v50 = vpop.f32.mrb[38].mxu0  ;;  %v12506_v49 = vpop.f32.mrb[70].mxu1 }
 0x465   :  { %v6827_v38 = vmax.f32 %v17839_v40, 0.0  ;;  %v6759_v16 = vmax.f32 %v12436_v50, %v12506_v49  ;;  %v6319_v48 = vpop.f32.mrb[39].mxu0  ;;  %v6591_v7 = vpop.f32.mrb[71].mxu1  ;;  %v18889_v41 = vrot.slane %v17836_v22, 4 }
 0x466   :  { %v6914_v54 = vsel %vm1313_vm2, %v6856_v21, %v6857_v0  ;;  %v6915_v63 = vsel %vm1313_vm2, %v6855_v42, %v6856_v21  ;;  %v6826_v12 = vmax.f32 %v6794_v43, 0.0  ;;  %v6758_v14 = vmax.f32 %v6319_v48, %v6591_v7 }
 0x467   :  { %v17861_v47 = vmax.f32 %v6823_v5, %v6915_v63  ;;  %v17863_v30 = vmax.f32 %v6824_v53, %v6914_v54  ;;  %v6859_v29 = vrot.slane %v6827_v38, 2  ;;  %v17866_v15 = vadd.f32 %v17798_v4, %v6759_v16 }
 0x468   :  { %v6858_v23 = vrot.slane %v6826_v12, 2  ;;  %v6796_v32 = vadd.f32 %v17798_v4, %v6758_v14  ;;  %v12439_v52 = vpop.f32.mrb[40].mxu0  ;;  %v12509_v34 = vpop.f32.mrb[72].mxu1 }
 0x469   :  { %v6829_v56 = vmax.f32 %v17866_v15, 0.0  ;;  %v6761_v57 = vmax.f32 %v12439_v52, %v12509_v34  ;;  %v6329_v3 = vpop.f32.mrb[41].mxu0  ;;  %v6601_v5 = vpop.f32.mrb[73].mxu1  ;;  %v6961_v26 = vrot.slane %v17861_v47, 4  ;;  %v6962_v45 = vrot.slane %v17863_v30, 4 }
 0x46a   :  { %v6912_v1 = vsel %vm1313_vm2, %v6858_v23, %v6859_v29  ;;  %v6913_v61 = vsel %vm1313_vm2, %v6857_v0, %v6858_v23  ;;  %v6828_v31 = vmax.f32 %v6796_v32, 0.0  ;;  %v6760_v42 = vmax.f32 %v6329_v3, %v6601_v5 }
 0x46b   :  { %v17879_v24 = vmax.f32 %v6825_v13, %v6913_v61  ;;  %v17881_v6 = vmax.f32 %v6826_v12, %v6912_v1  ;;  %v6861_v18 = vrot.slane %v6829_v56, 2  ;;  %v17884_v28 = vadd.f32 %v17798_v4, %v6761_v57 }
 0x46c   :  { %v6860_v9 = vrot.slane %v6828_v31, 2  ;;  %v6798_v19 = vadd.f32 %v17798_v4, %v6760_v42  ;;  %v12442_v37 = vpop.f32.mrb[42].mxu0  ;;  %v12512_v25 = vpop.f32.mrb[74].mxu1  ;;  %v17891_v62 = vsel %vm2715_vm4, %v18889_v41, %v6961_v26  ;;  %v17895_v13 = vsel %vm2715_vm4, %v6961_v26, %v6962_v45 }
 0x46d   :  { %19095 = vst [vmem:[#allocation3_spill] sm:$0xff] %v17891_v62  ;;  %v6831_v58 = vmax.f32 %v17884_v28, 0.0  ;;  %v6763_v17 = vmax.f32 %v12442_v37, %v12512_v25  ;;  %12563 = vmatprep.mubr.msk.f32.mxu0 %vm7035_vm8, %v17891_v62  ;;  %v6339_v35 = vpop.f32.mrb[43].mxu0  ;;  %v6611_v46 = vpop.f32.mrb[75].mxu1  ;;  %v6963_v53 = vrot.slane %v17879_v24, 4  ;;  %v6964_v60 = vrot.slane %v17881_v6, 4 }
 0x46e   :  { %v6910_v11 = vsel %vm1313_vm2, %v6860_v9, %v6861_v18  ;;  %v6911_v51 = vsel %vm1313_vm2, %v6859_v29, %v6860_v9  ;;  %v6830_v55 = vmax.f32 %v6798_v19, 0.0  ;;  %v6762_v0 = vmax.f32 %v6339_v35, %v6611_v46  ;;  %12564 = vmatmul.mubr.msk.f32.vlgmr.msra.gmra.mrb[64].mxu0 %vm7035_vm8, %v17895_v13 }
 0x46f   :  { %v17908_v40 = vmax.f32 %v6827_v38, %v6911_v51  ;;  %v17910_v21 = vmax.f32 %v6828_v31, %v6910_v11  ;;  %v6863_v43 = vrot.slane %v6831_v58, 2  ;;  %v17913_v50 = vadd.f32 %v17798_v4, %v6763_v17  ;;  %13426 = vmatpush3.bf16.msra.mxu0 %v17792_v2 }
 0x470   :  { %v6862_v49 = vrot.slane %v6830_v55, 2  ;;  %v6800_v16 = vadd.f32 %v17798_v4, %v6762_v0  ;;  %v12445_v48 = vpop.f32.mrb[44].mxu0  ;;  %v12515_v7 = vpop.f32.mrb[76].mxu1  ;;  %v17919_v44 = vsel %vm2715_vm4, %v6962_v45, %v6963_v53  ;;  %v17923_v38 = vsel %vm2715_vm4, %v6963_v53, %v6964_v60  ;;  %13428 = vmatprep.subr.bf16.mxu0 %v17842_v39 }
 0x471   :  { %v6833_v36 = vmax.f32 %v17913_v50, 0.0  ;;  %v6765_v54 = vmax.f32 %v12445_v48, %v12515_v7  ;;  %12566 = vmatprep.mubr.msk.f32.mxu0 %vm7035_vm8, %v17919_v44  ;;  %v6349_v2 = vpop.f32.mrb[45].mxu0  ;;  %v6621_v63 = vpop.f32.mrb[77].mxu1  ;;  %v6965_v12 = vrot.slane %v17908_v40, 4  ;;  %v6966_v14 = vrot.slane %v17910_v21, 4 }
 0x472   :  { %v6908_v29 = vsel %vm1313_vm2, %v6862_v49, %v6863_v43  ;;  %v6909_v15 = vsel %vm1313_vm2, %v6861_v18, %v6862_v49  ;;  %v6832_v23 = vmax.f32 %v6800_v16, 0.0  ;;  %v6764_v32 = vmax.f32 %v6349_v2, %v6621_v63  ;;  %12567 = vmatmul.mubr.msk.f32.gmra.mrb[66].mxu0 %vm7035_vm8, %v17923_v38 }
 0x473   :  { %v17937_v52 = vmax.f32 %v6829_v56, %v6909_v15  ;;  %v17939_v34 = vmax.f32 %v6830_v55, %v6908_v29  ;;  %v6865_v57 = vrot.slane %v6833_v36, 2  ;;  %v17942_v3 = vadd.f32 %v17798_v4, %v6765_v54  ;;  %13430 = vmatpush3.bf16.msra.mxu0 %v17842_v39 }
 0x474   :  { %v6864_v5 = vrot.slane %v6832_v23, 2  ;;  %v6802_v26 = vadd.f32 %v17798_v4, %v6764_v32  ;;  %v12448_v45 = vpop.f32.mrb[46].mxu0  ;;  %v12518_v1 = vpop.f32.mrb[78].mxu1  ;;  %v17948_v61 = vsel %vm2715_vm4, %v6964_v60, %v6965_v12  ;;  %v17952_v56 = vsel %vm2715_vm4, %v6965_v12, %v6966_v14  ;;  %13432 = vmatprep.subr.bf16.mxu0 %v17844_v27 }
 0x475   :  { %v6835_v31 = vmax.f32 %v17942_v3, 0.0  ;;  %v6767_v42 = vmax.f32 %v12448_v45, %v12518_v1  ;;  %12569 = vmatprep.mubr.msk.f32.mxu0 %vm7035_vm8, %v17948_v61  ;;  %v6359_v39 = vpop.f32.mrb[47].mxu0  ;;  %v6631_v18 = vpop.f32.mrb[79].mxu1  ;;  %v6967_v28 = vrot.slane %v17937_v52, 4  ;;  %v6968_v9 = vrot.slane %v17939_v34, 4 }
 0x476   :  { %v6906_v19 = vsel %vm1313_vm2, %v6864_v5, %v6865_v57  ;;  %v6907_v37 = vsel %vm1313_vm2, %v6863_v43, %v6864_v5  ;;  %v6834_v25 = vmax.f32 %v6802_v26, 0.0  ;;  %v6766_v17 = vmax.f32 %v6359_v39, %v6631_v18  ;;  %12570 = vmatmul.mubr.msk.f32.gmra.mrb[68].mxu0 %vm7035_vm8, %v17952_v56 }
 0x477   :  { %v17966_v35 = vmax.f32 %v6831_v58, %v6907_v37  ;;  %v17968_v46 = vmax.f32 %v6832_v23, %v6906_v19  ;;  %v6867_v53 = vrot.slane %v6835_v31, 2  ;;  %v17971_v60 = vadd.f32 %v17798_v4, %v6767_v42  ;;  %13434 = vmatpush3.bf16.msra.mxu0 %v17844_v27 }
 0x478   :  { %v6866_v11 = vrot.slane %v6834_v25, 2  ;;  %v6804_v51 = vadd.f32 %v17798_v4, %v6766_v17  ;;  %v12451_v55 = vpop.f32.mrb[48].mxu0  ;;  %v12521_v0 = vpop.f32.mrb[80].mxu1  ;;  %v17977_v43 = vsel %vm2715_vm4, %v6966_v14, %v6967_v28  ;;  %v17981_v58 = vsel %vm2715_vm4, %v6967_v28, %v6968_v9  ;;  %13436 = vmatprep.subr.bf16.mxu0 %v17847_v8 }
 0x479   :  { %v6837_v50 = vmax.f32 %v17971_v60, 0.0  ;;  %v6769_v49 = vmax.f32 %v12451_v55, %v12521_v0  ;;  %12572 = vmatprep.mubr.msk.f32.mxu0 %vm7035_vm8, %v17977_v43  ;;  %v6369_v27 = vpop.f32.mrb[49].mxu0  ;;  %v6641_v16 = vpop.f32.mrb[81].mxu1  ;;  %v6969_v48 = vrot.slane %v17966_v35, 4  ;;  %v6970_v7 = vrot.slane %v17968_v46, 4 }
 0x47a   :  { %v6904_v54 = vsel %vm1313_vm2, %v6866_v11, %v6867_v53  ;;  %v6905_v2 = vsel %vm1313_vm2, %v6865_v57, %v6866_v11  ;;  %v6836_v63 = vmax.f32 %v6804_v51, 0.0  ;;  %v6768_v12 = vmax.f32 %v6369_v27, %v6641_v16  ;;  %12573 = vmatmul.mubr.msk.f32.gmra.mrb[70].mxu0 %vm7035_vm8, %v17981_v58 }
 0x47b   :  { %v17995_v14 = vmax.f32 %v6833_v36, %v6905_v2  ;;  %v17997_v29 = vmax.f32 %v6834_v25, %v6904_v54  ;;  %v6869_v15 = vrot.slane %v6837_v50, 2  ;;  %v18000_v23 = vadd.f32 %v17798_v4, %v6769_v49  ;;  %13438 = vmatpush3.bf16.msra.mxu0 %v17847_v8 }
 0x47c   :  { %v6868_v32 = vrot.slane %v6836_v63, 2  ;;  %v6806_v3 = vadd.f32 %v17798_v4, %v6768_v12  ;;  %v12454_v5 = vpop.f32.mrb[50].mxu0  ;;  %v12524_v57 = vpop.f32.mrb[82].mxu1  ;;  %v18006_v26 = vsel %vm2715_vm4, %v6968_v9, %v6969_v48  ;;  %v18010_v36 = vsel %vm2715_vm4, %v6969_v48, %v6970_v7  ;;  %13440 = vmatprep.subr.bf16.mxu0 %v17849_v59 }
 0x47d   :  { %v6839_v45 = vmax.f32 %v18000_v23, 0.0  ;;  %v6771_v1 = vmax.f32 %v12454_v5, %v12524_v57  ;;  %12575 = vmatprep.mubr.msk.f32.mxu0 %vm7035_vm8, %v18006_v26  ;;  %v6379_v8 = vpop.f32.mrb[51].mxu0  ;;  %v6651_v42 = vpop.f32.mrb[83].mxu1  ;;  %v6971_v39 = vrot.slane %v17995_v14, 4  ;;  %v6972_v18 = vrot.slane %v17997_v29, 4 }
 0x47e   :  { %v6902_v28 = vsel %vm1313_vm2, %v6868_v32, %v6869_v15  ;;  %v6903_v9 = vsel %vm1313_vm2, %v6867_v53, %v6868_v32  ;;  %v6838_v19 = vmax.f32 %v6806_v3, 0.0  ;;  %v6770_v37 = vmax.f32 %v6379_v8, %v6651_v42  ;;  %12576 = vmatmul.mubr.msk.f32.gmra.mrb[72].mxu0 %vm7035_vm8, %v18010_v36 }
 0x47f   :  { %v18024_v25 = vmax.f32 %v6835_v31, %v6903_v9  ;;  %v18026_v17 = vmax.f32 %v6836_v63, %v6902_v28  ;;  %v6871_v60 = vrot.slane %v6839_v45, 2  ;;  %v18029_v11 = vadd.f32 %v17798_v4, %v6771_v1  ;;  %13442 = vmatpush3.bf16.msra.mxu0 %v17849_v59 }
 0x480   :  { %v6870_v51 = vrot.slane %v6838_v19, 2  ;;  %v6808_v55 = vadd.f32 %v17798_v4, %v6770_v37  ;;  %v12457_v0 = vpop.f32.mrb[52].mxu0  ;;  %v12527_v53 = vpop.f32.mrb[84].mxu1  ;;  %v18035_v49 = vsel %vm2715_vm4, %v6970_v7, %v6971_v39  ;;  %v18039_v31 = vsel %vm2715_vm4, %v6971_v39, %v6972_v18  ;;  %13444 = vmatprep.subr.bf16.mxu0 %v17870_v20 }
 0x481   :  { %19096 = vst [vmem:[#allocation4_spill] sm:$0xff] %v18035_v49  ;;  %19097 = vst [vmem:[#allocation5_spill] sm:$0xff] %v18039_v31  ;;  %v6841_v27 = vmax.f32 %v18029_v11, 0.0  ;;  %v6773_v16 = vmax.f32 %v12457_v0, %v12527_v53  ;;  %12578 = vmatprep.mubr.msk.f32.mxu0 %vm7035_vm8, %v18035_v49  ;;  %v6389_v59 = vpop.f32.mrb[53].mxu0  ;;  %v6661_v48 = vpop.f32.mrb[85].mxu1  ;;  %v6973_v54 = vrot.slane %v18024_v25, 4 }
 0x482   :  { %v6974_v2 = vrot.slane %v18026_v17, 4  ;;  %v6900_v7 = vsel %vm1313_vm2, %v6870_v51, %v6871_v60  ;;  %v6901_v63 = vsel %vm1313_vm2, %v6869_v15, %v6870_v51  ;;  %v6840_v12 = vmax.f32 %v6808_v55, 0.0  ;;  %12579 = vmatmul.mubr.msk.f32.gmra.mrb[74].mxu0 %vm7035_vm8, %v18039_v31 }
 0x483   :  { %v6772_v23 = vmax.f32 %v6389_v59, %v6661_v48  ;;  %v18053_v32 = vmax.f32 %v6837_v50, %v6901_v63  ;;  %v18055_v3 = vmax.f32 %v6838_v19, %v6900_v7  ;;  %v6873_v5 = vrot.slane %v6841_v27, 2 }
 0x484   :  { %v18058_v57 = vadd.f32 %v17798_v4, %v6773_v16  ;;  %v6872_v1 = vrot.slane %v6840_v12, 2  ;;  %v12460_v42 = vpop.f32.mrb[54].mxu0  ;;  %v12530_v39 = vpop.f32.mrb[86].mxu1  ;;  %v18063_v15 = vsel %vm2715_vm4, %v6972_v18, %v6973_v54  ;;  %v18067_v28 = vsel %vm2715_vm4, %v6973_v54, %v6974_v2 }
 0x485   :  { %v6810_v8 = vadd.f32 %v17798_v4, %v6772_v23  ;;  %19098 = vst [vmem:[#allocation6_spill] sm:$0xff] %v18063_v15  ;;  %19099 = vst [vmem:[#allocation7_spill] sm:$0xff] %v18067_v28  ;;  %v6775_v9 = vmax.f32 %v12460_v42, %v12530_v39  ;;  %12581 = vmatprep.mubr.msk.f32.mxu0 %vm7035_vm8, %v18063_v15  ;;  %v6399_v19 = vpop.f32.mrb[55].mxu0  ;;  %v6671_v37 = vpop.f32.mrb[87].mxu1  ;;  %v6975_v11 = vrot.slane %v18053_v32, 4  ;;  %v6976_v51 = vrot.slane %v18055_v3, 4 }
 0x486   :  { %v6843_v50 = vmax.f32 %v18058_v57, 0.0  ;;  %v6898_v18 = vsel %vm1313_vm2, %v6872_v1, %v6873_v5  ;;  %v6899_v55 = vsel %vm1313_vm2, %v6871_v60, %v6872_v1  ;;  %v6774_v53 = vmax.f32 %v6399_v19, %v6671_v37  ;;  %12582 = vmatmul.mubr.msk.f32.gmra.mrb[76].mxu0 %vm7035_vm8, %v18067_v28 }
 0x487   :  { %v6842_v0 = vmax.f32 %v6810_v8, 0.0  ;;  %v18080_v16 = vmax.f32 %v6839_v45, %v6899_v55  ;;  %v18082_v59 = vmax.f32 %v6840_v12, %v6898_v18  ;;  %v18085_v54 = vadd.f32 %v17798_v4, %v6775_v9 }
 0x488   :  { %v6875_v48 = vrot.slane %v6843_v50, 2  ;;  %v6812_v63 = vadd.f32 %v17798_v4, %v6774_v53  ;;  %v12463_v23 = vpop.f32.mrb[56].mxu0  ;;  %v12533_v57 = vpop.f32.mrb[88].mxu1  ;;  %v18090_v60 = vsel %vm2715_vm4, %v6974_v2, %v6975_v11  ;;  %v18094_v1 = vsel %vm2715_vm4, %v6975_v11, %v6976_v51 }
 0x489   :  { %v6874_v7 = vrot.slane %v6842_v0, 2  ;;  %19100 = vst [vmem:[#allocation8_spill] sm:$0xff] %v18090_v60  ;;  %19101 = vst [vmem:[#allocation9_spill] sm:$0xff] %v18094_v1  ;;  %v6845_v45 = vmax.f32 %v18085_v54, 0.0  ;;  %v6777_v12 = vmax.f32 %v12463_v23, %v12533_v57  ;;  %12584 = vmatprep.mubr.msk.f32.mxu0 %vm7035_vm8, %v18090_v60  ;;  %v6409_v8 = vpop.f32.mrb[57].mxu0  ;;  %v6681_v42 = vpop.f32.mrb[89].mxu1 }
 0x48a   :  { %v6977_v39 = vrot.slane %v18080_v16, 4  ;;  %v6978_v9 = vrot.slane %v18082_v59, 4  ;;  %v6844_v37 = vmax.f32 %v6812_v63, 0.0  ;;  %v6776_v11 = vmax.f32 %v6409_v8, %v6681_v42  ;;  %12585 = vmatmul.mubr.msk.f32.gmra.mrb[78].mxu0 %vm7035_vm8, %v18094_v1 }
 0x48b   :  { %v6896_v2 = vsel %vm1313_vm2, %v6874_v7, %v6875_v48  ;;  %v6897_v19 = vsel %vm1313_vm2, %v6873_v5, %v6874_v7  ;;  %v6877_v53 = vrot.slane %v6845_v45, 2  ;;  %v18112_v54 = vadd.f32 %v17798_v4, %v6777_v12 }
 0x48c   :  { %v18107_v18 = vmax.f32 %v6841_v27, %v6897_v19  ;;  %v18109_v55 = vmax.f32 %v6842_v0, %v6896_v2  ;;  %v6876_v23 = vrot.slane %v6844_v37, 2  ;;  %v6814_v57 = vadd.f32 %v17798_v4, %v6776_v11  ;;  %v12466_v41 = vpop.f32.mrb[58].mxu0  ;;  %v12536_v62 = vpop.f32.mrb[90].mxu1 }
 0x48d   :  { %v18117_v5 = vsel %vm2715_vm4, %v6976_v51, %v6977_v39  ;;  %v18121_v7 = vsel %vm2715_vm4, %v6977_v39, %v6978_v9  ;;  %v6847_v27 = vmax.f32 %v18112_v54, 0.0  ;;  %v6779_v0 = vmax.f32 %v12466_v41, %v12536_v62  ;;  %v6419_v63 = vpop.f32.mrb[59].mxu0  ;;  %v6691_v12 = vpop.f32.mrb[91].mxu1 }
 0x48e   :  { %19102 = vst [vmem:[#allocation10_spill] sm:$0xff] %v18117_v5  ;;  %19103 = vst [vmem:[#allocation11_spill] sm:$0xff] %v18121_v7  ;;  %12587 = vmatprep.mubr.msk.f32.mxu0 %vm7035_vm8, %v18117_v5  ;;  %v6979_v8 = vrot.slane %v18107_v18, 4  ;;  %v6980_v42 = vrot.slane %v18109_v55, 4  ;;  %v6894_v51 = vsel %vm1313_vm2, %v6876_v23, %v6877_v53  ;;  %v6895_v2 = vsel %vm1313_vm2, %v6875_v48, %v6876_v23 }
 0x48f   :  { %v6846_v39 = vmax.f32 %v6814_v57, 0.0  ;;  %v6778_v19 = vmax.f32 %v6419_v63, %v6691_v12  ;;  %12588 = vmatmul.mubr.msk.f32.gmra.mrb[80].mxu0 %vm7035_vm8, %v18121_v7  ;;  %v18134_v41 = vmax.f32 %v6843_v50, %v6895_v2  ;;  %v18136_v62 = vmax.f32 %v6844_v37, %v6894_v51 }
 0x490   :  { %v6879_v11 = vrot.slane %v6847_v27, 2  ;;  %v6817_v54 = vadd.f32 %v17798_v4, %v6779_v0  ;;  %v12469_v60 = vpop.f32.mrb[60].mxu0  ;;  %v12539_v28 = vpop.f32.mrb[92].mxu1  ;;  %v18142_v48 = vsel %vm2715_vm4, %v6978_v9, %v6979_v8  ;;  %v18146_v23 = vsel %vm2715_vm4, %v6979_v8, %v6980_v42 }
 0x491   :  { %v6878_v5 = vrot.slane %v6846_v39, 2  ;;  %v6816_v1 = vadd.f32 %v17798_v4, %v6778_v19  ;;  %19104 = vst [vmem:[#allocation12_spill] sm:$0xff] %v18142_v48  ;;  %19105 = vst [vmem:[#allocation13_spill] sm:$0xff] %v18146_v23  ;;  %v6781_v57 = vmax.f32 %v12469_v60, %v12539_v28  ;;  %12590 = vmatprep.mubr.msk.f32.mxu0 %vm7035_vm8, %v18142_v48  ;;  %v6429_v37 = vpop.f32.mrb[61].mxu0  ;;  %v6701_v0 = vpop.f32.mrb[93].mxu1  ;;  %v6981_v63 = vrot.slane %v18134_v41, 4 }
 0x492   :  { %v6849_v50 = vmax.f32 %v6817_v54, 0.0  ;;  %v6982_v12 = vrot.slane %v18136_v62, 4  ;;  %v6780_v8 = vmax.f32 %v6429_v37, %v6701_v0 }
 0x493   :  { %v6892_v51 = vsel %vm1313_vm2, %v6878_v5, %v6879_v11  ;;  %v6893_v9 = vsel %vm1313_vm2, %v6877_v53, %v6878_v5  ;;  %v6848_v2 = vmax.f32 %v6816_v1, 0.0  ;;  %12591 = vmatmul.mubr.msk.f32.gmra.mrb[82].mxu0 %vm7035_vm8, %v18146_v23  ;;  %v6819_v54 = vadd.f32 %v17798_v4, %v6781_v57 }
 0x494   :  { %v18158_v28 = vmax.f32 %v6845_v45, %v6893_v9  ;;  %v18160_v60 = vmax.f32 %v6846_v39, %v6892_v51  ;;  %v6881_v19 = vrot.slane %v6849_v50, 2  ;;  %v6818_v7 = vadd.f32 %v17798_v4, %v6780_v8  ;;  %v12472_v15 = vpop.f32.mrb[62].mxu0  ;;  %v12542_v31 = vpop.f32.mrb[94].mxu1 }
 0x495   :  { %v6880_v48 = vrot.slane %v6848_v2, 2  ;;  %v18166_v53 = vsel %vm2715_vm4, %v6980_v42, %v6981_v63  ;;  %v18170_v1 = vsel %vm2715_vm4, %v6981_v63, %v6982_v12  ;;  %v6851_v45 = vmax.f32 %v6819_v54, 0.0  ;;  %v6439_v39 = vpop.f32.mrb[63].mxu0  ;;  %v6711_v57 = vpop.f32.mrb[95].mxu1 }
 0x496   :  { %19106 = vst [vmem:[#allocation14_spill] sm:$0xff] %v18166_v53  ;;  %v6783_v5 = vmax.f32 %v12472_v15, %v12542_v31  ;;  %12593 = vmatprep.mubr.msk.f32.mxu0 %vm7035_vm8, %v18166_v53  ;;  %v6983_v37 = vrot.slane %v18158_v28, 4  ;;  %v6984_v0 = vrot.slane %v18160_v60, 4  ;;  %v6850_v9 = vmax.f32 %v6818_v7, 0.0 }
 0x497   :  { %v6890_v51 = vsel %vm1313_vm2, %v6880_v48, %v6881_v19  ;;  %v6891_v42 = vsel %vm1313_vm2, %v6879_v11, %v6880_v48  ;;  %v6782_v63 = vmax.f32 %v6439_v39, %v6711_v57  ;;  %12594 = vmatmul.mubr.msk.f32.gmra.mrb[84].mxu0 %vm7035_vm8, %v18170_v1  ;;  %v6883_v8 = vrot.slane %v6851_v45, 2 }
 0x498   :  { %v18182_v31 = vmax.f32 %v6847_v27, %v6891_v42  ;;  %v18184_v15 = vmax.f32 %v6848_v2, %v6890_v51  ;;  %v6821_v54 = vadd.f32 %v17798_v4, %v6783_v5  ;;  %v6882_v53 = vrot.slane %v6850_v9, 2 }
 0x499   :  { %v6820_v23 = vadd.f32 %v17798_v4, %v6782_v63  ;;  %v18190_v49 = vsel %vm2715_vm4, %v6982_v12, %v6983_v37  ;;  %v18194_v7 = vsel %vm2715_vm4, %v6983_v37, %v6984_v0 }
 0x49a   :  { %v6853_v11 = vmax.f32 %v6821_v54, 0.0  ;;  %12596 = vmatprep.mubr.msk.f32.mxu0 %vm7035_vm8, %v18190_v49  ;;  %v6985_v27 = vrot.slane %v18182_v31, 4  ;;  %v6986_v48 = vrot.slane %v18184_v15, 4  ;;  %v6888_v2 = vsel %vm1313_vm2, %v6882_v53, %v6883_v8 }
 0x49b   :  { %v6889_v4 = vsel %vm1313_vm2, %v6881_v19, %v6882_v53  ;;  %v6852_v12 = vmax.f32 %v6820_v23, 0.0  ;;  %12597 = vmatmul.mubr.msk.f32.gmra.mrb[86].mxu0 %vm7035_vm8, %v18194_v7  ;;  %v18208_v39 = vmax.f32 %v6850_v9, %v6888_v2 }
 0x49c   :  { %v18206_v5 = vmax.f32 %v6849_v50, %v6889_v4  ;;  %v6885_v57 = vrot.slane %v6853_v11, 2  ;;  %v18212_v37 = vsel %vm2715_vm4, %v6984_v0, %v6985_v27  ;;  %v18218_v19 = vsel %vm2715_vm4, %v6985_v27, %v6986_v48 }
 0x49d   :  { %v6884_v51 = vrot.slane %v6852_v12, 2  ;;  %12599 = vmatprep.mubr.msk.f32.mxu0 %vm7035_vm8, %v18212_v37  ;;  %v6988_v53 = vrot.slane %v18208_v39, 4 }
 0x49e   :  { %v6917_v23 = vsel %vm1313_vm2, %v6885_v57, %v17805_v33  ;;  %v6987_v50 = vrot.slane %v18206_v5, 4 }
 0x49f   :  { %v18225_v42 = vmax.f32 %v6853_v11, %v6917_v23  ;;  %v6886_v0 = vsel %vm1313_vm2, %v6884_v51, %v6885_v57  ;;  %v6887_v9 = vsel %vm1313_vm2, %v6883_v8, %v6884_v51  ;;  %12600 = vmatmul.mubr.msk.f32.gmra.mrb[88].mxu0 %vm7035_vm8, %v18218_v19  ;;  %v9830_v51 = vld [vmem:[%s18785_s7 + $0xb0] sm:$0xff]  ;;  %v9831_v23 = vld [vmem:[%s18785_s7 + $0xb8] sm:$0xff] }
 0x4a0   :  { %v18233_v63 = vmax.f32 %v6851_v45, %v6887_v9  ;;  %v18235_v54 = vmax.f32 %v6852_v12, %v6886_v0  ;;  %v18239_v33 = vsel %vm2715_vm4, %v6986_v48, %v6987_v50  ;;  %v18243_v11 = vsel %vm2715_vm4, %v6987_v50, %v6988_v53  ;;  %v9833_v0 = vld [vmem:[%s18785_s7 + $0xc8] sm:$0xff] }
 0x4a1   :  { %12602 = vmatprep.mubr.msk.f32.mxu0 %vm7035_vm8, %v18239_v33  ;;  %v6991_v45 = vrot.slane %v18225_v42, 4  ;;  %v19107_v12 = vrot.slane %v17836_v22, 4  ;;  %v13447_v50 = vpack.c.bf16 %v9831_v23, %v9830_v51  ;;  %v9870_v23 = vld [vmem:[%s18785_s7 + $0xf0] sm:$0xff] }
 0x4a2   :  { %v6989_v8 = vrot.slane %v18233_v63, 4  ;;  %v6990_v27 = vrot.slane %v18235_v54, 4 }
 0x4a3   :  { %12603 = vmatmul.mubr.msk.f32.gmra.mrb[90].mxu0 %vm7035_vm8, %v18243_v11  ;;  %v18274_v57 = vsel %vm2715_vm4, %v6991_v45, %v19107_v12  ;;  %v9837_v12 = vld [vmem:[%s18785_s7 + $0xe8] sm:$0xff] }
 0x4a4   :  { %v18254_v48 = vsel %vm2715_vm4, %v6988_v53, %v6989_v8  ;;  %v18258_v2 = vsel %vm2715_vm4, %v6989_v8, %v6990_v27  ;;  %v18266_v4 = vsel %vm2715_vm4, %v6990_v27, %v6991_v45  ;;  %v9832_v53 = vld [vmem:[%s18785_s7 + $0xc0] sm:$0xff]  ;;  %v9834_v8 = vld [vmem:[%s18785_s7 + $0xd0] sm:$0xff]  ;;  %v9835_v27 = vld [vmem:[%s18785_s7 + $0xd8] sm:$0xff] }
 0x4a5   :  { %12605 = vmatprep.mubr.msk.f32.mxu0 %vm7035_vm8, %v18254_v48  ;;  %v13451_v9 = vpack.c.bf16 %v9833_v0, %v9832_v53  ;;  %v13455_v45 = vpack.c.bf16 %v9835_v27, %v9834_v8  ;;  %v9872_v0 = vld [vmem:[%s18785_s7 + $0x100] sm:$0xff]  ;;  %v9874_v27 = vld [vmem:[%s18785_s7 + $0x110] sm:$0xff] }
 0x4a7   :  { %12606 = vmatmul.mubr.msk.f32.gmra.mrb[92].mxu0 %vm7035_vm8, %v18258_v2 }
 0x4a8   :  { %12608 = vmatprep.mubr.msk.f32.mxu0 %vm7035_vm8, %v18266_v4 }
 0x4ab   :  { %12609 = vmatmul.mubr.msk.f32.gmra.mrb[94].mxu0 %vm7035_vm8, %v18274_v57 }
 0x4ac   :  { %12631 = vmatprep.mubr.msk.f32.mxu0 %vm7035_vm8, %v17836_v22 }
 0x4af   :  { %12632 = vmatmul.mubr.msk.f32.vlgmr.msra.gmra.mrb[64].mxu0 %vm7035_vm8, %v17861_v47 }
 0x4b0   :  { %12634 = vmatprep.mubr.msk.f32.mxu0 %vm7035_vm8, %v17863_v30  ;;  %13446 = vmatpush3.bf16.msra.mxu0 %v17870_v20  ;;  %v9836_v20 = vld [vmem:[%s18785_s7 + $0xe0] sm:$0xff] }
 0x4b1   :  { %13448 = vmatprep.subr.bf16.mxu0 %v13447_v50  ;;  %v13459_v51 = vpack.c.bf16 %v9837_v12, %v9836_v20  ;;  %v9876_v12 = vld [vmem:[%s18785_s7 + $0x120] sm:$0xff] }
 0x4b3   :  { %12635 = vmatmul.mubr.msk.f32.gmra.mrb[66].mxu0 %vm7035_vm8, %v17879_v24 }
 0x4b4   :  { %12637 = vmatprep.mubr.msk.f32.mxu0 %vm7035_vm8, %v17881_v6  ;;  %13450 = vmatpush3.bf16.msra.mxu0 %v13447_v50  ;;  %v9871_v50 = vld [vmem:[%s18785_s7 + $0xf8] sm:$0xff] }
 0x4b5   :  { %13452 = vmatprep.subr.bf16.mxu0 %v13451_v9  ;;  %v13463_v53 = vpack.c.bf16 %v9871_v50, %v9870_v23  ;;  %v9878_v50 = vld [vmem:[%s18785_s7 + $0x130] sm:$0xff] }
 0x4b7   :  { %12638 = vmatmul.mubr.msk.f32.gmra.mrb[68].mxu0 %vm7035_vm8, %v17908_v40 }
 0x4b8   :  { %12640 = vmatprep.mubr.msk.f32.mxu0 %vm7035_vm8, %v17910_v21  ;;  %13454 = vmatpush3.bf16.msra.mxu0 %v13451_v9  ;;  %v9873_v9 = vld [vmem:[%s18785_s7 + $0x108] sm:$0xff] }
 0x4b9   :  { %13456 = vmatprep.subr.bf16.mxu0 %v13455_v45  ;;  %v13467_v8 = vpack.c.bf16 %v9873_v9, %v9872_v0  ;;  %v9912_v9 = vld [vmem:[%s18785_s7 + $0x140] sm:$0xff] }
 0x4bb   :  { %12641 = vmatmul.mubr.msk.f32.gmra.mrb[70].mxu0 %vm7035_vm8, %v17937_v52 }
 0x4bc   :  { %12643 = vmatprep.mubr.msk.f32.mxu0 %vm7035_vm8, %v17939_v34  ;;  %13458 = vmatpush3.bf16.msra.mxu0 %v13455_v45  ;;  %v9875_v45 = vld [vmem:[%s18785_s7 + $0x118] sm:$0xff] }
 0x4bd   :  { %13460 = vmatprep.subr.bf16.mxu0 %v13459_v51  ;;  %v13471_v20 = vpack.c.bf16 %v9875_v45, %v9874_v27  ;;  %v9914_v45 = vld [vmem:[%s18785_s7 + $0x150] sm:$0xff] }
 0x4bf   :  { %12644 = vmatmul.mubr.msk.f32.gmra.mrb[72].mxu0 %vm7035_vm8, %v17966_v35 }
 0x4c0   :  { %12646 = vmatprep.mubr.msk.f32.mxu0 %vm7035_vm8, %v17968_v46  ;;  %13462 = vmatpush3.bf16.msra.mxu0 %v13459_v51  ;;  %v9877_v51 = vld [vmem:[%s18785_s7 + $0x128] sm:$0xff] }
 0x4c1   :  { %13464 = vmatprep.subr.bf16.mxu0 %v13463_v53  ;;  %v13475_v23 = vpack.c.bf16 %v9877_v51, %v9876_v12  ;;  %v8553_v12 = vld [vmem:[%s18787_s9] sm:$0xff]  ;;  %v8554_v51 = vld [vmem:[%s18787_s9 + $0x8] sm:$0xff] }
 0x4c3   :  { %12647 = vmatmul.mubr.msk.f32.gmra.mrb[74].mxu0 %vm7035_vm8, %v17995_v14 }
 0x4c4   :  { %12649 = vmatprep.mubr.msk.f32.mxu0 %vm7035_vm8, %v17997_v29 }
 0x4c7   :  { %12650 = vmatmul.mubr.msk.f32.gmra.mrb[76].mxu0 %vm7035_vm8, %v18024_v25 }
 0x4c8   :  { %12652 = vmatprep.mubr.msk.f32.mxu0 %vm7035_vm8, %v18026_v17 }
 0x4cb   :  { %12653 = vmatmul.mubr.msk.f32.gmra.mrb[78].mxu0 %vm7035_vm8, %v18053_v32 }
 0x4cc   :  { %12655 = vmatprep.mubr.msk.f32.mxu0 %vm7035_vm8, %v18055_v3 }
 0x4cf   :  { %12656 = vmatmul.mubr.msk.f32.gmra.mrb[80].mxu0 %vm7035_vm8, %v18080_v16 }
 0x4d0   :  { %12658 = vmatprep.mubr.msk.f32.mxu0 %vm7035_vm8, %v18082_v59 }
 0x4d3   :  { %12659 = vmatmul.mubr.msk.f32.gmra.mrb[82].mxu0 %vm7035_vm8, %v18107_v18 }
 0x4d4   :  { %12661 = vmatprep.mubr.msk.f32.mxu0 %vm7035_vm8, %v18109_v55 }
 0x4d7   :  { %12662 = vmatmul.mubr.msk.f32.gmra.mrb[84].mxu0 %vm7035_vm8, %v18134_v41 }
 0x4d8   :  { %12664 = vmatprep.mubr.msk.f32.mxu0 %vm7035_vm8, %v18136_v62 }
 0x4db   :  { %12665 = vmatmul.mubr.msk.f32.gmra.mrb[86].mxu0 %vm7035_vm8, %v18158_v28 }
 0x4dc   :  { %12667 = vmatprep.mubr.msk.f32.mxu0 %vm7035_vm8, %v18160_v60 }
 0x4df   :  { %12668 = vmatmul.mubr.msk.f32.gmra.mrb[88].mxu0 %vm7035_vm8, %v18182_v31 }
 0x4e0   :  { %12670 = vmatprep.mubr.msk.f32.mxu0 %vm7035_vm8, %v18184_v15 }
 0x4e3   :  { %12671 = vmatmul.mubr.msk.f32.gmra.mrb[90].mxu0 %vm7035_vm8, %v18206_v5 }
 0x4e4   :  { %12673 = vmatprep.mubr.msk.f32.mxu0 %vm7035_vm8, %v18208_v39 }
 0x4e7   :  { %12674 = vmatmul.mubr.msk.f32.gmra.mrb[92].mxu0 %vm7035_vm8, %v18233_v63 }
 0x4e8   :  { %12676 = vmatprep.mubr.msk.f32.mxu0 %vm7035_vm8, %v18235_v54 }
 0x4eb   :  { %12677 = vmatmul.mubr.msk.f32.gmra.mrb[94].mxu0 %vm7035_vm8, %v18225_v42 }
 0x4ec   :  { %12699 = vmatprep.mubr.msk.f32.mxu0 %vm7035_vm8, %v17861_v47 }
 0x4ef   :  { %12700 = vmatmul.mubr.msk.f32.vlgmr.msra.gmra.mrb[64].mxu0 %vm7035_vm8, %v17863_v30 }
 0x4f0   :  { %12702 = vmatprep.mubr.msk.f32.mxu0 %vm7035_vm8, %v17879_v24  ;;  %13466 = vmatpush3.bf16.msra.mxu0 %v13463_v53  ;;  %v9879_v53 = vld [vmem:[%s18785_s7 + $0x138] sm:$0xff] }
 0x4f1   :  { %13468 = vmatprep.subr.bf16.mxu0 %v13467_v8  ;;  %v13479_v0 = vpack.c.bf16 %v9879_v53, %v9878_v50  ;;  %v13503_v53 = vpack.c.bf16 %v8554_v51, %v8553_v12  ;;  %v9919_v51 = vld [vmem:[%s18785_s7 + $0x178] sm:$0xff] }
 0x4f3   :  { %12703 = vmatmul.mubr.msk.f32.gmra.mrb[66].mxu0 %vm7035_vm8, %v17881_v6  ;;  %13504 = vmatprep.subr.bf16.mxu1 %v13503_v53 }
 0x4f4   :  { %12705 = vmatprep.mubr.msk.f32.mxu0 %vm7035_vm8, %v17908_v40  ;;  %13470 = vmatpush3.bf16.msra.mxu0 %v13467_v8  ;;  %v9913_v8 = vld [vmem:[%s18785_s7 + $0x148] sm:$0xff] }
 0x4f5   :  { %13472 = vmatprep.subr.bf16.mxu0 %v13471_v20  ;;  %v13483_v27 = vpack.c.bf16 %v9913_v8, %v9912_v9  ;;  %v9917_v9 = vld [vmem:[%s18785_s7 + $0x168] sm:$0xff]  ;;  %13506 = vmatpush3.bf16.msra.mxu1 %v13503_v53 }
 0x4f7   :  { %12706 = vmatmul.mubr.msk.f32.gmra.mrb[68].mxu0 %vm7035_vm8, %v17910_v21 }
 0x4f8   :  { %12708 = vmatprep.mubr.msk.f32.mxu0 %vm7035_vm8, %v17937_v52  ;;  %13474 = vmatpush3.bf16.msra.mxu0 %v13471_v20  ;;  %v9915_v20 = vld [vmem:[%s18785_s7 + $0x158] sm:$0xff] }
 0x4f9   :  { %13476 = vmatprep.subr.bf16.mxu0 %v13475_v23  ;;  %v13487_v50 = vpack.c.bf16 %v9915_v20, %v9914_v45  ;;  %v8557_v45 = vld [vmem:[%s18787_s9 + $0x20] sm:$0xff]  ;;  %v8558_v20 = vld [vmem:[%s18787_s9 + $0x28] sm:$0xff] }
 0x4fb   :  { %12709 = vmatmul.mubr.msk.f32.gmra.mrb[70].mxu0 %vm7035_vm8, %v17939_v34 }
 0x4fc   :  { %12711 = vmatprep.mubr.msk.f32.mxu0 %vm7035_vm8, %v17966_v35  ;;  %13478 = vmatpush3.bf16.msra.mxu0 %v13475_v23  ;;  %v8555_v23 = vld [vmem:[%s18787_s9 + $0x10] sm:$0xff] }
 0x4fd   :  { %13480 = vmatprep.subr.bf16.mxu0 %v13479_v0 }
 0x4ff   :  { %12712 = vmatmul.mubr.msk.f32.gmra.mrb[72].mxu0 %vm7035_vm8, %v17968_v46 }
 0x500   :  { %12714 = vmatprep.mubr.msk.f32.mxu0 %vm7035_vm8, %v17995_v14  ;;  %13482 = vmatpush3.bf16.msra.mxu0 %v13479_v0  ;;  %v8556_v0 = vld [vmem:[%s18787_s9 + $0x18] sm:$0xff] }
 0x501   :  { %13484 = vmatprep.subr.bf16.mxu0 %v13483_v27  ;;  %v13507_v8 = vpack.c.bf16 %v8556_v0, %v8555_v23  ;;  %v13511_v23 = vpack.c.bf16 %v8558_v20, %v8557_v45  ;;  %v9920_v0 = vld [vmem:[%s18785_s7 + $0x180] sm:$0xff]  ;;  %v8564_v45 = vld [vmem:[%s18787_s9 + $0x58] sm:$0xff]  ;;  %v19108_v20 = vld [vmem:[#allocation4_spill] sm:$0xff] }
 0x503   :  { %12715 = vmatmul.mubr.msk.f32.gmra.mrb[74].mxu0 %vm7035_vm8, %v17997_v29  ;;  %13508 = vmatprep.subr.bf16.mxu1 %v13507_v8 }
 0x504   :  { %12717 = vmatprep.mubr.msk.f32.mxu0 %vm7035_vm8, %v18024_v25  ;;  %13510 = vmatpush3.bf16.msra.mxu1 %v13507_v8 }
 0x505   :  { %13512 = vmatprep.subr.bf16.mxu1 %v13511_v23 }
 0x507   :  { %12718 = vmatmul.mubr.msk.f32.gmra.mrb[76].mxu0 %vm7035_vm8, %v18026_v17 }
 0x508   :  { %12720 = vmatprep.mubr.msk.f32.mxu0 %vm7035_vm8, %v18053_v32  ;;  %13514 = vmatpush3.bf16.msra.mxu1 %v13511_v23  ;;  %v19111_v23 = vld [vmem:[#allocation7_spill] sm:$0xff] }
 0x50b   :  { %12721 = vmatmul.mubr.msk.f32.gmra.mrb[78].mxu0 %vm7035_vm8, %v18055_v3 }
 0x50c   :  { %12723 = vmatprep.mubr.msk.f32.mxu0 %vm7035_vm8, %v18080_v16 }
 0x50f   :  { %12724 = vmatmul.mubr.msk.f32.gmra.mrb[80].mxu0 %vm7035_vm8, %v18082_v59 }
 0x510   :  { %12726 = vmatprep.mubr.msk.f32.mxu0 %vm7035_vm8, %v18107_v18 }
 0x513   :  { %12727 = vmatmul.mubr.msk.f32.gmra.mrb[82].mxu0 %vm7035_vm8, %v18109_v55 }
 0x514   :  { %12729 = vmatprep.mubr.msk.f32.mxu0 %vm7035_vm8, %v18134_v41 }
 0x517   :  { %12730 = vmatmul.mubr.msk.f32.gmra.mrb[84].mxu0 %vm7035_vm8, %v18136_v62 }
 0x518   :  { %12732 = vmatprep.mubr.msk.f32.mxu0 %vm7035_vm8, %v18158_v28 }
 0x51b   :  { %12733 = vmatmul.mubr.msk.f32.gmra.mrb[86].mxu0 %vm7035_vm8, %v18160_v60 }
 0x51c   :  { %12735 = vmatprep.mubr.msk.f32.mxu0 %vm7035_vm8, %v18182_v31 }
 0x51f   :  { %12736 = vmatmul.mubr.msk.f32.gmra.mrb[88].mxu0 %vm7035_vm8, %v18184_v15 }
 0x520   :  { %12738 = vmatprep.mubr.msk.f32.mxu0 %vm7035_vm8, %v18206_v5 }
 0x523   :  { %12739 = vmatmul.mubr.msk.f32.gmra.mrb[90].mxu0 %vm7035_vm8, %v18208_v39 }
 0x524   :  { %12741 = vmatprep.mubr.msk.f32.mxu0 %vm7035_vm8, %v18233_v63 }
 0x527   :  { %12742 = vmatmul.mubr.msk.f32.gmra.mrb[92].mxu0 %vm7035_vm8, %v18235_v54 }
 0x528   :  { %12744 = vmatprep.mubr.msk.f32.mxu0 %vm7035_vm8, %v18225_v42 }
 0x52b   :  { %12745 = vmatmul.mubr.msk.f32.gmra.mrb[94].mxu0 %vm7035_vm8, %v17836_v22 }
 0x52c   :  { %12767 = vmatprep.mubr.msk.f32.mxu0 %vm7035_vm8, %v17895_v13  ;;  %v9916_v13 = vld [vmem:[%s18785_s7 + $0x160] sm:$0xff] }
 0x52d   :  { %v13491_v12 = vpack.c.bf16 %v9917_v9, %v9916_v13 }
 0x52f   :  { %12768 = vmatmul.mubr.msk.f32.vlgmr.msra.gmra.mrb[64].mxu0 %vm7035_vm8, %v17919_v44  ;;  %v9918_v44 = vld [vmem:[%s18785_s7 + $0x170] sm:$0xff] }
 0x530   :  { %12770 = vmatprep.mubr.msk.f32.mxu0 %vm7035_vm8, %v17923_v38  ;;  %13486 = vmatpush3.bf16.msra.mxu0 %v13483_v27  ;;  %v8559_v38 = vld [vmem:[%s18787_s9 + $0x30] sm:$0xff]  ;;  %v8560_v27 = vld [vmem:[%s18787_s9 + $0x38] sm:$0xff]  ;;  %v13495_v53 = vpack.c.bf16 %v9919_v51, %v9918_v44  ;;  %v19110_v51 = vld [vmem:[#allocation6_spill] sm:$0xff] }
 0x531   :  { %13488 = vmatprep.subr.bf16.mxu0 %v13487_v50  ;;  %v13515_v13 = vpack.c.bf16 %v8560_v27, %v8559_v38  ;;  %v19109_v44 = vld [vmem:[#allocation5_spill] sm:$0xff]  ;;  %v19112_v38 = vld [vmem:[#allocation8_spill] sm:$0xff] }
 0x532   :  { %v19113_v27 = vld [vmem:[#allocation9_spill] sm:$0xff] }
 0x533   :  { %12771 = vmatmul.mubr.msk.f32.gmra.mrb[66].mxu0 %vm7035_vm8, %v17948_v61  ;;  %v9921_v61 = vld [vmem:[%s18785_s7 + $0x188] sm:$0xff]  ;;  %13516 = vmatprep.subr.bf16.mxu1 %v13515_v13 }
 0x534   :  { %12773 = vmatprep.mubr.msk.f32.mxu0 %vm7035_vm8, %v17952_v56  ;;  %13490 = vmatpush3.bf16.msra.mxu0 %v13487_v50  ;;  %v8561_v56 = vld [vmem:[%s18787_s9 + $0x40] sm:$0xff]  ;;  %v8562_v50 = vld [vmem:[%s18787_s9 + $0x48] sm:$0xff]  ;;  %v13499_v9 = vpack.c.bf16 %v9921_v61, %v9920_v0  ;;  %v19116_v61 = vld [vmem:[#allocation12_spill] sm:$0xff] }
 0x535   :  { %13492 = vmatprep.subr.bf16.mxu0 %v13491_v12  ;;  %v13519_v8 = vpack.c.bf16 %v8562_v50, %v8561_v56  ;;  %13518 = vmatpush3.bf16.msra.mxu1 %v13515_v13  ;;  %v19115_v0 = vld [vmem:[#allocation11_spill] sm:$0xff]  ;;  %v19117_v13 = vld [vmem:[#allocation13_spill] sm:$0xff]  ;;  %v19118_v56 = vld [vmem:[#allocation14_spill] sm:$0xff] }
 0x537   :  { %12774 = vmatmul.mubr.msk.f32.gmra.mrb[68].mxu0 %vm7035_vm8, %v17977_v43  ;;  %v8563_v43 = vld [vmem:[%s18787_s9 + $0x50] sm:$0xff]  ;;  %13520 = vmatprep.subr.bf16.mxu1 %v13519_v8 }
 0x538   :  { %12776 = vmatprep.mubr.msk.f32.mxu0 %vm7035_vm8, %v17981_v58  ;;  %13494 = vmatpush3.bf16.msra.mxu0 %v13491_v12  ;;  %v13523_v58 = vpack.c.bf16 %v8564_v45, %v8563_v43  ;;  %v8566_v12 = vld [vmem:[%s18787_s9 + $0x68] sm:$0xff] }
 0x539   :  { %13496 = vmatprep.subr.bf16.mxu0 %v13495_v53  ;;  %13522 = vmatpush3.bf16.msra.mxu1 %v13519_v8 }
 0x53a   :  { %13524 = vmatprep.subr.bf16.mxu1 %v13523_v58 }
 0x53b   :  { %12777 = vmatmul.mubr.msk.f32.gmra.mrb[70].mxu0 %vm7035_vm8, %v18006_v26  ;;  %v8565_v26 = vld [vmem:[%s18787_s9 + $0x60] sm:$0xff] }
 0x53c   :  { %12779 = vmatprep.mubr.msk.f32.mxu0 %vm7035_vm8, %v18010_v36  ;;  %13498 = vmatpush3.bf16.msra.mxu0 %v13495_v53  ;;  %v13527_v36 = vpack.c.bf16 %v8566_v12, %v8565_v26  ;;  %v19114_v53 = vld [vmem:[#allocation10_spill] sm:$0xff] }
 0x53d   :  { %13500 = vmatprep.subr.bf16.mxu0 %v13499_v9  ;;  %13526 = vmatpush3.bf16.msra.mxu1 %v13523_v58 }
 0x53e   :  { %13528 = vmatprep.subr.bf16.mxu1 %v13527_v36 }
 0x53f   :  { %12780 = vmatmul.mubr.msk.f32.gmra.mrb[72].mxu0 %vm7035_vm8, %v19108_v20 }
 0x540   :  { %12782 = vmatprep.mubr.msk.f32.mxu0 %vm7035_vm8, %v19109_v44  ;;  %13502 = vmatpush3.bf16.msra.mxu0 %v13499_v9 }
 0x541   :  { %13530 = vmatpush3.bf16.msra.mxu1 %v13527_v36 }
 0x543   :  { %12783 = vmatmul.mubr.msk.f32.gmra.mrb[74].mxu0 %vm7035_vm8, %v19110_v51 }
 0x544   :  { %12785 = vmatprep.mubr.msk.f32.mxu0 %vm7035_vm8, %v19111_v23 }
 0x547   :  { %12786 = vmatmul.mubr.msk.f32.gmra.mrb[76].mxu0 %vm7035_vm8, %v19112_v38 }
 0x548   :  { %12788 = vmatprep.mubr.msk.f32.mxu0 %vm7035_vm8, %v19113_v27 }
 0x54b   :  { %12789 = vmatmul.mubr.msk.f32.gmra.mrb[78].mxu0 %vm7035_vm8, %v19114_v53 }
 0x54c   :  { %12791 = vmatprep.mubr.msk.f32.mxu0 %vm7035_vm8, %v19115_v0 }
 0x54f   :  { %12792 = vmatmul.mubr.msk.f32.gmra.mrb[80].mxu0 %vm7035_vm8, %v19116_v61 }
 0x550   :  { %12794 = vmatprep.mubr.msk.f32.mxu0 %vm7035_vm8, %v19117_v13 }
 0x553   :  { %12795 = vmatmul.mubr.msk.f32.gmra.mrb[82].mxu0 %vm7035_vm8, %v19118_v56 }
 0x554   :  { %12797 = vmatprep.mubr.msk.f32.mxu0 %vm7035_vm8, %v18170_v1 }
 0x557   :  { %12798 = vmatmul.mubr.msk.f32.gmra.mrb[84].mxu0 %vm7035_vm8, %v18190_v49  ;;  %v19119_v49 = vld [vmem:[#allocation3_spill] sm:$0xff] }
 0x558   :  { %12800 = vmatprep.mubr.msk.f32.mxu0 %vm7035_vm8, %v18194_v7 }
 0x55b   :  { %12801 = vmatmul.mubr.msk.f32.gmra.mrb[86].mxu0 %vm7035_vm8, %v18212_v37 }
 0x55c   :  { %12803 = vmatprep.mubr.msk.f32.mxu0 %vm7035_vm8, %v18218_v19 }
 0x55f   :  { %12804 = vmatmul.mubr.msk.f32.gmra.mrb[88].mxu0 %vm7035_vm8, %v18239_v33 }
 0x560   :  { %12806 = vmatprep.mubr.msk.f32.mxu0 %vm7035_vm8, %v18243_v11 }
 0x563   :  { %12807 = vmatmul.mubr.msk.f32.gmra.mrb[90].mxu0 %vm7035_vm8, %v18254_v48 }
 0x564   :  { %12809 = vmatprep.mubr.msk.f32.mxu0 %vm7035_vm8, %v18258_v2 }
 0x567   :  { %12810 = vmatmul.mubr.msk.f32.gmra.mrb[92].mxu0 %vm7035_vm8, %v18266_v4 }
 0x568   :  { %12812 = vmatprep.mubr.msk.f32.mxu0 %vm7035_vm8, %v18274_v57 }
 0x56b   :  { %12813 = vmatmul.mubr.msk.f32.gmra.mrb[94].mxu0 %vm7035_vm8, %v19119_v49 }
 0x56c   :  { %12835 = vmatprep.mubr.msk.f32.mxu0 %vm7035_vm8, %v17863_v30  ;;  %v8567_v30 = vld [vmem:[%s18787_s9 + $0x70] sm:$0xff] }
 0x56f   :  { %12836 = vmatmul.mubr.msk.f32.vlgmr.msra.gmra.mrb[64].mxu0 %vm7035_vm8, %v17879_v24  ;;  %v8568_v24 = vld [vmem:[%s18787_s9 + $0x78] sm:$0xff] }
 0x570   :  { %12838 = vmatprep.mubr.msk.f32.mxu0 %vm7035_vm8, %v17881_v6  ;;  %v13531_v6 = vpack.c.bf16 %v8568_v24, %v8567_v30 }
 0x572   :  { %13532 = vmatprep.subr.bf16.mxu1 %v13531_v6 }
 0x573   :  { %12839 = vmatmul.mubr.msk.f32.gmra.mrb[66].mxu0 %vm7035_vm8, %v17908_v40  ;;  %13534 = vmatpush3.bf16.msra.mxu1 %v13531_v6  ;;  %v18670_v40 = vld [vmem:[%s18788_s8] ss:$0 sm:$0xff] }
 0x574   :  { %12841 = vmatprep.mubr.msk.f32.mxu0 %vm7035_vm8, %v17910_v21 }
 0x577   :  { %12842 = vmatmul.mubr.msk.f32.gmra.mrb[68].mxu0 %vm7035_vm8, %v17937_v52 }
 0x578   :  { %12844 = vmatprep.mubr.msk.f32.mxu0 %vm7035_vm8, %v17939_v34 }
 0x57b   :  { %12845 = vmatmul.mubr.msk.f32.gmra.mrb[70].mxu0 %vm7035_vm8, %v17966_v35 }
 0x57c   :  { %12847 = vmatprep.mubr.msk.f32.mxu0 %vm7035_vm8, %v17968_v46 }
 0x57f   :  { %12848 = vmatmul.mubr.msk.f32.gmra.mrb[72].mxu0 %vm7035_vm8, %v17995_v14 }
 0x580   :  { %12850 = vmatprep.mubr.msk.f32.mxu0 %vm7035_vm8, %v17997_v29 }
 0x583   :  { %12851 = vmatmul.mubr.msk.f32.gmra.mrb[74].mxu0 %vm7035_vm8, %v18024_v25 }
 0x584   :  { %12853 = vmatprep.mubr.msk.f32.mxu0 %vm7035_vm8, %v18026_v17 }
 0x587   :  { %12854 = vmatmul.mubr.msk.f32.gmra.mrb[76].mxu0 %vm7035_vm8, %v18053_v32 }
 0x588   :  { %12856 = vmatprep.mubr.msk.f32.mxu0 %vm7035_vm8, %v18055_v3 }
 0x58b   :  { %12857 = vmatmul.mubr.msk.f32.gmra.mrb[78].mxu0 %vm7035_vm8, %v18080_v16 }
 0x58c   :  { %12859 = vmatprep.mubr.msk.f32.mxu0 %vm7035_vm8, %v18082_v59 }
 0x58f   :  { %12860 = vmatmul.mubr.msk.f32.gmra.mrb[80].mxu0 %vm7035_vm8, %v18107_v18 }
 0x590   :  { %12862 = vmatprep.mubr.msk.f32.mxu0 %vm7035_vm8, %v18109_v55 }
 0x593   :  { %12863 = vmatmul.mubr.msk.f32.gmra.mrb[82].mxu0 %vm7035_vm8, %v18134_v41 }
 0x594   :  { %12865 = vmatprep.mubr.msk.f32.mxu0 %vm7035_vm8, %v18136_v62 }
 0x597   :  { %12866 = vmatmul.mubr.msk.f32.gmra.mrb[84].mxu0 %vm7035_vm8, %v18158_v28 }
 0x598   :  { %12868 = vmatprep.mubr.msk.f32.mxu0 %vm7035_vm8, %v18160_v60 }
 0x59b   :  { %12869 = vmatmul.mubr.msk.f32.gmra.mrb[86].mxu0 %vm7035_vm8, %v18182_v31 }
 0x59c   :  { %12871 = vmatprep.mubr.msk.f32.mxu0 %vm7035_vm8, %v18184_v15 }
 0x59f   :  { %12872 = vmatmul.mubr.msk.f32.gmra.mrb[88].mxu0 %vm7035_vm8, %v18206_v5 }
 0x5a0   :  { %12874 = vmatprep.mubr.msk.f32.mxu0 %vm7035_vm8, %v18208_v39 }
 0x5a3   :  { %12875 = vmatmul.mubr.msk.f32.gmra.mrb[90].mxu0 %vm7035_vm8, %v18233_v63 }
 0x5a4   :  { %12877 = vmatprep.mubr.msk.f32.mxu0 %vm7035_vm8, %v18235_v54 }
 0x5a7   :  { %12878 = vmatmul.mubr.msk.f32.gmra.mrb[92].mxu0 %vm7035_vm8, %v18225_v42 }
 0x5a8   :  { %12880 = vmatprep.mubr.msk.f32.mxu0 %vm7035_vm8, %v17836_v22 }
 0x5ab   :  { %12881 = vmatmul.mubr.msk.f32.gmra.mrb[94].mxu0 %vm7035_vm8, %v17861_v47 }
 0x642   :  { %v12837_v22 = vpop.f32.mrb[64].mxu0 }
 0x643   :  { %v8490_v21 = vadd.f32 %v12837_v22, %v18670_v40  ;;  %v8291_v47 = vpop.f32.mrb[65].mxu0 }
 0x644   :  { %v8489_v52 = vadd.f32 %v18670_v40, %v8291_v47 }
 0x645   :  { %v8522_v46 = vmax.f32 %v8490_v21, 0.0 }
 0x646   :  { %v8521_v34 = vmax.f32 %v8489_v52, 0.0  ;;  %v12840_v35 = vpop.f32.mrb[66].mxu0 }
 0x647   :  { %v8492_v14 = vadd.f32 %v12840_v35, %v18670_v40  ;;  %v8301_v29 = vpop.f32.mrb[67].mxu0 }
 0x648   :  { %v8491_v25 = vadd.f32 %v18670_v40, %v8301_v29  ;;  %12915 = vmatprep.mubr.f32.mxu1 %v8521_v34 }
 0x649   :  { %12916 = vmatmul.mubr.f32.vlgmr.msra.gmra.mrb[96].mxu1 %v8522_v46  ;;  %v8524_v3 = vmax.f32 %v8492_v14, 0.0 }
 0x64a   :  { %v8523_v17 = vmax.f32 %v8491_v25, 0.0  ;;  %v12843_v32 = vpop.f32.mrb[68].mxu0 }
 0x64b   :  { %v8494_v16 = vadd.f32 %v12843_v32, %v18670_v40  ;;  %v8311_v59 = vpop.f32.mrb[69].mxu0 }
 0x64c   :  { %v8493_v18 = vadd.f32 %v18670_v40, %v8311_v59  ;;  %12918 = vmatprep.mubr.f32.mxu1 %v8523_v17 }
 0x64d   :  { %12919 = vmatmul.mubr.f32.gmra.mrb[98].mxu1 %v8524_v3  ;;  %v8526_v62 = vmax.f32 %v8494_v16, 0.0 }
 0x64e   :  { %v8525_v55 = vmax.f32 %v8493_v18, 0.0  ;;  %v12846_v41 = vpop.f32.mrb[70].mxu0 }
 0x64f   :  { %v8496_v28 = vadd.f32 %v12846_v41, %v18670_v40  ;;  %v8321_v60 = vpop.f32.mrb[71].mxu0 }
 0x650   :  { %v8495_v1 = vadd.f32 %v18670_v40, %v8321_v60  ;;  %12921 = vmatprep.mubr.f32.mxu1 %v8525_v55 }
 0x651   :  { %12922 = vmatmul.mubr.f32.gmra.mrb[100].mxu1 %v8526_v62  ;;  %v8528_v7 = vmax.f32 %v8496_v28, 0.0 }
 0x652   :  { %v8527_v31 = vmax.f32 %v8495_v1, 0.0  ;;  %v12849_v15 = vpop.f32.mrb[72].mxu0 }
 0x653   :  { %v8498_v5 = vadd.f32 %v12849_v15, %v18670_v40  ;;  %v8331_v39 = vpop.f32.mrb[73].mxu0 }
 0x654   :  { %v8497_v37 = vadd.f32 %v18670_v40, %v8331_v39  ;;  %12924 = vmatprep.mubr.f32.mxu1 %v8527_v31 }
 0x655   :  { %12925 = vmatmul.mubr.f32.gmra.mrb[102].mxu1 %v8528_v7  ;;  %v8530_v63 = vmax.f32 %v8498_v5, 0.0 }
 0x656   :  { %v8529_v19 = vmax.f32 %v8497_v37, 0.0  ;;  %v12852_v42 = vpop.f32.mrb[74].mxu0 }
 0x657   :  { %v8500_v54 = vadd.f32 %v12852_v42, %v18670_v40  ;;  %v8341_v33 = vpop.f32.mrb[75].mxu0 }
 0x658   :  { %v8499_v11 = vadd.f32 %v18670_v40, %v8341_v33  ;;  %12927 = vmatprep.mubr.f32.mxu1 %v8529_v19 }
 0x659   :  { %12928 = vmatmul.mubr.f32.gmra.mrb[104].mxu1 %v8530_v63  ;;  %v8532_v4 = vmax.f32 %v8500_v54, 0.0 }
 0x65a   :  { %v8531_v48 = vmax.f32 %v8499_v11, 0.0  ;;  %v12855_v2 = vpop.f32.mrb[76].mxu0 }
 0x65b   :  { %v8502_v57 = vadd.f32 %v12855_v2, %v18670_v40  ;;  %v8351_v50 = vpop.f32.mrb[77].mxu0 }
 0x65c   :  { %v8501_v9 = vadd.f32 %v18670_v40, %v8351_v50  ;;  %12930 = vmatprep.mubr.f32.mxu1 %v8531_v48  ;;  %v19120_v48 = vlaneseq }
 0x65d   :  { %12931 = vmatmul.mubr.f32.gmra.mrb[106].mxu1 %v8532_v4  ;;  %v8534_v45 = vmax.f32 %v8502_v57, 0.0  ;;  %v8836_v4 = vmul.u32 32, %v19092_v10 }
 0x65e   :  { %v8533_v8 = vmax.f32 %v8501_v9, 0.0  ;;  %v12858_v43 = vpop.f32.mrb[78].mxu0  ;;  %v8834_v2 = vand.u32 127, %v19120_v48  ;;  %v14228_v9 = vmov 1.0  }
 0x65f   :  { %v8504_v58 = vadd.f32 %v12858_v43, %v18670_v40  ;;  %v8361_v20 = vpop.f32.mrb[79].mxu0 }
 0x660   :  { %v8503_v26 = vadd.f32 %v18670_v40, %v8361_v20  ;;  %12933 = vmatprep.mubr.f32.mxu1 %v8533_v8  ;;  %v8835_v57 = vadd.s32 128, %v8834_v2  ;;  %vm18706_vm9 = vcmp.eq.s32.totalorder %v8834_v2, %v8836_v4 }
 0x661   :  { %12934 = vmatmul.mubr.f32.gmra.mrb[108].mxu1 %v8534_v45  ;;  %v8536_v36 = vmax.f32 %v8504_v58, 0.0 }
 0x662   :  { %v8535_v12 = vmax.f32 %v8503_v26, 0.0  ;;  %v12861_v44 = vpop.f32.mrb[80].mxu0  ;;  %vm8838_vm10 = vcmp.eq.s32.totalorder %v8835_v57, %v8836_v4 }
 0x663   :  { %v8506_v51 = vadd.f32 %v12861_v44, %v18670_v40  ;;  %v8371_v23 = vpop.f32.mrb[81].mxu0 }
 0x664   :  { %v8505_v38 = vadd.f32 %v18670_v40, %v8371_v23  ;;  %12936 = vmatprep.mubr.f32.mxu1 %v8535_v12 }
 0x665   :  { %12937 = vmatmul.mubr.f32.gmra.mrb[110].mxu1 %v8536_v36  ;;  %v8538_v0 = vmax.f32 %v8506_v51, 0.0 }
 0x666   :  { %v8537_v27 = vmax.f32 %v8505_v38, 0.0  ;;  %v12864_v53 = vpop.f32.mrb[82].mxu0 }
 0x667   :  { %v8508_v61 = vadd.f32 %v12864_v53, %v18670_v40  ;;  %v8381_v13 = vpop.f32.mrb[83].mxu0 }
 0x668   :  { %v8507_v56 = vadd.f32 %v18670_v40, %v8381_v13  ;;  %12939 = vmatprep.mubr.f32.mxu1 %v8537_v27 }
 0x669   :  { %12940 = vmatmul.mubr.f32.gmra.mrb[112].mxu1 %v8538_v0  ;;  %v8540_v24 = vmax.f32 %v8508_v61, 0.0 }
 0x66a   :  { %v8539_v49 = vmax.f32 %v8507_v56, 0.0  ;;  %v12867_v30 = vpop.f32.mrb[84].mxu0 }
 0x66b   :  { %v8510_v6 = vadd.f32 %v12867_v30, %v18670_v40  ;;  %v8391_v22 = vpop.f32.mrb[85].mxu0 }
 0x66c   :  { %v8509_v21 = vadd.f32 %v18670_v40, %v8391_v22  ;;  %12942 = vmatprep.mubr.f32.mxu1 %v8539_v49 }
 0x66d   :  { %12943 = vmatmul.mubr.f32.gmra.mrb[114].mxu1 %v8540_v24  ;;  %v8542_v34 = vmax.f32 %v8510_v6, 0.0 }
 0x66e   :  { %v8541_v47 = vmax.f32 %v8509_v21, 0.0  ;;  %v12870_v52 = vpop.f32.mrb[86].mxu0 }
 0x66f   :  { %v8512_v35 = vadd.f32 %v12870_v52, %v18670_v40  ;;  %v8401_v46 = vpop.f32.mrb[87].mxu0 }
 0x670   :  { %v8511_v14 = vadd.f32 %v18670_v40, %v8401_v46  ;;  %12945 = vmatprep.mubr.f32.mxu1 %v8541_v47 }
 0x671   :  { %12946 = vmatmul.mubr.f32.gmra.mrb[116].mxu1 %v8542_v34  ;;  %v8544_v17 = vmax.f32 %v8512_v35, 0.0 }
 0x672   :  { %v8543_v29 = vmax.f32 %v8511_v14, 0.0  ;;  %v12873_v25 = vpop.f32.mrb[88].mxu0 }
 0x673   :  { %v8514_v32 = vadd.f32 %v12873_v25, %v18670_v40  ;;  %v8411_v3 = vpop.f32.mrb[89].mxu0 }
 0x674   :  { %v8513_v16 = vadd.f32 %v18670_v40, %v8411_v3  ;;  %12948 = vmatprep.mubr.f32.mxu1 %v8543_v29 }
 0x675   :  { %12949 = vmatmul.mubr.f32.gmra.mrb[118].mxu1 %v8544_v17  ;;  %v8546_v55 = vmax.f32 %v8514_v32, 0.0 }
 0x676   :  { %v8545_v59 = vmax.f32 %v8513_v16, 0.0  ;;  %v12876_v18 = vpop.f32.mrb[90].mxu0 }
 0x677   :  { %v8516_v41 = vadd.f32 %v12876_v18, %v18670_v40  ;;  %v8421_v62 = vpop.f32.mrb[91].mxu0 }
 0x678   :  { %v8515_v28 = vadd.f32 %v18670_v40, %v8421_v62  ;;  %12951 = vmatprep.mubr.f32.mxu1 %v8545_v59 }
 0x679   :  { %12952 = vmatmul.mubr.f32.gmra.mrb[120].mxu1 %v8546_v55  ;;  %v8548_v31 = vmax.f32 %v8516_v41, 0.0 }
 0x67a   :  { %v8547_v60 = vmax.f32 %v8515_v28, 0.0  ;;  %v12879_v1 = vpop.f32.mrb[92].mxu0 }
 0x67b   :  { %v8518_v15 = vadd.f32 %v12879_v1, %v18670_v40  ;;  %v8431_v7 = vpop.f32.mrb[93].mxu0 }
 0x67c   :  { %v8517_v5 = vadd.f32 %v18670_v40, %v8431_v7  ;;  %12954 = vmatprep.mubr.f32.mxu1 %v8547_v60 }
 0x67d   :  { %12955 = vmatmul.mubr.f32.gmra.mrb[122].mxu1 %v8548_v31  ;;  %v8550_v19 = vmax.f32 %v8518_v15, 0.0 }
 0x67e   :  { %v8549_v39 = vmax.f32 %v8517_v5, 0.0  ;;  %v12882_v37 = vpop.f32.mrb[94].mxu0 }
 0x67f   :  { %v8520_v42 = vadd.f32 %v12882_v37, %v18670_v40  ;;  %v8441_v63 = vpop.f32.mrb[95].mxu0 }
 0x680   :  { %v8519_v54 = vadd.f32 %v18670_v40, %v8441_v63  ;;  %12957 = vmatprep.mubr.f32.mxu1 %v8549_v39  ;;  %v18714_v40 = vld [vmem:[%s18789_s10] ss:$0 sm:$0xff] }
 0x681   :  { %12958 = vmatmul.mubr.f32.gmra.mrb[124].mxu1 %v8550_v19  ;;  %v8552_v11 = vmax.f32 %v8520_v42, 0.0 }
 0x682   :  { %v8551_v33 = vmax.f32 %v8519_v54, 0.0 }
 0x684   :  { %12960 = vmatprep.mubr.f32.mxu1 %v8551_v33 }
 0x685   :  { %12961 = vmatmul.mubr.f32.gmra.mrb[126].mxu1 %v8552_v11 }
 0x686   :  { %9958 = vmatprep.mubr.msk.f32.mxu1 %vm8838_vm10, %v14228_v9 }
 0x71c   :  { %v12917_v8 = vpop.f32.mrb[96].mxu1 }
 0x71d   :  { %v8648_v43 = vadd.f32 %v12917_v8, %v18714_v40  ;;  %v8642_v45 = vpop.f32.mrb[97].mxu1 }
 0x71e   :  { %v8643_v10 = vadd.f32 %v18714_v40, %v8642_v45 }
 0x71f   :  { %v8802_v58 = vmax.f32 %v8648_v43, 0.0 }
 0x720   :  { %v8801_v20 = vmax.f32 %v8643_v10, 0.0  ;;  %v12920_v26 = vpop.f32.mrb[98].mxu1 }
 0x721   :  { %v8658_v12 = vadd.f32 %v12920_v26, %v18714_v40  ;;  %v8652_v44 = vpop.f32.mrb[99].mxu1 }
 0x722   :  { %v18719_v36 = vpack.c.bf16 %v8802_v58, %v8801_v20  ;;  %v8653_v51 = vadd.f32 %v18714_v40, %v8652_v44 }
 0x723   :  { %v8804_v23 = vmax.f32 %v8658_v12, 0.0 }
 0x724   :  { %v8803_v38 = vmax.f32 %v8653_v51, 0.0  ;;  %v12923_v27 = vpop.f32.mrb[100].mxu1 }
 0x725   :  { %v8668_v53 = vadd.f32 %v12923_v27, %v18714_v40  ;;  %v8662_v0 = vpop.f32.mrb[101].mxu1 }
 0x726   :  { %v18723_v61 = vpack.c.bf16 %v8804_v23, %v8803_v38  ;;  %v8663_v13 = vadd.f32 %v18714_v40, %v8662_v0 }
 0x727   :  { %v8806_v56 = vmax.f32 %v8668_v53, 0.0 }
 0x728   :  { %v8805_v49 = vmax.f32 %v8663_v13, 0.0  ;;  %v12926_v30 = vpop.f32.mrb[102].mxu1 }
 0x729   :  { %v8678_v24 = vadd.f32 %v12926_v30, %v18714_v40  ;;  %v8672_v6 = vpop.f32.mrb[103].mxu1 }
 0x72a   :  { %v18727_v22 = vpack.c.bf16 %v8806_v56, %v8805_v49  ;;  %v8673_v21 = vadd.f32 %v18714_v40, %v8672_v6 }
 0x72b   :  { %v8808_v47 = vmax.f32 %v8678_v24, 0.0 }
 0x72c   :  { %v8807_v52 = vmax.f32 %v8673_v21, 0.0  ;;  %v12929_v34 = vpop.f32.mrb[104].mxu1 }
 0x72d   :  { %v8688_v35 = vadd.f32 %v12929_v34, %v18714_v40  ;;  %v8682_v46 = vpop.f32.mrb[105].mxu1 }
 0x72e   :  { %v18731_v14 = vpack.c.bf16 %v8808_v47, %v8807_v52  ;;  %v8683_v29 = vadd.f32 %v18714_v40, %v8682_v46 }
 0x72f   :  { %v8810_v25 = vmax.f32 %v8688_v35, 0.0 }
 0x730   :  { %v8809_v17 = vmax.f32 %v8683_v29, 0.0  ;;  %v12932_v32 = vpop.f32.mrb[106].mxu1 }
 0x731   :  { %v8698_v3 = vadd.f32 %v12932_v32, %v18714_v40  ;;  %v8692_v16 = vpop.f32.mrb[107].mxu1 }
 0x732   :  { %v18735_v59 = vpack.c.bf16 %v8810_v25, %v8809_v17  ;;  %v8693_v18 = vadd.f32 %v18714_v40, %v8692_v16 }
 0x733   :  { %v8812_v55 = vmax.f32 %v8698_v3, 0.0 }
 0x734   :  { %v8811_v41 = vmax.f32 %v8693_v18, 0.0  ;;  %v12935_v62 = vpop.f32.mrb[108].mxu1 }
 0x735   :  { %v8708_v28 = vadd.f32 %v12935_v62, %v18714_v40  ;;  %v8702_v60 = vpop.f32.mrb[109].mxu1 }
 0x736   :  { %v18739_v1 = vpack.c.bf16 %v8812_v55, %v8811_v41  ;;  %v8703_v31 = vadd.f32 %v18714_v40, %v8702_v60 }
 0x737   :  { %v8814_v15 = vmax.f32 %v8708_v28, 0.0 }
 0x738   :  { %v8813_v7 = vmax.f32 %v8703_v31, 0.0  ;;  %v12938_v5 = vpop.f32.mrb[110].mxu1 }
 0x739   :  { %v8718_v39 = vadd.f32 %v12938_v5, %v18714_v40  ;;  %v8712_v37 = vpop.f32.mrb[111].mxu1 }
 0x73a   :  { %v18743_v19 = vpack.c.bf16 %v8814_v15, %v8813_v7  ;;  %v8713_v42 = vadd.f32 %v18714_v40, %v8712_v37 }
 0x73b   :  { %v8816_v63 = vmax.f32 %v8718_v39, 0.0 }
 0x73c   :  { %v8815_v54 = vmax.f32 %v8713_v42, 0.0  ;;  %v12941_v33 = vpop.f32.mrb[112].mxu1 }
 0x73d   :  { %v8728_v11 = vadd.f32 %v12941_v33, %v18714_v40  ;;  %v8722_v48 = vpop.f32.mrb[113].mxu1 }
 0x73e   :  { %v18747_v2 = vpack.c.bf16 %v8816_v63, %v8815_v54  ;;  %v8723_v4 = vadd.f32 %v18714_v40, %v8722_v48 }
 0x73f   :  { %v8818_v57 = vmax.f32 %v8728_v11, 0.0 }
 0x740   :  { %v8817_v8 = vmax.f32 %v8723_v4, 0.0  ;;  %v12944_v43 = vpop.f32.mrb[114].mxu1 }
 0x741   :  { %v8738_v45 = vadd.f32 %v12944_v43, %v18714_v40  ;;  %v8732_v10 = vpop.f32.mrb[115].mxu1 }
 0x742   :  { %v13535_v58 = vpack.c.bf16 %v8818_v57, %v8817_v8  ;;  %v8733_v20 = vadd.f32 %v18714_v40, %v8732_v10 }
 0x743   :  { %v8820_v26 = vmax.f32 %v8738_v45, 0.0 }
 0x744   :  { %v8819_v12 = vmax.f32 %v8733_v20, 0.0  ;;  %v12947_v44 = vpop.f32.mrb[116].mxu1  ;;  %13536 = vmatprep.subr.bf16.mxu1 %v13535_v58 }
 0x745   :  { %v8748_v51 = vadd.f32 %v12947_v44, %v18714_v40  ;;  %v8742_v23 = vpop.f32.mrb[117].mxu1  ;;  %13538 = vmatpush3.bf16.msra.mxu1 %v18719_v36 }
 0x746   :  { %v13539_v38 = vpack.c.bf16 %v8820_v26, %v8819_v12  ;;  %v8743_v27 = vadd.f32 %v18714_v40, %v8742_v23 }
 0x747   :  { %v8822_v53 = vmax.f32 %v8748_v51, 0.0 }
 0x748   :  { %v8821_v0 = vmax.f32 %v8743_v27, 0.0  ;;  %v12950_v13 = vpop.f32.mrb[118].mxu1  ;;  %13540 = vmatprep.subr.bf16.mxu1 %v13539_v38 }
 0x749   :  { %v8758_v56 = vadd.f32 %v12950_v13, %v18714_v40  ;;  %v8752_v49 = vpop.f32.mrb[119].mxu1  ;;  %13542 = vmatpush3.bf16.msra.mxu1 %v18723_v61 }
 0x74a   :  { %v13543_v30 = vpack.c.bf16 %v8822_v53, %v8821_v0  ;;  %v8753_v24 = vadd.f32 %v18714_v40, %v8752_v49 }
 0x74b   :  { %v8824_v6 = vmax.f32 %v8758_v56, 0.0 }
 0x74c   :  { %v8823_v21 = vmax.f32 %v8753_v24, 0.0  ;;  %v12953_v47 = vpop.f32.mrb[120].mxu1  ;;  %13544 = vmatprep.subr.bf16.mxu1 %v13543_v30 }
 0x74d   :  { %v8768_v36 = vadd.f32 %v12953_v47, %v18714_v40  ;;  %v8762_v52 = vpop.f32.mrb[121].mxu1  ;;  %13546 = vmatpush3.bf16.msra.mxu1 %v18727_v22 }
 0x74e   :  { %v13547_v34 = vpack.c.bf16 %v8824_v6, %v8823_v21  ;;  %v8763_v35 = vadd.f32 %v18714_v40, %v8762_v52 }
 0x74f   :  { %v8826_v46 = vmax.f32 %v8768_v36, 0.0 }
 0x750   :  { %v8825_v29 = vmax.f32 %v8763_v35, 0.0  ;;  %v12956_v25 = vpop.f32.mrb[122].mxu1  ;;  %13548 = vmatprep.subr.bf16.mxu1 %v13547_v34 }
 0x751   :  { %v8778_v61 = vadd.f32 %v12956_v25, %v18714_v40  ;;  %v8772_v17 = vpop.f32.mrb[123].mxu1  ;;  %13550 = vmatpush3.bf16.msra.mxu1 %v18731_v14 }
 0x752   :  { %v13551_v32 = vpack.c.bf16 %v8826_v46, %v8825_v29  ;;  %v8773_v3 = vadd.f32 %v18714_v40, %v8772_v17 }
 0x753   :  { %v8828_v16 = vmax.f32 %v8778_v61, 0.0 }
 0x754   :  { %v8827_v18 = vmax.f32 %v8773_v3, 0.0  ;;  %v12959_v55 = vpop.f32.mrb[124].mxu1  ;;  %13552 = vmatprep.subr.bf16.mxu1 %v13551_v32 }
 0x755   :  { %v8788_v22 = vadd.f32 %v12959_v55, %v18714_v40  ;;  %v8782_v41 = vpop.f32.mrb[125].mxu1  ;;  %13554 = vmatpush3.bf16.msra.mxu1 %v18735_v59 }
 0x756   :  { %v13555_v62 = vpack.c.bf16 %v8828_v16, %v8827_v18  ;;  %v8783_v28 = vadd.f32 %v18714_v40, %v8782_v41 }
 0x757   :  { %v8830_v60 = vmax.f32 %v8788_v22, 0.0 }
 0x758   :  { %v8829_v31 = vmax.f32 %v8783_v28, 0.0  ;;  %v12962_v15 = vpop.f32.mrb[126].mxu1  ;;  %13556 = vmatprep.subr.bf16.mxu1 %v13555_v62 }
 0x759   :  { %v8798_v14 = vadd.f32 %v12962_v15, %v18714_v40  ;;  %v8792_v7 = vpop.f32.mrb[127].mxu1  ;;  %13558 = vmatpush3.bf16.msra.mxu1 %v18739_v1 }
 0x75a   :  { %v13559_v5 = vpack.c.bf16 %v8830_v60, %v8829_v31  ;;  %v8793_v39 = vadd.f32 %v18714_v40, %v8792_v7 }
 0x75b   :  { %v8832_v37 = vmax.f32 %v8798_v14, 0.0 }
 0x75c   :  { %v8831_v42 = vmax.f32 %v8793_v39, 0.0  ;;  %13560 = vmatprep.subr.bf16.mxu1 %v13559_v5 }
 0x75d   :  { %13562 = vmatpush3.bf16.msra.mxu1 %v18743_v19 }
 0x75e   :  { %v13563_v59 = vpack.c.bf16 %v8832_v37, %v8831_v42 }
 0x760   :  { %13564 = vmatprep.subr.bf16.mxu1 %v13563_v59 }
 0x761   :  { %13566 = vmatpush3.bf16.msra.mxu1 %v18747_v2 }
 0x764   :  { %9959 = vmatmul.mubr.msk.f32.vlgmr.msra.gmra.mrb[128].mxu1 %vm18706_vm9, %v14228_v9 }
 0x837   :  { %v11120_v63 = vpop.f32.mrb[128].mxu1 }
 0x838   :  { %v11121_v54 = vpop.f32.mrb[129].mxu1 }
 0x839   :  { %v11122_v33 = vadd.f32 %v11121_v54, %v11120_v63 }
 0x83b   :  { %8913 = vst.msk [vmem:[%s18790_s11] sm:$0xff] %vm3681_vm6, %v11122_v33 }

</bundles_post_ra>
